<compile_context>
chip_gen: v7x
topology: tpu7x:2x2x1
jax: 0.10.0
libtpu: 0.0.40
codegen_flags: <defaults>
</compile_context>

<pallas_src>
import jax
import jax.numpy as jnp
from jax.experimental import pallas as pl
from jax.experimental.pallas import tpu as pltpu

# ---------------------------------------------------------------------------
# Configuration (matches CNN1d_decoder(in_channels=128, n_classes=5,
#                                       n_conv=2, n_decoder=2, step=4))
# ---------------------------------------------------------------------------
IN_CHANNELS = 128
N_CLASSES = 5
STEP = 4
K = 5
PAD = K // 2                       # Conv1dAuto: floor(5/2) = 2 -> 'same' conv
EPS = 1e-5

BATCH = 2                          # batch_size argument of forward()
L_SEQ = 8                          # L = (B*L) // batch_size
H_SP = W_SP = 4                    # spatial dims of the 2-D input

C0 = IN_CHANNELS                   # 128
C1 = IN_CHANNELS // STEP           # 32  (conv block 1 out)
C2 = IN_CHANNELS // STEP ** 2      # 8   (conv block 2 out)
H1 = IN_CHANNELS // STEP ** 3      # 2   (hidden linear)

VEC_ROWS = 56                      # packed small-parameter slab rows (multiple of 8)


# ---------------------------------------------------------------------------
# In-kernel helpers
# ---------------------------------------------------------------------------
def _conv_taps_combine(z, cout, bsz, lb):
    """z: (L*B, K*cout) stacked-tap conv partials, rows ordered r = l*B + b.

    Returns the zero-padded 'same' Conv1d output (L*B, cout):
        out[r] = sum_k z[r + (k - PAD)*B, k*cout:(k+1)*cout]   (0 outside [0, L*B)).
    Each non-center tap is aligned with an XLU sublane roll + a boundary mask.
    """
    row = jax.lax.broadcasted_iota(jnp.int32, (lb, cout), 0)
    acc = z[:, PAD * cout:(PAD + 1) * cout]            # center tap, no shift
    for k in range(K):
        d = k - PAD
        if d == 0:
            continue
        slab = z[:, k * cout:(k + 1) * cout]
        # want contribution[r] = slab[r + d*B]  ->  roll by -d*B (mod L*B)
        rolled = pltpu.roll(slab, shift=(-d * bsz) % lb, axis=0)
        if d > 0:
            valid = row < (lb - d * bsz)               # zero rows wrapped from front
        else:
            valid = row >= (-d * bsz)                  # zero rows wrapped from back
        acc = acc + jnp.where(valid, rolled, 0.0)
    return acc


def _bn_relu(y, gamma, beta):
    """BatchNorm1d in training mode (biased batch stats over batch*time), two-pass."""
    mu = jnp.mean(y, axis=0, keepdims=True)
    yc = y - mu
    var = jnp.mean(yc * yc, axis=0, keepdims=True)
    return jnp.maximum(yc * jax.lax.rsqrt(var + EPS) * gamma + beta, 0.0)


# ---------------------------------------------------------------------------
# Fused kernel: avgpool2d + 2x(conv1d+BN+ReLU) + avgpool1d + linear decoder
# ---------------------------------------------------------------------------
def _fused_decoder_kernel(x_ref,          # (L*B, C0, H*W)  spatial on lanes
                          w1_ref,         # (C0, K*C1) stacked-tap conv1 weight
                          vecs_ref,       # (56, 128)  packed small params
                          o_ref):         # (B, N_CLASSES)
    lb = x_ref.shape[0]                   # L * batch_size, rows ordered r = l*B + b
    bsz = o_ref.shape[0]
    lseq = lb // bsz

    # ---- unpack the packed small-parameter slab (static slices) ----
    w2 = vecs_ref[0:C1, 0:K * C2]                        # (32, 40) conv2 stacked weight
    b1 = vecs_ref[32:33, 0:C1]
    g1 = vecs_ref[33:34, 0:C1]
    be1 = vecs_ref[34:35, 0:C1]
    b2 = vecs_ref[35:36, 0:C2]
    g2 = vecs_ref[36:37, 0:C2]
    be2 = vecs_ref[37:38, 0:C2]
    bl1 = vecs_ref[38:39, 0:H1]
    bl2 = vecs_ref[39:40, 0:N_CLASSES]
    wl1 = vecs_ref[40:40 + C2, 0:H1]                     # (8, 2)  = linear1.weight.T
    wl2 = vecs_ref[48:48 + H1, 0:N_CLASSES]              # (2, 5)  = linear2.weight.T

    # ---- AdaptiveAvgPool2d((1,1)): spatial mean over the H*W (lane) axis ----
    pooled = jnp.mean(x_ref[...], axis=2)                # (L*B, C0)

    # ---- conv block 1: one stacked-tap matmul + XLU rolls, bias, BN, ReLU ----
    z1 = jnp.dot(pooled, w1_ref[...], preferred_element_type=jnp.float32)   # (L*B, K*C1)
    y1 = _bn_relu(_conv_taps_combine(z1, C1, bsz, lb) + b1, g1, be1)        # (L*B, C1)

    # ---- conv block 2 ----
    z2 = jnp.dot(y1, w2, preferred_element_type=jnp.float32)                # (L*B, K*C2)
    y2 = _bn_relu(_conv_taps_combine(z2, C2, bsz, lb) + b2, g2, be2)        # (L*B, C2)

    # ---- AdaptiveAvgPool1d(1): per-batch mean over time via selector matmul
    #      (batch b owns rows with r % B == b; avoids value reshapes/relayouts) ----
    rsel = jax.lax.broadcasted_iota(jnp.int32, (bsz, lb), 0)
    csel = jax.lax.broadcasted_iota(jnp.int32, (bsz, lb), 1)
    sel = jnp.where((csel % bsz) == rsel,
                    jnp.float32(1.0 / lseq), jnp.float32(0.0))
    pooled2 = jnp.dot(sel, y2, preferred_element_type=jnp.float32)          # (B, C2)

    # ---- Linear -> ReLU -> Linear ----
    h = jnp.maximum(
        jnp.dot(pooled2, wl1, preferred_element_type=jnp.float32) + bl1, 0.0)
    o_ref[...] = jnp.dot(h, wl2, preferred_element_type=jnp.float32) + bl2


# ---------------------------------------------------------------------------
# Parameter packing (PyTorch layout -> kernel layout), done once off hot path
# ---------------------------------------------------------------------------
def pack_params(pt_params):
    (c1w, c1b, g1, be1, c2w, c2b, g2, be2, l1w, l1b, l2w, l2b) = pt_params
    # conv weight (Cout, Cin, K) -> stacked-tap (Cin, K*Cout): W[:, k*Cout+o] = w[o,:,k]
    w1 = jnp.transpose(c1w, (1, 2, 0)).reshape(C0, K * C1).astype(jnp.float32)
    w2 = jnp.transpose(c2w, (1, 2, 0)).reshape(C1, K * C2).astype(jnp.float32)
    vecs = jnp.zeros((VEC_ROWS, 128), jnp.float32)
    vecs = vecs.at[0:C1, 0:K * C2].set(w2)
    vecs = vecs.at[32, :C1].set(c1b).at[33, :C1].set(g1).at[34, :C1].set(be1)
    vecs = vecs.at[35, :C2].set(c2b).at[36, :C2].set(g2).at[37, :C2].set(be2)
    vecs = vecs.at[38, :H1].set(l1b).at[39, :N_CLASSES].set(l2b)
    vecs = vecs.at[40:40 + C2, :H1].set(l1w.T)                 # (C2, H1)
    vecs = vecs.at[48:48 + H1, :N_CLASSES].set(l2w.T)          # (H1, N_CLASSES)
    return w1, vecs


def cnn1d_decoder_forward(x, packed, batch_size):
    """x: (L*B, C, H, W) float32 (PyTorch NCHW). Returns (batch_size, n_classes)."""
    BL, C, Hh, Ww = x.shape
    # Pure (no-copy) reshape; no transpose glue. Everything else (pool, convs, BN,
    # ReLU, pools, linears) runs inside ONE pallas_call.
    xr = x.reshape(BL, C, Hh * Ww)
    w1, vecs = packed
    return pl.pallas_call(
        _fused_decoder_kernel,
        out_shape=jax.ShapeDtypeStruct((batch_size, N_CLASSES), jnp.float32),
    )(xr, w1, vecs)


# ---------------------------------------------------------------------------
# Pure-JAX reference (direct transcription of the PyTorch forward)
# ---------------------------------------------------------------------------
def reference_forward(x, pt_params, batch_size):
    (c1w, c1b, g1, be1, c2w, c2b, g2, be2, l1w, l1b, l2w, l2b) = pt_params
    BL, C, _, _ = x.shape
    L = BL // batch_size
    avg = x.mean(axis=(2, 3))                               # AdaptiveAvgPool2d
    u = avg.reshape(L, batch_size, C).transpose(1, 2, 0)    # (B, C, L)

    def conv1d_same(u, w, b):         # u: (B, Cin, L); w: (Cout, Cin, K)
        up = jnp.pad(u, ((0, 0), (0, 0), (PAD, PAD)))
        out = jnp.zeros((u.shape[0], w.shape[0], u.shape[2]), jnp.float32)
        for k in range(K):
            out = out + jnp.einsum('oi,bil->bol', w[:, :, k],
                                   up[:, :, k:k + u.shape[2]])
        return out + b.reshape(1, -1, 1)

    def bn_relu(u, g, be):            # BatchNorm1d (training) + ReLU
        mu = u.mean(axis=(0, 2), keepdims=True)
        var = ((u - mu) ** 2).mean(axis=(0, 2), keepdims=True)
        y = (u - mu) / jnp.sqrt(var + EPS)
        y = y * g.reshape(1, -1, 1) + be.reshape(1, -1, 1)
        return jnp.maximum(y, 0.0)

    y = bn_relu(conv1d_same(u, c1w, c1b), g1, be1)
    y = bn_relu(conv1d_same(y, c2w, c2b), g2, be2)
    pooled = y.mean(axis=2)                                 # AdaptiveAvgPool1d
    h = jnp.maximum(pooled @ l1w.T + l1b, 0.0)
    return h @ l2w.T + l2b


# ---------------------------------------------------------------------------
if __name__ == "__main__":
    key = jax.random.PRNGKey(0)
    ks = jax.random.split(key, 13)

    x = jax.random.normal(ks[0], (BATCH * L_SEQ, C0, H_SP, W_SP), jnp.float32)

    # Deterministic synthetic parameters in native PyTorch layouts.
    pt_params = (
        0.1 * jax.random.normal(ks[1], (C1, C0, K), jnp.float32),        # conv1.weight
        0.1 * jax.random.normal(ks[2], (C1,), jnp.float32),              # conv1.bias
        1.0 + 0.1 * jax.random.normal(ks[3], (C1,), jnp.float32),        # bn1.gamma
        0.1 * jax.random.normal(ks[4], (C1,), jnp.float32),              # bn1.beta
        0.1 * jax.random.normal(ks[5], (C2, C1, K), jnp.float32),        # conv2.weight
        0.1 * jax.random.normal(ks[6], (C2,), jnp.float32),              # conv2.bias
        1.0 + 0.1 * jax.random.normal(ks[7], (C2,), jnp.float32),        # bn2.gamma
        0.1 * jax.random.normal(ks[8], (C2,), jnp.float32),              # bn2.beta
        0.1 * jax.random.normal(ks[9], (H1, C2), jnp.float32),           # linear1.weight
        0.1 * jax.random.normal(ks[10], (H1,), jnp.float32),             # linear1.bias
        0.1 * jax.random.normal(ks[11], (N_CLASSES, H1), jnp.float32),   # linear2.weight
        0.1 * jax.random.normal(ks[12], (N_CLASSES,), jnp.float32),      # linear2.bias
    )

    packed = pack_params(pt_params)
    fwd = jax.jit(lambda xx, pp: cnn1d_decoder_forward(xx, pp, BATCH))
    out = jax.block_until_ready(fwd(x, packed))
    ref = reference_forward(x, pt_params, BATCH)

    assert out.shape == (BATCH, N_CLASSES), out.shape
    if not jnp.allclose(out, ref, rtol=2e-2, atol=2e-2):
        raise AssertionError(f"mismatch:\nkernel={out}\nref={ref}")

    print("KERNEL_OK")
</pallas_src>

<mosaic_0001>
module attributes {stable_mosaic.version = 11 : i64} {
  func.func @_fused_decoder_kernel(%arg0: memref<16x128x16xf32, #tpu.memory_space<vmem>>, %arg1: memref<128x160xf32, #tpu.memory_space<vmem>>, %arg2: memref<56x128xf32, #tpu.memory_space<vmem>>, %arg3: memref<2x5xf32, #tpu.memory_space<vmem>>) attributes {dimension_semantics = [], scalar_prefetch = 0 : i64, scratch_operands = 0 : i64, tpu.core_type = #tpu.core_type<tc>} {
    %c0 = arith.constant 0 : index
    %c0_0 = arith.constant 0 : index
    %0 = vector.load %arg2[%c0, %c0_0] : memref<56x128xf32, #tpu.memory_space<vmem>>, vector<32x40xf32>
    %c32 = arith.constant 32 : index
    %c0_1 = arith.constant 0 : index
    %1 = vector.load %arg2[%c32, %c0_1] : memref<56x128xf32, #tpu.memory_space<vmem>>, vector<1x32xf32>
    %c33 = arith.constant 33 : index
    %c0_2 = arith.constant 0 : index
    %2 = vector.load %arg2[%c33, %c0_2] : memref<56x128xf32, #tpu.memory_space<vmem>>, vector<1x32xf32>
    %c34 = arith.constant 34 : index
    %c0_3 = arith.constant 0 : index
    %3 = vector.load %arg2[%c34, %c0_3] : memref<56x128xf32, #tpu.memory_space<vmem>>, vector<1x32xf32>
    %c35 = arith.constant 35 : index
    %c0_4 = arith.constant 0 : index
    %4 = vector.load %arg2[%c35, %c0_4] : memref<56x128xf32, #tpu.memory_space<vmem>>, vector<1x8xf32>
    %c36 = arith.constant 36 : index
    %c0_5 = arith.constant 0 : index
    %5 = vector.load %arg2[%c36, %c0_5] : memref<56x128xf32, #tpu.memory_space<vmem>>, vector<1x8xf32>
    %c37 = arith.constant 37 : index
    %c0_6 = arith.constant 0 : index
    %6 = vector.load %arg2[%c37, %c0_6] : memref<56x128xf32, #tpu.memory_space<vmem>>, vector<1x8xf32>
    %c38 = arith.constant 38 : index
    %c0_7 = arith.constant 0 : index
    %7 = vector.load %arg2[%c38, %c0_7] : memref<56x128xf32, #tpu.memory_space<vmem>>, vector<1x2xf32>
    %c39 = arith.constant 39 : index
    %c0_8 = arith.constant 0 : index
    %8 = vector.load %arg2[%c39, %c0_8] : memref<56x128xf32, #tpu.memory_space<vmem>>, vector<1x5xf32>
    %c40 = arith.constant 40 : index
    %c0_9 = arith.constant 0 : index
    %9 = vector.load %arg2[%c40, %c0_9] : memref<56x128xf32, #tpu.memory_space<vmem>>, vector<8x2xf32>
    %c48 = arith.constant 48 : index
    %c0_10 = arith.constant 0 : index
    %10 = vector.load %arg2[%c48, %c0_10] : memref<56x128xf32, #tpu.memory_space<vmem>>, vector<2x5xf32>
    %c0_11 = arith.constant 0 : index
    %c0_12 = arith.constant 0 : index
    %c0_13 = arith.constant 0 : index
    %11 = vector.load %arg0[%c0_11, %c0_12, %c0_13] : memref<16x128x16xf32, #tpu.memory_space<vmem>>, vector<16x128x16xf32>
    %cst = arith.constant dense<0.000000e+00> : vector<16x128xf32>
    %12 = vector.multi_reduction <add>, %11, %cst [2] : vector<16x128x16xf32> to vector<16x128xf32>
    %cst_14 = arith.constant 1.600000e+01 : f32
    %13 = vector.broadcast %cst_14 : f32 to vector<16x128xf32>
    %14 = arith.divf %12, %13 : vector<16x128xf32>
    %c0_15 = arith.constant 0 : index
    %c0_16 = arith.constant 0 : index
    %15 = vector.load %arg1[%c0_15, %c0_16] : memref<128x160xf32, #tpu.memory_space<vmem>>, vector<128x160xf32>
    %cst_17 = arith.constant dense<0.000000e+00> : vector<16x160xf32>
    %16 = tpu.matmul %14, %15, %cst_17 {dimension_numbers = #tpu.dot_dimension_numbers<[1], [0], [0], [1], [0, 0, 1, 1], [], []>} : vector<16x128xf32>, vector<128x160xf32>, vector<16x160xf32> -> vector<16x160xf32>
    %17 = tpu.iota {dimensions = array<i32: 0>} : vector<16x32xi32>
    %18 = vector.extract_strided_slice %16 {offsets = [0, 64], sizes = [16, 32], strides = [1, 1]} : vector<16x160xf32> to vector<16x32xf32>
    %19 = vector.extract_strided_slice %16 {offsets = [0, 0], sizes = [16, 32], strides = [1, 1]} : vector<16x160xf32> to vector<16x32xf32>
    %c4_i32 = arith.constant 4 : i32
    %20 = tpu.dynamic_rotate %19 by %c4_i32 dim 0 : vector<16x32xf32>, i32 -> vector<16x32xf32>
    %c4_i32_18 = arith.constant 4 : i32
    %21 = vector.broadcast %c4_i32_18 : i32 to vector<16x32xi32>
    %22 = arith.cmpi sge, %17, %21 : vector<16x32xi32>
    %cst_19 = arith.constant 0.000000e+00 : f32
    %23 = vector.broadcast %cst_19 : f32 to vector<16x32xf32>
    %24 = arith.select %22, %20, %23 : vector<16x32xi1>, vector<16x32xf32>
    %25 = arith.addf %18, %24 : vector<16x32xf32>
    %26 = vector.extract_strided_slice %16 {offsets = [0, 32], sizes = [16, 32], strides = [1, 1]} : vector<16x160xf32> to vector<16x32xf32>
    %c2_i32 = arith.constant 2 : i32
    %27 = tpu.dynamic_rotate %26 by %c2_i32 dim 0 : vector<16x32xf32>, i32 -> vector<16x32xf32>
    %c2_i32_20 = arith.constant 2 : i32
    %28 = vector.broadcast %c2_i32_20 : i32 to vector<16x32xi32>
    %29 = arith.cmpi sge, %17, %28 : vector<16x32xi32>
    %cst_21 = arith.constant 0.000000e+00 : f32
    %30 = vector.broadcast %cst_21 : f32 to vector<16x32xf32>
    %31 = arith.select %29, %27, %30 : vector<16x32xi1>, vector<16x32xf32>
    %32 = arith.addf %25, %31 : vector<16x32xf32>
    %33 = vector.extract_strided_slice %16 {offsets = [0, 96], sizes = [16, 32], strides = [1, 1]} : vector<16x160xf32> to vector<16x32xf32>
    %c14_i32 = arith.constant 14 : i32
    %34 = tpu.dynamic_rotate %33 by %c14_i32 dim 0 : vector<16x32xf32>, i32 -> vector<16x32xf32>
    %c14_i32_22 = arith.constant 14 : i32
    %35 = vector.broadcast %c14_i32_22 : i32 to vector<16x32xi32>
    %36 = arith.cmpi slt, %17, %35 : vector<16x32xi32>
    %cst_23 = arith.constant 0.000000e+00 : f32
    %37 = vector.broadcast %cst_23 : f32 to vector<16x32xf32>
    %38 = arith.select %36, %34, %37 : vector<16x32xi1>, vector<16x32xf32>
    %39 = arith.addf %32, %38 : vector<16x32xf32>
    %40 = vector.extract_strided_slice %16 {offsets = [0, 128], sizes = [16, 32], strides = [1, 1]} : vector<16x160xf32> to vector<16x32xf32>
    %c12_i32 = arith.constant 12 : i32
    %41 = tpu.dynamic_rotate %40 by %c12_i32 dim 0 : vector<16x32xf32>, i32 -> vector<16x32xf32>
    %c12_i32_24 = arith.constant 12 : i32
    %42 = vector.broadcast %c12_i32_24 : i32 to vector<16x32xi32>
    %43 = arith.cmpi slt, %17, %42 : vector<16x32xi32>
    %cst_25 = arith.constant 0.000000e+00 : f32
    %44 = vector.broadcast %cst_25 : f32 to vector<16x32xf32>
    %45 = arith.select %43, %41, %44 : vector<16x32xi1>, vector<16x32xf32>
    %46 = arith.addf %39, %45 : vector<16x32xf32>
    %47 = vector.broadcast %1 : vector<1x32xf32> to vector<16x32xf32>
    %48 = arith.addf %46, %47 : vector<16x32xf32>
    %cst_26 = arith.constant dense<0.000000e+00> : vector<32xf32>
    %49 = vector.multi_reduction <add>, %48, %cst_26 [0] : vector<16x32xf32> to vector<32xf32>
    %50 = vector.shape_cast %49 : vector<32xf32> to vector<1x32xf32>
    %cst_27 = arith.constant 1.600000e+01 : f32
    %51 = vector.broadcast %cst_27 : f32 to vector<1x32xf32>
    %52 = arith.divf %50, %51 : vector<1x32xf32>
    %53 = vector.broadcast %52 : vector<1x32xf32> to vector<16x32xf32>
    %54 = arith.subf %48, %53 : vector<16x32xf32>
    %55 = arith.mulf %54, %54 : vector<16x32xf32>
    %cst_28 = arith.constant dense<0.000000e+00> : vector<32xf32>
    %56 = vector.multi_reduction <add>, %55, %cst_28 [0] : vector<16x32xf32> to vector<32xf32>
    %57 = vector.shape_cast %56 : vector<32xf32> to vector<1x32xf32>
    %cst_29 = arith.constant 1.600000e+01 : f32
    %58 = vector.broadcast %cst_29 : f32 to vector<1x32xf32>
    %59 = arith.divf %57, %58 : vector<1x32xf32>
    %cst_30 = arith.constant 9.99999974E-6 : f32
    %60 = vector.broadcast %cst_30 : f32 to vector<1x32xf32>
    %61 = arith.addf %59, %60 : vector<1x32xf32>
    %62 = math.rsqrt %61 : vector<1x32xf32>
    %63 = vector.broadcast %62 : vector<1x32xf32> to vector<16x32xf32>
    %64 = arith.mulf %54, %63 : vector<16x32xf32>
    %65 = vector.broadcast %2 : vector<1x32xf32> to vector<16x32xf32>
    %66 = arith.mulf %64, %65 : vector<16x32xf32>
    %67 = vector.broadcast %3 : vector<1x32xf32> to vector<16x32xf32>
    %68 = arith.addf %66, %67 : vector<16x32xf32>
    %cst_31 = arith.constant 0.000000e+00 : f32
    %69 = vector.broadcast %cst_31 : f32 to vector<16x32xf32>
    %70 = arith.maximumf %68, %69 : vector<16x32xf32>
    %cst_32 = arith.constant dense<0.000000e+00> : vector<16x40xf32>
    %71 = tpu.matmul %70, %0, %cst_32 {dimension_numbers = #tpu.dot_dimension_numbers<[1], [0], [0], [1], [0, 0, 1, 1], [], []>} : vector<16x32xf32>, vector<32x40xf32>, vector<16x40xf32> -> vector<16x40xf32>
    %72 = tpu.iota {dimensions = array<i32: 0>} : vector<16x8xi32>
    %73 = vector.extract_strided_slice %71 {offsets = [0, 16], sizes = [16, 8], strides = [1, 1]} : vector<16x40xf32> to vector<16x8xf32>
    %74 = vector.extract_strided_slice %71 {offsets = [0, 0], sizes = [16, 8], strides = [1, 1]} : vector<16x40xf32> to vector<16x8xf32>
    %c4_i32_33 = arith.constant 4 : i32
    %75 = tpu.dynamic_rotate %74 by %c4_i32_33 dim 0 : vector<16x8xf32>, i32 -> vector<16x8xf32>
    %c4_i32_34 = arith.constant 4 : i32
    %76 = vector.broadcast %c4_i32_34 : i32 to vector<16x8xi32>
    %77 = arith.cmpi sge, %72, %76 : vector<16x8xi32>
    %cst_35 = arith.constant 0.000000e+00 : f32
    %78 = vector.broadcast %cst_35 : f32 to vector<16x8xf32>
    %79 = arith.select %77, %75, %78 : vector<16x8xi1>, vector<16x8xf32>
    %80 = arith.addf %73, %79 : vector<16x8xf32>
    %81 = vector.extract_strided_slice %71 {offsets = [0, 8], sizes = [16, 8], strides = [1, 1]} : vector<16x40xf32> to vector<16x8xf32>
    %c2_i32_36 = arith.constant 2 : i32
    %82 = tpu.dynamic_rotate %81 by %c2_i32_36 dim 0 : vector<16x8xf32>, i32 -> vector<16x8xf32>
    %c2_i32_37 = arith.constant 2 : i32
    %83 = vector.broadcast %c2_i32_37 : i32 to vector<16x8xi32>
    %84 = arith.cmpi sge, %72, %83 : vector<16x8xi32>
    %cst_38 = arith.constant 0.000000e+00 : f32
    %85 = vector.broadcast %cst_38 : f32 to vector<16x8xf32>
    %86 = arith.select %84, %82, %85 : vector<16x8xi1>, vector<16x8xf32>
    %87 = arith.addf %80, %86 : vector<16x8xf32>
    %88 = vector.extract_strided_slice %71 {offsets = [0, 24], sizes = [16, 8], strides = [1, 1]} : vector<16x40xf32> to vector<16x8xf32>
    %c14_i32_39 = arith.constant 14 : i32
    %89 = tpu.dynamic_rotate %88 by %c14_i32_39 dim 0 : vector<16x8xf32>, i32 -> vector<16x8xf32>
    %c14_i32_40 = arith.constant 14 : i32
    %90 = vector.broadcast %c14_i32_40 : i32 to vector<16x8xi32>
    %91 = arith.cmpi slt, %72, %90 : vector<16x8xi32>
    %cst_41 = arith.constant 0.000000e+00 : f32
    %92 = vector.broadcast %cst_41 : f32 to vector<16x8xf32>
    %93 = arith.select %91, %89, %92 : vector<16x8xi1>, vector<16x8xf32>
    %94 = arith.addf %87, %93 : vector<16x8xf32>
    %95 = vector.extract_strided_slice %71 {offsets = [0, 32], sizes = [16, 8], strides = [1, 1]} : vector<16x40xf32> to vector<16x8xf32>
    %c12_i32_42 = arith.constant 12 : i32
    %96 = tpu.dynamic_rotate %95 by %c12_i32_42 dim 0 : vector<16x8xf32>, i32 -> vector<16x8xf32>
    %c12_i32_43 = arith.constant 12 : i32
    %97 = vector.broadcast %c12_i32_43 : i32 to vector<16x8xi32>
    %98 = arith.cmpi slt, %72, %97 : vector<16x8xi32>
    %cst_44 = arith.constant 0.000000e+00 : f32
    %99 = vector.broadcast %cst_44 : f32 to vector<16x8xf32>
    %100 = arith.select %98, %96, %99 : vector<16x8xi1>, vector<16x8xf32>
    %101 = arith.addf %94, %100 : vector<16x8xf32>
    %102 = vector.broadcast %4 : vector<1x8xf32> to vector<16x8xf32>
    %103 = arith.addf %101, %102 : vector<16x8xf32>
    %cst_45 = arith.constant dense<0.000000e+00> : vector<8xf32>
    %104 = vector.multi_reduction <add>, %103, %cst_45 [0] : vector<16x8xf32> to vector<8xf32>
    %105 = vector.shape_cast %104 : vector<8xf32> to vector<1x8xf32>
    %cst_46 = arith.constant 1.600000e+01 : f32
    %106 = vector.broadcast %cst_46 : f32 to vector<1x8xf32>
    %107 = arith.divf %105, %106 : vector<1x8xf32>
    %108 = vector.broadcast %107 : vector<1x8xf32> to vector<16x8xf32>
    %109 = arith.subf %103, %108 : vector<16x8xf32>
    %110 = arith.mulf %109, %109 : vector<16x8xf32>
    %cst_47 = arith.constant dense<0.000000e+00> : vector<8xf32>
    %111 = vector.multi_reduction <add>, %110, %cst_47 [0] : vector<16x8xf32> to vector<8xf32>
    %112 = vector.shape_cast %111 : vector<8xf32> to vector<1x8xf32>
    %cst_48 = arith.constant 1.600000e+01 : f32
    %113 = vector.broadcast %cst_48 : f32 to vector<1x8xf32>
    %114 = arith.divf %112, %113 : vector<1x8xf32>
    %cst_49 = arith.constant 9.99999974E-6 : f32
    %115 = vector.broadcast %cst_49 : f32 to vector<1x8xf32>
    %116 = arith.addf %114, %115 : vector<1x8xf32>
    %117 = math.rsqrt %116 : vector<1x8xf32>
    %118 = vector.broadcast %117 : vector<1x8xf32> to vector<16x8xf32>
    %119 = arith.mulf %109, %118 : vector<16x8xf32>
    %120 = vector.broadcast %5 : vector<1x8xf32> to vector<16x8xf32>
    %121 = arith.mulf %119, %120 : vector<16x8xf32>
    %122 = vector.broadcast %6 : vector<1x8xf32> to vector<16x8xf32>
    %123 = arith.addf %121, %122 : vector<16x8xf32>
    %cst_50 = arith.constant 0.000000e+00 : f32
    %124 = vector.broadcast %cst_50 : f32 to vector<16x8xf32>
    %125 = arith.maximumf %123, %124 : vector<16x8xf32>
    %126 = tpu.iota {dimensions = array<i32: 0>} : vector<2x16xi32>
    %127 = tpu.iota {dimensions = array<i32: 1>} : vector<2x16xi32>
    %c2_i32_51 = arith.constant 2 : i32
    %c0_i32 = arith.constant 0 : i32
    %128 = arith.cmpi eq, %c2_i32_51, %c0_i32 : i32
    %c1_i32 = arith.constant 1 : i32
    %129 = arith.select %128, %c1_i32, %c2_i32_51 : i32
    %130 = vector.broadcast %129 : i32 to vector<2x16xi32>
    %131 = arith.remsi %127, %130 : vector<2x16xi32>
    %c0_i32_52 = arith.constant 0 : i32
    %132 = vector.broadcast %c0_i32_52 : i32 to vector<2x16xi32>
    %133 = arith.cmpi ne, %131, %132 : vector<2x16xi32>
    %c0_i32_53 = arith.constant 0 : i32
    %134 = vector.broadcast %c0_i32_53 : i32 to vector<2x16xi32>
    %135 = arith.cmpi slt, %131, %134 : vector<2x16xi32>
    %c0_i32_54 = arith.constant 0 : i32
    %136 = arith.cmpi slt, %129, %c0_i32_54 : i32
    %137 = vector.broadcast %136 : i1 to vector<2x16xi1>
    %138 = vector.broadcast %137 : vector<2x16xi1> to vector<2x16xi1>
    %139 = arith.xori %135, %138 : vector<2x16xi1>
    %140 = arith.andi %139, %133 : vector<2x16xi1>
    %141 = vector.broadcast %129 : i32 to vector<2x16xi32>
    %142 = arith.addi %131, %141 : vector<2x16xi32>
    %143 = arith.select %140, %142, %131 : vector<2x16xi1>, vector<2x16xi32>
    %144 = arith.cmpi eq, %143, %126 : vector<2x16xi32>
    %cst_55 = arith.constant 1.250000e-01 : f32
    %cst_56 = arith.constant 0.000000e+00 : f32
    %145 = vector.broadcast %cst_55 : f32 to vector<2x16xf32>
    %146 = vector.broadcast %cst_56 : f32 to vector<2x16xf32>
    %147 = arith.select %144, %145, %146 : vector<2x16xi1>, vector<2x16xf32>
    %cst_57 = arith.constant dense<0.000000e+00> : vector<2x8xf32>
    %148 = tpu.matmul %147, %125, %cst_57 {dimension_numbers = #tpu.dot_dimension_numbers<[1], [0], [0], [1], [0, 0, 1, 1], [], []>} : vector<2x16xf32>, vector<16x8xf32>, vector<2x8xf32> -> vector<2x8xf32>
    %cst_58 = arith.constant dense<0.000000e+00> : vector<2x2xf32>
    %149 = tpu.matmul %148, %9, %cst_58 {dimension_numbers = #tpu.dot_dimension_numbers<[1], [0], [0], [1], [0, 0, 1, 1], [], []>} : vector<2x8xf32>, vector<8x2xf32>, vector<2x2xf32> -> vector<2x2xf32>
    %150 = vector.broadcast %7 : vector<1x2xf32> to vector<2x2xf32>
    %151 = arith.addf %149, %150 : vector<2x2xf32>
    %cst_59 = arith.constant 0.000000e+00 : f32
    %152 = vector.broadcast %cst_59 : f32 to vector<2x2xf32>
    %153 = arith.maximumf %151, %152 : vector<2x2xf32>
    %cst_60 = arith.constant dense<0.000000e+00> : vector<2x5xf32>
    %154 = tpu.matmul %153, %10, %cst_60 {dimension_numbers = #tpu.dot_dimension_numbers<[1], [0], [0], [1], [0, 0, 1, 1], [], []>} : vector<2x2xf32>, vector<2x5xf32>, vector<2x5xf32> -> vector<2x5xf32>
    %155 = vector.broadcast %8 : vector<1x5xf32> to vector<2x5xf32>
    %156 = arith.addf %154, %155 : vector<2x5xf32>
    %c0_61 = arith.constant 0 : index
    %c0_62 = arith.constant 0 : index
    %157 = vector.load %arg3[%c0_61, %c0_62] : memref<2x5xf32, #tpu.memory_space<vmem>>, vector<2x5xf32>
    tpu.vector_store %arg3[%c0_61, %c0_62], %156 {strides = array<i32>} : memref<2x5xf32, #tpu.memory_space<vmem>>, vector<2x5xf32>,
    return
  }
}

</mosaic_0001>

<bundles_post_ra>
// kernel: _lambda_.1
= control target key start
LH: loop header
LB: loop body
LE: loop exit
PB: predicated region body
PF: predicated region fallthrough
CT: control target
= control target key end

     0   :  { %vm6244_vm0 = vcmask 130048   ;;  %s6235_s0 = inlined_call_operand.vmem [shape: f32[16,128,16], index: 0, kind: input, shape index: {}]   ;;  %s6236_s1 = inlined_call_operand.vmem [shape: f32[128,160], index: 1, kind: input, shape index: {}]   ;;  %s6237_s2 = inlined_call_operand.vmem [shape: f32[56,128], index: 2, kind: input, shape index: {}]   ;;  %s6238_s3 = inlined_call_operand.hbm [shape: f32[2,5], index: 3, kind: output, shape index: {}]  }
   0x1   :  { %v45_v0 = vld [vmem:[%s6235_s0 + $0x80] sm:$0xff]  ;;  %v46_v2 = vld [vmem:[%s6235_s0 + $0x88] sm:$0xff]  ;;  %v47_v8 = vld [vmem:[%s6235_s0 + $0x90] sm:$0xff] }
   0x2   :  { %v29_v1 = vld [vmem:[%s6235_s0] sm:$0xff]  ;;  %v334_v3 = vsel %vm6244_vm0, %v45_v0, 0.0  ;;  %v30_v5 = vld [vmem:[%s6235_s0 + $0x8] sm:$0xff]  ;;  %v337_v6 = vsel %vm6244_vm0, %v46_v2, 0.0  ;;  %v31_v9 = vld [vmem:[%s6235_s0 + $0x10] sm:$0xff]  ;;  %v340_v10 = vsel %vm6244_vm0, %v47_v8, 0.0 }
   0x3   :  { %v286_v4 = vsel %vm6244_vm0, %v29_v1, 0.0  ;;  %335 = vadd.xlane.f32.xlu1 %v334_v3  ;;  %v289_v7 = vsel %vm6244_vm0, %v30_v5, 0.0  ;;  %v292_v11 = vsel %vm6244_vm0, %v31_v9, 0.0  ;;  %v62_v12 = vld [vmem:[%s6235_s0 + $0x108] sm:$0xff]  ;;  %v61_v13 = vld [vmem:[%s6235_s0 + $0x100] sm:$0xff]  ;;  %v48_v16 = vld [vmem:[%s6235_s0 + $0x98] sm:$0xff] }
   0x4   :  { %287 = vadd.xlane.f32.xlu0 %v286_v4  ;;  %v385_v14 = vsel %vm6244_vm0, %v62_v12, 0.0  ;;  %v382_v15 = vsel %vm6244_vm0, %v61_v13, 0.0  ;;  %v32_v17 = vld [vmem:[%s6235_s0 + $0x18] sm:$0xff]  ;;  %v343_v18 = vsel %vm6244_vm0, %v48_v16, 0.0  ;;  %v77_v20 = vld [vmem:[%s6235_s0 + $0x180] sm:$0xff]  ;;  %v63_v21 = vld [vmem:[%s6235_s0 + $0x110] sm:$0xff] }
   0x5   :  { %v295_v19 = vsel %vm6244_vm0, %v32_v17, 0.0  ;;  %v430_v22 = vsel %vm6244_vm0, %v77_v20, 0.0  ;;  %v388_v23 = vsel %vm6244_vm0, %v63_v21, 0.0  ;;  %v33_v24 = vld [vmem:[%s6235_s0 + $0x20] sm:$0xff]  ;;  %v78_v25 = vld [vmem:[%s6235_s0 + $0x188] sm:$0xff]  ;;  %v64_v28 = vld [vmem:[%s6235_s0 + $0x118] sm:$0xff] }
   0x6   :  { %v298_v26 = vsel %vm6244_vm0, %v33_v24, 0.0  ;;  %v433_v27 = vsel %vm6244_vm0, %v78_v25, 0.0  ;;  %v49_v29 = vld [vmem:[%s6235_s0 + $0xa0] sm:$0xff]  ;;  %v391_v30 = vsel %vm6244_vm0, %v64_v28, 0.0 }
   0x7   :  { %338 = vadd.xlane.f32.xlu1 %v337_v6  ;;  %v346_v31 = vsel %vm6244_vm0, %v49_v29, 0.0 }
   0x8   :  { %290 = vadd.xlane.f32.xlu0 %v289_v7 }
   0xb   :  { %341 = vadd.xlane.f32.xlu1 %v340_v10 }
   0xc   :  { %293 = vadd.xlane.f32.xlu0 %v292_v11 }
   0xf   :  { %386 = vadd.xlane.f32.xlu1 %v385_v14 }
  0x10   :  { %383 = vadd.xlane.f32.xlu0 %v382_v15 }
  0x13   :  { %344 = vadd.xlane.f32.xlu1 %v343_v18 }
  0x14   :  { %296 = vadd.xlane.f32.xlu0 %v295_v19 }
  0x17   :  { %431 = vadd.xlane.f32.xlu1 %v430_v22 }
  0x18   :  { %389 = vadd.xlane.f32.xlu0 %v388_v23 }
  0x1b   :  { %299 = vadd.xlane.f32.xlu1 %v298_v26 }
  0x1c   :  { %434 = vadd.xlane.f32.xlu0 %v433_v27 }
  0x1d   :  { %8 = vsyncpa [#allocation3], 0  ;;  %v93_v32 = vld [vmem:[%s6235_s0 + $0x200] sm:$0xff]  ;;  %v79_v33 = vld [vmem:[%s6235_s0 + $0x190] sm:$0xff]  ;;  %vm1610_vm1 = vcmask 130112   ;;  %vm1617_vm2 = vcmask 195712  }
  0x1e   :  { %v478_v34 = vsel %vm6244_vm0, %v93_v32, 0.0  ;;  %v436_v35 = vsel %vm6244_vm0, %v79_v33, 0.0  ;;  %v34_v36 = vld [vmem:[%s6235_s0 + $0x28] sm:$0xff]  ;;  %v65_v40 = vld [vmem:[%s6235_s0 + $0x120] sm:$0xff]  ;;  %v95_v44 = vld [vmem:[%s6235_s0 + $0x210] sm:$0xff]  ;;  %vm1624_vm3 = vcmask 261312  }
  0x1f   :  { %392 = vadd.xlane.f32.xlu1 %v391_v30  ;;  %v94_v37 = vld [vmem:[%s6235_s0 + $0x208] sm:$0xff]  ;;  %v301_v38 = vsel %vm6244_vm0, %v34_v36, 0.0  ;;  %v394_v42 = vsel %vm6244_vm0, %v65_v40, 0.0  ;;  %v80_v45 = vld [vmem:[%s6235_s0 + $0x198] sm:$0xff]  ;;  %v484_v46 = vsel %vm6244_vm0, %v95_v44, 0.0  ;;  %v109_v49 = vld [vmem:[%s6235_s0 + $0x280] sm:$0xff] }
  0x20   :  { %347 = vadd.xlane.f32.xlu0 %v346_v31  ;;  %v481_v39 = vsel %vm6244_vm0, %v94_v37, 0.0  ;;  %v50_v41 = vld [vmem:[%s6235_s0 + $0xa8] sm:$0xff]  ;;  %v439_v47 = vsel %vm6244_vm0, %v80_v45, 0.0  ;;  %v526_v51 = vsel %vm6244_vm0, %v109_v49, 0.0  ;;  %v157_v53 = vld [vmem:[%s6235_s0 + $0x400] sm:$0xff]  ;;  %v51_v60 = vld [vmem:[%s6235_s0 + $0xb0] sm:$0xff] }
  0x21   :  { %v349_v43 = vsel %vm6244_vm0, %v50_v41, 0.0  ;;  %v110_v48 = vld [vmem:[%s6235_s0 + $0x288] sm:$0xff]  ;;  %v670_v55 = vsel %vm6244_vm0, %v157_v53, 0.0  ;;  %v173_v57 = vld [vmem:[%s6235_s0 + $0x480] sm:$0xff]  ;;  %v35_v61 = vld [vmem:[%s6235_s0 + $0x30] sm:$0xff]  ;;  %v352_v62 = vsel %vm6244_vm0, %v51_v60, 0.0 }
  0x22   :  { %v529_v50 = vsel %vm6244_vm0, %v110_v48, 0.0  ;;  %v158_v52 = vld [vmem:[%s6235_s0 + $0x408] sm:$0xff]  ;;  %v718_v59 = vsel %vm6244_vm0, %v173_v57, 0.0  ;;  %v304_v63 = vsel %vm6244_vm0, %v35_v61, 0.0  ;;  %v81_v0 = vld [vmem:[%s6235_s0 + $0x1a0] sm:$0xff]  ;;  %v111_v4 = vld [vmem:[%s6235_s0 + $0x290] sm:$0xff] }
  0x23   :  { %479 = vadd.xlane.f32.xlu1 %v478_v34  ;;  %v673_v54 = vsel %vm6244_vm0, %v158_v52, 0.0  ;;  %v174_v56 = vld [vmem:[%s6235_s0 + $0x488] sm:$0xff]  ;;  %v442_v2 = vsel %vm6244_vm0, %v81_v0, 0.0  ;;  %v96_v5 = vld [vmem:[%s6235_s0 + $0x218] sm:$0xff]  ;;  %v532_v6 = vsel %vm6244_vm0, %v111_v4, 0.0  ;;  %v125_v9 = vld [vmem:[%s6235_s0 + $0x300] sm:$0xff] }
  0x24   :  { %437 = vadd.xlane.f32.xlu0 %v436_v35  ;;  %v721_v58 = vsel %vm6244_vm0, %v174_v56, 0.0  ;;  %v66_v1 = vld [vmem:[%s6235_s0 + $0x128] sm:$0xff]  ;;  %v487_v7 = vsel %vm6244_vm0, %v96_v5, 0.0  ;;  %v574_v11 = vsel %vm6244_vm0, %v125_v9, 0.0  ;;  %v175_v12 = vld [vmem:[%s6235_s0 + $0x490] sm:$0xff]  ;;  %v189_v17 = vld [vmem:[%s6235_s0 + $0x500] sm:$0xff] }
  0x25   :  { %v397_v3 = vsel %vm6244_vm0, %v66_v1, 0.0  ;;  %v126_v8 = vld [vmem:[%s6235_s0 + $0x308] sm:$0xff]  ;;  %v159_v13 = vld [vmem:[%s6235_s0 + $0x410] sm:$0xff]  ;;  %v724_v14 = vsel %vm6244_vm0, %v175_v12, 0.0  ;;  %v766_v19 = vsel %vm6244_vm0, %v189_v17, 0.0  ;;  %v52_v20 = vld [vmem:[%s6235_s0 + $0xb8] sm:$0xff] }
  0x26   :  { %v577_v10 = vsel %vm6244_vm0, %v126_v8, 0.0  ;;  %v676_v15 = vsel %vm6244_vm0, %v159_v13, 0.0  ;;  %v190_v16 = vld [vmem:[%s6235_s0 + $0x508] sm:$0xff]  ;;  %v36_v21 = vld [vmem:[%s6235_s0 + $0x38] sm:$0xff]  ;;  %v355_v22 = vsel %vm6244_vm0, %v52_v20, 0.0  ;;  %v67_v25 = vld [vmem:[%s6235_s0 + $0x130] sm:$0xff] }
  0x27   :  { %302 = vadd.xlane.f32.xlu1 %v301_v38  ;;  %v769_v18 = vsel %vm6244_vm0, %v190_v16, 0.0  ;;  %v307_v23 = vsel %vm6244_vm0, %v36_v21, 0.0  ;;  %v82_v24 = vld [vmem:[%s6235_s0 + $0x1a8] sm:$0xff]  ;;  %v400_v27 = vsel %vm6244_vm0, %v67_v25, 0.0  ;;  %v112_v28 = vld [vmem:[%s6235_s0 + $0x298] sm:$0xff]  ;;  %v97_v29 = vld [vmem:[%s6235_s0 + $0x220] sm:$0xff] }
  0x28   :  { %482 = vadd.xlane.f32.xlu0 %v481_v39  ;;  %v445_v26 = vsel %vm6244_vm0, %v82_v24, 0.0  ;;  %v535_v30 = vsel %vm6244_vm0, %v112_v28, 0.0  ;;  %v490_v31 = vsel %vm6244_vm0, %v97_v29, 0.0  ;;  %v141_v32 = vld [vmem:[%s6235_s0 + $0x380] sm:$0xff]  ;;  %v127_v33 = vld [vmem:[%s6235_s0 + $0x310] sm:$0xff]  ;;  %v160_v36 = vld [vmem:[%s6235_s0 + $0x418] sm:$0xff] }
  0x29   :  { %v622_v34 = vsel %vm6244_vm0, %v141_v32, 0.0  ;;  %v580_v35 = vsel %vm6244_vm0, %v127_v33, 0.0  ;;  %v142_v37 = vld [vmem:[%s6235_s0 + $0x388] sm:$0xff]  ;;  %v679_v38 = vsel %vm6244_vm0, %v160_v36, 0.0  ;;  %v191_v40 = vld [vmem:[%s6235_s0 + $0x510] sm:$0xff]  ;;  %v176_v41 = vld [vmem:[%s6235_s0 + $0x498] sm:$0xff] }
  0x2a   :  { %v625_v39 = vsel %vm6244_vm0, %v142_v37, 0.0  ;;  %v206_v44 = vld [vmem:[%s6235_s0 + $0x588] sm:$0xff]  ;;  %v205_v45 = vld [vmem:[%s6235_s0 + $0x580] sm:$0xff]  ;;  %v83_v52 = vld [vmem:[%s6235_s0 + $0x1b0] sm:$0xff]  ;;  %vm1631_vm4 = vcmask 326912   ;;  %vm1638_vm5 = vcmask 392512  }
  0x2b   :  { %395 = vadd.xlane.f32.xlu1 %v394_v42  ;;  %v772_v42 = vsel %vm6244_vm0, %v191_v40, 0.0  ;;  %v53_v48 = vld [vmem:[%s6235_s0 + $0xc0] sm:$0xff]  ;;  %v68_v53 = vld [vmem:[%s6235_s0 + $0x138] sm:$0xff]  ;;  %v98_v57 = vld [vmem:[%s6235_s0 + $0x228] sm:$0xff]  ;;  %vm1645_vm6 = vcmask 458112   ;;  %vm1652_vm7 = vcmask 523712  }
  0x2c   :  { %350 = vadd.xlane.f32.xlu0 %v349_v43  ;;  %v727_v43 = vsel %vm6244_vm0, %v176_v41, 0.0  ;;  %v37_v49 = vld [vmem:[%s6235_s0 + $0x40] sm:$0xff]  ;;  %v143_v60 = vld [vmem:[%s6235_s0 + $0x390] sm:$0xff]  ;;  %v128_v61 = vld [vmem:[%s6235_s0 + $0x318] sm:$0xff]  ;;  %vm1659_vm8 = vcmask 589312   ;;  %vm1666_vm9 = vcmask 654912  }
  0x2d   :  { %v113_v56 = vld [vmem:[%s6235_s0 + $0x2a0] sm:$0xff]  ;;  %v207_v4 = vld [vmem:[%s6235_s0 + $0x590] sm:$0xff]  ;;  %v192_v5 = vld [vmem:[%s6235_s0 + $0x518] sm:$0xff]  ;;  %vm1673_vm10 = vcmask 720512   ;;  %vm1680_vm11 = vcmask 786112   ;;  %vm1687_vm12 = vcmask 851712  }
  0x2e   :  { %v177_v0 = vld [vmem:[%s6235_s0 + $0x4a0] sm:$0xff]  ;;  %v222_v8 = vld [vmem:[%s6235_s0 + $0x608] sm:$0xff]  ;;  %vm1694_vm13 = vcmask 917312   ;;  %vm1701_vm14 = vcmask 982912   ;;  %vm1708_vm15 = vcmask 1048512   ;;  %s3794_s20 = smov 32  }
  0x2f   :  { %485 = vadd.xlane.f32.xlu1 %v484_v46  ;;  %v817_v46 = vsel %vm6244_vm0, %v206_v44, 0.0  ;;  %v161_v1 = vld [vmem:[%s6235_s0 + $0x420] sm:$0xff]  ;;  %v54_v12 = vld [vmem:[%s6235_s0 + $0xc8] sm:$0xff]  ;;  %s3795_s21 = smov 64   ;;  %s3796_s9 = smov 120  }
  0x30   :  { %440 = vadd.xlane.f32.xlu0 %v439_v47  ;;  %v814_v47 = vsel %vm6244_vm0, %v205_v45, 0.0  ;;  %v221_v9 = vld [vmem:[%s6235_s0 + $0x600] sm:$0xff]  ;;  %v38_v13 = vld [vmem:[%s6235_s0 + $0x48] sm:$0xff]  ;;  %s3797_s10 = smov 104   ;;  %s3798_s11 = smov 16  }
  0x31   :  { %v313_v16 = vsel %vm6244_vm0, %v38_v13, 0.0  ;;  %v129_v40 = vld [vmem:[%s6235_s0 + $0x320] sm:$0xff]  ;;  %s3801_s17 = smov 112   ;;  %s3802_s25 = smov [#allocation2]  }
  0x32   :  { %s3642_s26 = sshll.u32 %s3802_s25, 4  ;;  %s3643_s26 = int_to_ptr.vmem [resolvable:$true] %s3642_s26 }
  0x33   :  { %530 = vadd.xlane.f32.xlu1 %v529_v50  ;;  %v358_v50 = vsel %vm6244_vm0, %v53_v48, 0.0  ;;  %s3768_s27 = scalar_lea.vmem %s3643_s26, 32  ;;  %p3773_p1 = scmp.lt.s32.totalorder %s3643_s26, %s3643_s26 }
  0x34   :  { %527 = vadd.xlane.f32.xlu0 %v526_v51  ;;  %v310_v51 = vsel %vm6244_vm0, %v37_v49, 0.0  ;;  %v586_v49 = vsel %vm6244_vm0, %v129_v40, 0.0  ;;  %p3769_p0 = scmp.ne.s32.totalorder %s3643_s26, %s3768_s27  ;;  %p3774_p2 = scmp.lt.s32.totalorder %s3768_s27, %s3768_s27 }
  0x36   :  { %p3775_p3 = por %p3774_p2, %p3773_p1 }
  0x37   :  { %674 = vadd.xlane.f32.xlu1 %v673_v54  ;;  %v448_v54 = vsel %vm6244_vm0, %v83_v52, 0.0 }
  0x38   :  { %671 = vadd.xlane.f32.xlu0 %v670_v55  ;;  %v403_v55 = vsel %vm6244_vm0, %v68_v53, 0.0  ;;  %p3776_p4 = pnand %p3775_p3, %p3769_p0 }
  0x3b   :  { %722 = vadd.xlane.f32.xlu1 %v721_v58  ;;  %v538_v58 = vsel %vm6244_vm0, %v113_v56, 0.0 }
  0x3c   :  { %719 = vadd.xlane.f32.xlu0 %v718_v59  ;;  %v493_v59 = vsel %vm6244_vm0, %v98_v57, 0.0 }
  0x3f   :  { %353 = vadd.xlane.f32.xlu1 %v352_v62  ;;  %v628_v62 = vsel %vm6244_vm0, %v143_v60, 0.0 }
  0x40   :  { %305 = vadd.xlane.f32.xlu0 %v304_v63  ;;  %v583_v63 = vsel %vm6244_vm0, %v128_v61, 0.0 }
  0x43   :  { %443 = vadd.xlane.f32.xlu1 %v442_v2  ;;  %v730_v2 = vsel %vm6244_vm0, %v177_v0, 0.0 }
  0x44   :  { %398 = vadd.xlane.f32.xlu0 %v397_v3  ;;  %v682_v3 = vsel %vm6244_vm0, %v161_v1, 0.0 }
  0x47   :  { %533 = vadd.xlane.f32.xlu1 %v532_v6  ;;  %v820_v6 = vsel %vm6244_vm0, %v207_v4, 0.0  ;;  %v193_v4 = vld [vmem:[%s6235_s0 + $0x520] sm:$0xff] }
  0x48   :  { %488 = vadd.xlane.f32.xlu0 %v487_v7  ;;  %v775_v7 = vsel %vm6244_vm0, %v192_v5, 0.0 }
  0x4b   :  { %578 = vadd.xlane.f32.xlu1 %v577_v10  ;;  %v865_v10 = vsel %vm6244_vm0, %v222_v8, 0.0 }
  0x4c   :  { %575 = vadd.xlane.f32.xlu0 %v574_v11  ;;  %v862_v11 = vsel %vm6244_vm0, %v221_v9, 0.0 }
  0x4f   :  { %725 = vadd.xlane.f32.xlu1 %v724_v14  ;;  %v1599_v14 = vlaneseq }
  0x50   :  { %677 = vadd.xlane.f32.xlu0 %v676_v15  ;;  %v361_v15 = vsel %vm6244_vm0, %v54_v12, 0.0 }
  0x51   :  { %v4111_v17 = vand.u32 127, %v1599_v14  ;;  %v4119_v20 = vshrl.u32 %v1599_v14, 7 }
  0x53   :  { %770 = vadd.xlane.f32.xlu1 %v769_v18  ;;  %6245 = vst [vmem:[#allocation5_spill] sm:$0xff] %v4111_v17  ;;  %v84_v18 = vld [vmem:[%s6235_s0 + $0x1b8] sm:$0xff]  ;;  %6246 = vst [vmem:[#allocation6_spill] sm:$0xff] %v4119_v20  ;;  %v1605_v21 = vadd.s32 4294967288, %v4111_v17  ;;  %v4132_v28 = vsub.s32 %v4111_v17, %v4119_v20 }
  0x54   :  { %767 = vadd.xlane.f32.xlu0 %v766_v19  ;;  %v69_v19 = vld [vmem:[%s6235_s0 + $0x140] sm:$0xff]  ;;  %v451_v24 = vsel %vm6244_vm0, %v84_v18, 0.0 }
  0x55   :  { %v406_v25 = vsel %vm6244_vm0, %v69_v19, 0.0  ;;  %v4136_v32 = vsub.s32 %v1605_v21, %v4119_v20  ;;  %v1626_v21 = vadd.s32 4294967264, %v4111_v17 }
  0x57   :  { %356 = vadd.xlane.f32.xlu1 %v355_v22 }
  0x58   :  { %308 = vadd.xlane.f32.xlu0 %v307_v23 }
  0x5b   :  { %446 = vadd.xlane.f32.xlu1 %v445_v26  ;;  %v114_v26 = vld [vmem:[%s6235_s0 + $0x2a8] sm:$0xff] }
  0x5c   :  { %401 = vadd.xlane.f32.xlu0 %v400_v27  ;;  %v99_v27 = vld [vmem:[%s6235_s0 + $0x230] sm:$0xff] }
  0x5d   :  { %v496_v36 = vsel %vm6244_vm0, %v99_v27, 0.0 }
  0x5f   :  { %536 = vadd.xlane.f32.xlu1 %v535_v30  ;;  %v1612_v30 = vadd.s32 4294967280, %v4111_v17 }
  0x60   :  { %491 = vadd.xlane.f32.xlu0 %v490_v31 }
  0x63   :  { %623 = vadd.xlane.f32.xlu1 %v622_v34 }
  0x64   :  { %581 = vadd.xlane.f32.xlu0 %v580_v35  ;;  %v541_v35 = vsel %vm6244_vm0, %v114_v26, 0.0 }
  0x67   :  { %680 = vadd.xlane.f32.xlu1 %v679_v38 }
  0x68   :  { %626 = vadd.xlane.f32.xlu0 %v625_v39  ;;  %v144_v39 = vld [vmem:[%s6235_s0 + $0x398] sm:$0xff] }
  0x69   :  { %v631_v48 = vsel %vm6244_vm0, %v144_v39, 0.0 }
  0x6b   :  { %773 = vadd.xlane.f32.xlu1 %v772_v42  ;;  %v4148_v42 = vsub.s32 %v1612_v30, %v4119_v20  ;;  %v39_v30 = vld [vmem:[%s6235_s0 + $0x50] sm:$0xff] }
  0x6c   :  { %728 = vadd.xlane.f32.xlu0 %v727_v43 }
  0x6f   :  { %818 = vadd.xlane.f32.xlu1 %v817_v46 }
  0x70   :  { %815 = vadd.xlane.f32.xlu0 %v814_v47 }
  0x73   :  { %359 = vadd.xlane.f32.xlu1 %v358_v50 }
  0x74   :  { %311 = vadd.xlane.f32.xlu0 %v310_v51 }
  0x77   :  { %449 = vadd.xlane.f32.xlu1 %v448_v54  ;;  %v178_v54 = vld [vmem:[%s6235_s0 + $0x4a8] sm:$0xff] }
  0x78   :  { %404 = vadd.xlane.f32.xlu0 %v403_v55  ;;  %v162_v55 = vld [vmem:[%s6235_s0 + $0x428] sm:$0xff]  ;;  %v733_v61 = vsel %vm6244_vm0, %v178_v54, 0.0 }
  0x7b   :  { %539 = vadd.xlane.f32.xlu1 %v538_v58  ;;  %v1619_v58 = vadd.s32 4294967272, %v4111_v17 }
  0x7c   :  { %494 = vadd.xlane.f32.xlu0 %v493_v59 }
  0x7f   :  { %629 = vadd.xlane.f32.xlu1 %v628_v62  ;;  %v685_v62 = vsel %vm6244_vm0, %v162_v55, 0.0 }
  0x80   :  { %584 = vadd.xlane.f32.xlu0 %v583_v63 }
  0x83   :  { %731 = vadd.xlane.f32.xlu1 %v730_v2 }
  0x84   :  { %683 = vadd.xlane.f32.xlu0 %v682_v3  ;;  %v208_v3 = vld [vmem:[%s6235_s0 + $0x598] sm:$0xff] }
  0x87   :  { %821 = vadd.xlane.f32.xlu1 %v820_v6 }
  0x88   :  { %776 = vadd.xlane.f32.xlu0 %v775_v7  ;;  %v4179_v7 = vsub.s32 %v1619_v58, %v4119_v20  ;;  %v85_v58 = vld [vmem:[%s6235_s0 + $0x1c0] sm:$0xff] }
  0x8b   :  { %866 = vadd.xlane.f32.xlu1 %v865_v10  ;;  %v823_v10 = vsel %vm6244_vm0, %v208_v3, 0.0 }
  0x8c   :  { %863 = vadd.xlane.f32.xlu0 %v862_v11  ;;  %v778_v11 = vsel %vm6244_vm0, %v193_v4, 0.0 }
  0x8f   :  { %362 = vadd.xlane.f32.xlu1 %v361_v15  ;;  %v237_v15 = vld [vmem:[%s6235_s0 + $0x680] sm:$0xff] }
  0x90   :  { %314 = vadd.xlane.f32.xlu0 %v313_v16  ;;  %v336_v22 = vpop.xlane.xlu1 %335  ;;  %v223_v16 = vld [vmem:[%s6235_s0 + $0x610] sm:$0xff] }
  0x91   :  { %v288_v23 = vpop.xlane.xlu0 %287  ;;  %v1071_v29 = vmul.f32 0.0625, %v336_v22 }
  0x92   :  { %v1055_v31 = vmul.f32 0.0625, %v288_v23 }
  0x93   :  { %452 = vadd.xlane.f32.xlu1 %v451_v24  ;;  %v1713_v41 = vrot.slane %v1071_v29, %v4132_v28  ;;  %v910_v24 = vsel %vm6244_vm0, %v237_v15, 0.0 }
  0x94   :  { %407 = vadd.xlane.f32.xlu0 %v406_v25  ;;  %v339_v33 = vpop.xlane.xlu1 %338  ;;  %v1604_v43 = vrot.slane %v1055_v31, %v4132_v28  ;;  %v868_v25 = vsel %vm6244_vm0, %v223_v16, 0.0  ;;  %v238_v31 = vld [vmem:[%s6235_s0 + $0x688] sm:$0xff] }
  0x95   :  { %v291_v34 = vpop.xlane.xlu0 %290  ;;  %v1072_v37 = vmul.f32 0.0625, %v339_v33  ;;  %v913_v39 = vsel %vm6244_vm0, %v238_v31, 0.0 }
  0x96   :  { %v1056_v38 = vmul.f32 0.0625, %v291_v34 }
  0x97   :  { %v1717_v44 = vrot.slane %v1072_v37, %v4136_v32  ;;  %542 = vadd.xlane.f32.xlu1 %v541_v35  ;;  %v4205_v35 = vsub.s32 %v1626_v21, %v4119_v20  ;;  %v145_v21 = vld [vmem:[%s6235_s0 + $0x3a0] sm:$0xff] }
  0x98   :  { %v1609_v45 = vrot.slane %v1056_v38, %v4136_v32  ;;  %497 = vadd.xlane.f32.xlu0 %v496_v36  ;;  %v342_v46 = vpop.xlane.xlu1 %341  ;;  %v316_v38 = vsel %vm6244_vm0, %v39_v30, 0.0 }
  0x99   :  { %v294_v47 = vpop.xlane.xlu0 %293  ;;  %v1718_v50 = vsel %vm1610_vm1, %v1717_v44, %v1713_v41  ;;  %v1073_v52 = vmul.f32 0.0625, %v342_v46  ;;  %v70_v44 = vld [vmem:[%s6235_s0 + $0x148] sm:$0xff] }
  0x9a   :  { %v1611_v51 = vsel %vm1610_vm1, %v1609_v45, %v1604_v43  ;;  %v1057_v53 = vmul.f32 0.0625, %v294_v47  ;;  %v55_v45 = vld [vmem:[%s6235_s0 + $0xd0] sm:$0xff] }
  0x9b   :  { %v1722_v56 = vrot.slane %v1073_v52, %v4148_v42  ;;  %632 = vadd.xlane.f32.xlu1 %v631_v48  ;;  %v364_v52 = vsel %vm6244_vm0, %v55_v45, 0.0 }
  0x9c   :  { %v1616_v57 = vrot.slane %v1057_v53, %v4148_v42  ;;  %587 = vadd.xlane.f32.xlu0 %v586_v49  ;;  %v387_v59 = vpop.xlane.xlu1 %386 }
  0x9d   :  { %v384_v60 = vpop.xlane.xlu0 %383  ;;  %v1723_v63 = vsel %vm1617_vm2, %v1722_v56, %v1718_v50  ;;  %v1088_v1 = vmul.f32 0.0625, %v387_v59 }
  0x9e   :  { %v1618_v0 = vsel %vm1617_vm2, %v1616_v57, %v1611_v51  ;;  %v1087_v2 = vmul.f32 0.0625, %v384_v60  ;;  %v409_v51 = vsel %vm6244_vm0, %v70_v44, 0.0  ;;  %v100_v57 = vld [vmem:[%s6235_s0 + $0x238] sm:$0xff] }
  0x9f   :  { %v1796_v5 = vrot.slane %v1088_v1, %v4136_v32  ;;  %734 = vadd.xlane.f32.xlu1 %v733_v61  ;;  %v1633_v61 = vadd.s32 4294967256, %v4111_v17  ;;  %v454_v1 = vsel %vm6244_vm0, %v85_v58, 0.0 }
  0xa0   :  { %v1792_v6 = vrot.slane %v1087_v2, %v4132_v28  ;;  %686 = vadd.xlane.f32.xlu0 %v685_v62  ;;  %v345_v8 = vpop.xlane.xlu1 %344 }
  0xa1   :  { %v297_v9 = vpop.xlane.xlu0 %296  ;;  %v1074_v13 = vmul.f32 0.0625, %v345_v8 }
  0xa2   :  { %v1797_v12 = vsel %vm1610_vm1, %v1796_v5, %v1792_v6  ;;  %v1058_v14 = vmul.f32 0.0625, %v297_v9  ;;  %v130_v5 = vld [vmem:[%s6235_s0 + $0x328] sm:$0xff]  ;;  %v115_v6 = vld [vmem:[%s6235_s0 + $0x2b0] sm:$0xff] }
  0xa3   :  { %v1727_v18 = vrot.slane %v1074_v13, %v4179_v7  ;;  %824 = vadd.xlane.f32.xlu1 %v823_v10  ;;  %v4244_v10 = vsub.s32 %v1633_v61, %v4119_v20  ;;  %v589_v13 = vsel %vm6244_vm0, %v130_v5, 0.0  ;;  %v253_v61 = vld [vmem:[%s6235_s0 + $0x700] sm:$0xff] }
  0xa4   :  { %v1623_v19 = vrot.slane %v1058_v14, %v4179_v7  ;;  %779 = vadd.xlane.f32.xlu0 %v778_v11  ;;  %v432_v22 = vpop.xlane.xlu1 %431  ;;  %v544_v14 = vsel %vm6244_vm0, %v115_v6, 0.0 }
  0xa5   :  { %v390_v23 = vpop.xlane.xlu0 %389  ;;  %v1728_v26 = vsel %vm1624_vm3, %v1727_v18, %v1723_v63  ;;  %v1103_v33 = vmul.f32 0.0625, %v432_v22 }
  0xa6   :  { %v1625_v27 = vsel %vm1624_vm3, %v1623_v19, %v1618_v0  ;;  %v1089_v29 = vmul.f32 0.0625, %v390_v23  ;;  %v499_v0 = vsel %vm6244_vm0, %v100_v57, 0.0  ;;  %v163_v19 = vld [vmem:[%s6235_s0 + $0x430] sm:$0xff] }
  0xa7   :  { %911 = vadd.xlane.f32.xlu1 %v910_v24  ;;  %v1871_v46 = vrot.slane %v1103_v33, %v4132_v28 }
  0xa8   :  { %v1801_v34 = vrot.slane %v1089_v29, %v4148_v42  ;;  %869 = vadd.xlane.f32.xlu0 %v868_v25  ;;  %v300_v36 = vpop.xlane.xlu1 %299  ;;  %v634_v29 = vsel %vm6244_vm0, %v145_v21, 0.0 }
  0xa9   :  { %v435_v37 = vpop.xlane.xlu0 %434  ;;  %v1059_v41 = vmul.f32 0.0625, %v300_v36  ;;  %v194_v36 = vld [vmem:[%s6235_s0 + $0x528] sm:$0xff] }
  0xaa   :  { %v1802_v40 = vsel %vm1617_vm2, %v1801_v34, %v1797_v12  ;;  %v1104_v43 = vmul.f32 0.0625, %v435_v37  ;;  %v179_v37 = vld [vmem:[%s6235_s0 + $0x4b0] sm:$0xff] }
  0xab   :  { %v1630_v47 = vrot.slane %v1059_v41, %v4205_v35  ;;  %317 = vadd.xlane.f32.xlu1 %v316_v38  ;;  %v736_v44 = vsel %vm6244_vm0, %v179_v37, 0.0 }
  0xac   :  { %v1875_v48 = vrot.slane %v1104_v43, %v4136_v32  ;;  %914 = vadd.xlane.f32.xlu0 %v913_v39  ;;  %v393_v49 = vpop.xlane.xlu1 %392  ;;  %v781_v43 = vsel %vm6244_vm0, %v194_v36, 0.0 }
  0xad   :  { %v348_v50 = vpop.xlane.xlu0 %347  ;;  %v1632_v53 = vsel %vm1631_vm4, %v1630_v47, %v1625_v27  ;;  %v1090_v55 = vmul.f32 0.0625, %v393_v49  ;;  %v688_v27 = vsel %vm6244_vm0, %v163_v19, 0.0  ;;  %v224_v49 = vld [vmem:[%s6235_s0 + $0x618] sm:$0xff] }
  0xae   :  { %v1876_v54 = vsel %vm1610_vm1, %v1875_v48, %v1871_v46  ;;  %v1075_v56 = vmul.f32 0.0625, %v348_v50  ;;  %v209_v50 = vld [vmem:[%s6235_s0 + $0x5a0] sm:$0xff] }
  0xaf   :  { %v1806_v59 = vrot.slane %v1090_v55, %v4179_v7  ;;  %410 = vadd.xlane.f32.xlu1 %v409_v51  ;;  %v871_v55 = vsel %vm6244_vm0, %v224_v49, 0.0 }
  0xb0   :  { %v1732_v60 = vrot.slane %v1075_v56, %v4205_v35  ;;  %365 = vadd.xlane.f32.xlu0 %v364_v52  ;;  %v480_v62 = vpop.xlane.xlu1 %479  ;;  %v826_v56 = vsel %vm6244_vm0, %v209_v50, 0.0 }
  0xb1   :  { %v438_v63 = vpop.xlane.xlu0 %437  ;;  %v1807_v2 = vsel %vm1624_vm3, %v1806_v59, %v1802_v40  ;;  %v1119_v8 = vmul.f32 0.0625, %v480_v62  ;;  %v239_v62 = vld [vmem:[%s6235_s0 + $0x690] sm:$0xff] }
  0xb2   :  { %v1733_v3 = vsel %vm1631_vm4, %v1732_v60, %v1728_v26  ;;  %v1105_v4 = vmul.f32 0.0625, %v438_v63 }
  0xb3   :  { %500 = vadd.xlane.f32.xlu1 %v499_v0  ;;  %v1950_v22 = vrot.slane %v1119_v8, %v4132_v28 }
  0xb4   :  { %v1880_v9 = vrot.slane %v1105_v4, %v4148_v42  ;;  %455 = vadd.xlane.f32.xlu0 %v454_v1  ;;  %v303_v11 = vpop.xlane.xlu1 %302  ;;  %v916_v4 = vsel %vm6244_vm0, %v239_v62, 0.0 }
  0xb5   :  { %v483_v12 = vpop.xlane.xlu0 %482  ;;  %v1060_v16 = vmul.f32 0.0625, %v303_v11  ;;  %v254_v11 = vld [vmem:[%s6235_s0 + $0x708] sm:$0xff] }
  0xb6   :  { %v1881_v15 = vsel %vm1617_vm2, %v1880_v9, %v1876_v54  ;;  %v1120_v18 = vmul.f32 0.0625, %v483_v12  ;;  %v40_v9 = vld [vmem:[%s6235_s0 + $0x58] sm:$0xff]  ;;  %v961_v19 = vsel %vm6244_vm0, %v254_v11, 0.0 }
  0xb7   :  { %v1637_v23 = vrot.slane %v1060_v16, %v4244_v10  ;;  %590 = vadd.xlane.f32.xlu1 %v589_v13 }
  0xb8   :  { %v1954_v24 = vrot.slane %v1120_v18, %v4136_v32  ;;  %545 = vadd.xlane.f32.xlu0 %v544_v14  ;;  %v396_v25 = vpop.xlane.xlu1 %395  ;;  %v1640_v14 = vadd.s32 4294967248, %v4111_v17  ;;  %v319_v18 = vsel %vm6244_vm0, %v40_v9, 0.0 }
  0xb9   :  { %v351_v26 = vpop.xlane.xlu0 %350  ;;  %v4261_v30 = vsel %vm1638_vm5, %v1637_v23, %v1632_v53  ;;  %v1091_v33 = vmul.f32 0.0625, %v396_v25  ;;  %v56_v25 = vld [vmem:[%s6235_s0 + $0xd8] sm:$0xff] }
  0xba   :  { %v1955_v31 = vsel %vm1610_vm1, %v1954_v24, %v1950_v22  ;;  %v1076_v34 = vmul.f32 0.0625, %v351_v26  ;;  %v71_v24 = vld [vmem:[%s6235_s0 + $0x150] sm:$0xff]  ;;  %v367_v36 = vsel %vm6244_vm0, %v56_v25, 0.0 }
  0xbb   :  { %v1811_v38 = vrot.slane %v1091_v33, %v4205_v35  ;;  %689 = vadd.xlane.f32.xlu1 %v688_v27 }
  0xbc   :  { %v1737_v39 = vrot.slane %v1076_v34, %v4244_v10  ;;  %635 = vadd.xlane.f32.xlu0 %v634_v29  ;;  %v486_v40 = vpop.xlane.xlu1 %485  ;;  %v4332_v29 = vsub.s32 %v1640_v14, %v4119_v20  ;;  %v412_v34 = vsel %vm6244_vm0, %v71_v24, 0.0 }
  0xbd   :  { %v441_v41 = vpop.xlane.xlu0 %440  ;;  %v4275_v45 = vsel %vm1631_vm4, %v1811_v38, %v1807_v2  ;;  %v1121_v47 = vmul.f32 0.0625, %v486_v40  ;;  %v101_v40 = vld [vmem:[%s6235_s0 + $0x240] sm:$0xff] }
  0xbe   :  { %v4278_v46 = vsel %vm1638_vm5, %v1737_v39, %v1733_v3  ;;  %v1106_v48 = vmul.f32 0.0625, %v441_v41  ;;  %v958_v3 = vsel %vm6244_vm0, %v253_v61, 0.0  ;;  %v86_v41 = vld [vmem:[%s6235_s0 + $0x1c8] sm:$0xff]  ;;  %v502_v49 = vsel %vm6244_vm0, %v101_v40, 0.0 }
  0xbf   :  { %v1959_v51 = vrot.slane %v1121_v47, %v4148_v42  ;;  %782 = vadd.xlane.f32.xlu1 %v781_v43  ;;  %v457_v50 = vsel %vm6244_vm0, %v86_v41, 0.0 }
  0xc0   :  { %v1885_v52 = vrot.slane %v1106_v48, %v4179_v7  ;;  %737 = vadd.xlane.f32.xlu0 %v736_v44  ;;  %v531_v53 = vpop.xlane.xlu1 %530 }
  0xc1   :  { %v528_v54 = vpop.xlane.xlu0 %527  ;;  %v4291_v57 = vsel %vm1617_vm2, %v1959_v51, %v1955_v31  ;;  %v1136_v59 = vmul.f32 0.0625, %v531_v53 }
  0xc2   :  { %v4294_v58 = vsel %vm1624_vm3, %v1885_v52, %v1881_v15  ;;  %v1135_v60 = vmul.f32 0.0625, %v528_v54 }
  0xc3   :  { %v2033_v63 = vrot.slane %v1136_v59, %v4136_v32  ;;  %872 = vadd.xlane.f32.xlu1 %v871_v55  ;;  %v131_v55 = vld [vmem:[%s6235_s0 + $0x330] sm:$0xff] }
  0xc4   :  { %v2029_v0 = vrot.slane %v1135_v60, %v4132_v28  ;;  %827 = vadd.xlane.f32.xlu0 %v826_v56  ;;  %v675_v1 = vpop.xlane.xlu1 %674  ;;  %v116_v56 = vld [vmem:[%s6235_s0 + $0x2b8] sm:$0xff] }
  0xc5   :  { %v672_v2 = vpop.xlane.xlu0 %671  ;;  %v1184_v6 = vmul.f32 0.0625, %v675_v1  ;;  %v547_v62 = vsel %vm6244_vm0, %v116_v56, 0.0 }
  0xc6   :  { %v4307_v5 = vsel %vm1610_vm1, %v2033_v63, %v2029_v0  ;;  %v1183_v8 = vmul.f32 0.0625, %v672_v2 }
  0xc7   :  { %v2270_v12 = vrot.slane %v1184_v6, %v4136_v32  ;;  %959 = vadd.xlane.f32.xlu1 %v958_v3  ;;  %v164_v3 = vld [vmem:[%s6235_s0 + $0x438] sm:$0xff] }
  0xc8   :  { %v2266_v13 = vrot.slane %v1183_v8, %v4132_v28  ;;  %917 = vadd.xlane.f32.xlu0 %v916_v4  ;;  %v723_v15 = vpop.xlane.xlu1 %722  ;;  %v146_v4 = vld [vmem:[%s6235_s0 + $0x3a8] sm:$0xff] }
  0xc9   :  { %v720_v16 = vpop.xlane.xlu0 %719  ;;  %v1200_v22 = vmul.f32 0.0625, %v723_v15  ;;  %v637_v11 = vsel %vm6244_vm0, %v146_v4, 0.0 }
  0xca   :  { %v4321_v21 = vsel %vm1610_vm1, %v2270_v12, %v2266_v13  ;;  %v1199_v23 = vmul.f32 0.0625, %v720_v16  ;;  %v195_v16 = vld [vmem:[%s6235_s0 + $0x530] sm:$0xff] }
  0xcb   :  { %v2349_v26 = vrot.slane %v1200_v22, %v4136_v32  ;;  %320 = vadd.xlane.f32.xlu1 %v319_v18  ;;  %v180_v18 = vld [vmem:[%s6235_s0 + $0x4b8] sm:$0xff] }
  0xcc   :  { %v2345_v27 = vrot.slane %v1199_v23, %v4132_v28  ;;  %962 = vadd.xlane.f32.xlu0 %v961_v19  ;;  %v354_v31 = vpop.xlane.xlu1 %353  ;;  %v739_v24 = vsel %vm6244_vm0, %v180_v18, 0.0 }
  0xcd   :  { %v306_v33 = vpop.xlane.xlu0 %305  ;;  %v1077_v38 = vmul.f32 0.0625, %v354_v31  ;;  %v225_v31 = vld [vmem:[%s6235_s0 + $0x620] sm:$0xff] }
  0xce   :  { %v4337_v37 = vsel %vm1610_vm1, %v2349_v26, %v2345_v27  ;;  %v1061_v39 = vmul.f32 0.0625, %v306_v33  ;;  %v210_v33 = vld [vmem:[%s6235_s0 + $0x5a8] sm:$0xff]  ;;  %v874_v41 = vsel %vm6244_vm0, %v225_v31, 0.0  ;;  %v72_v31 = vld [vmem:[%s6235_s0 + $0x158] sm:$0xff] }
  0xcf   :  { %v1742_v43 = vrot.slane %v1077_v38, %v4332_v29  ;;  %413 = vadd.xlane.f32.xlu1 %v412_v34  ;;  %v1647_v38 = vadd.s32 4294967240, %v4111_v17 }
  0xd0   :  { %v1644_v44 = vrot.slane %v1061_v39, %v4332_v29  ;;  %368 = vadd.xlane.f32.xlu0 %v367_v36  ;;  %v444_v47 = vpop.xlane.xlu1 %443 }
  0xd1   :  { %v399_v48 = vpop.xlane.xlu0 %398  ;;  %v4351_v51 = vsel %vm1645_vm6, %v1742_v43, %v4278_v46  ;;  %v1107_v53 = vmul.f32 0.0625, %v444_v47  ;;  %v829_v43 = vsel %vm6244_vm0, %v210_v33, 0.0 }
  0xd2   :  { %v4355_v52 = vsel %vm1645_vm6, %v1644_v44, %v4261_v30  ;;  %v1092_v54 = vmul.f32 0.0625, %v399_v48  ;;  %v592_v30 = vsel %vm6244_vm0, %v131_v55, 0.0 }
  0xd3   :  { %v1890_v59 = vrot.slane %v1107_v53, %v4205_v35  ;;  %503 = vadd.xlane.f32.xlu1 %v502_v49  ;;  %v240_v53 = vld [vmem:[%s6235_s0 + $0x698] sm:$0xff] }
  0xd4   :  { %v1816_v60 = vrot.slane %v1092_v54, %v4244_v10  ;;  %458 = vadd.xlane.f32.xlu0 %v457_v50  ;;  %v534_v46 = vpop.xlane.xlu1 %533  ;;  %v255_v50 = vld [vmem:[%s6235_s0 + $0x710] sm:$0xff] }
  0xd5   :  { %v489_v61 = vpop.xlane.xlu0 %488  ;;  %v4369_v63 = vsel %vm1631_vm4, %v1890_v59, %v4294_v58  ;;  %v1137_v1 = vmul.f32 0.0625, %v534_v46  ;;  %v964_v59 = vsel %vm6244_vm0, %v255_v50, 0.0 }
  0xd6   :  { %v4373_v0 = vsel %vm1638_vm5, %v1816_v60, %v4275_v45  ;;  %v1122_v2 = vmul.f32 0.0625, %v489_v61  ;;  %v691_v45 = vsel %vm6244_vm0, %v164_v3, 0.0  ;;  %v919_v60 = vsel %vm6244_vm0, %v240_v53, 0.0 }
  0xd7   :  { %v2038_v6 = vrot.slane %v1137_v1, %v4148_v42  ;;  %593 = vadd.xlane.f32.xlu1 %v592_v30  ;;  %v269_v1 = vld [vmem:[%s6235_s0 + $0x780] sm:$0xff] }
  0xd8   :  { %v1964_v8 = vrot.slane %v1122_v2, %v4179_v7  ;;  %548 = vadd.xlane.f32.xlu0 %v547_v62  ;;  %v579_v58 = vpop.xlane.xlu1 %578  ;;  %v270_v62 = vld [vmem:[%s6235_s0 + $0x788] sm:$0xff] }
  0xd9   :  { %v576_v9 = vpop.xlane.xlu0 %575  ;;  %v4387_v12 = vsel %vm1617_vm2, %v2038_v6, %v4307_v5  ;;  %v1152_v14 = vmul.f32 0.0625, %v579_v58  ;;  %v1006_v58 = vsel %vm6244_vm0, %v269_v1, 0.0 }
  0xda   :  { %v4391_v13 = vsel %vm1624_vm3, %v1964_v8, %v4291_v57  ;;  %v1151_v15 = vmul.f32 0.0625, %v576_v9  ;;  %v784_v57 = vsel %vm6244_vm0, %v195_v16, 0.0  ;;  %v1009_v8 = vsel %vm6244_vm0, %v270_v62, 0.0  ;;  %v41_v16 = vld [vmem:[%s6235_s0 + $0x60] sm:$0xff] }
  0xdb   :  { %v2112_v19 = vrot.slane %v1152_v14, %v4136_v32  ;;  %692 = vadd.xlane.f32.xlu1 %v691_v45 }
  0xdc   :  { %v2108_v22 = vrot.slane %v1151_v15, %v4132_v28  ;;  %638 = vadd.xlane.f32.xlu0 %v637_v11  ;;  %v726_v5 = vpop.xlane.xlu1 %725  ;;  %v57_v15 = vld [vmem:[%s6235_s0 + $0xe0] sm:$0xff] }
  0xdd   :  { %v678_v23 = vpop.xlane.xlu0 %677  ;;  %v1201_v26 = vmul.f32 0.0625, %v726_v5  ;;  %v322_v5 = vsel %vm6244_vm0, %v41_v16, 0.0 }
  0xde   :  { %v4404_v25 = vsel %vm1610_vm1, %v2112_v19, %v2108_v22  ;;  %v1185_v27 = vmul.f32 0.0625, %v678_v23 }
  0xdf   :  { %v2354_v34 = vrot.slane %v1201_v26, %v4148_v42  ;;  %785 = vadd.xlane.f32.xlu1 %v784_v57 }
  0xe0   :  { %v2275_v36 = vrot.slane %v1185_v27, %v4148_v42  ;;  %740 = vadd.xlane.f32.xlu0 %v739_v24  ;;  %v771_v39 = vpop.xlane.xlu1 %770  ;;  %v87_v27 = vld [vmem:[%s6235_s0 + $0x1d0] sm:$0xff] }
  0xe1   :  { %v768_v40 = vpop.xlane.xlu0 %767  ;;  %v4419_v44 = vsel %vm1617_vm2, %v2354_v34, %v4337_v37  ;;  %v1216_v48 = vmul.f32 0.0625, %v771_v39  ;;  %v4434_v37 = vsub.s32 %v1647_v38, %v4119_v20  ;;  %v415_v38 = vsel %vm6244_vm0, %v72_v31, 0.0  ;;  %v196_v31 = vld [vmem:[%s6235_s0 + $0x538] sm:$0xff] }
  0xe2   :  { %v4423_v47 = vsel %vm1617_vm2, %v2275_v36, %v4321_v21  ;;  %v1215_v49 = vmul.f32 0.0625, %v768_v40 }
  0xe3   :  { %v2428_v54 = vrot.slane %v1216_v48, %v4136_v32  ;;  %875 = vadd.xlane.f32.xlu1 %v874_v41  ;;  %v102_v48 = vld [vmem:[%s6235_s0 + $0x248] sm:$0xff] }
  0xe4   :  { %v2424_v55 = vrot.slane %v1215_v49, %v4132_v28  ;;  %830 = vadd.xlane.f32.xlu0 %v829_v43  ;;  %v357_v21 = vpop.xlane.xlu1 %356  ;;  %v117_v43 = vld [vmem:[%s6235_s0 + $0x2c0] sm:$0xff] }
  0xe5   :  { %v309_v56 = vpop.xlane.xlu0 %308  ;;  %v1078_v61 = vmul.f32 0.0625, %v357_v21 }
  0xe6   :  { %v4439_v46 = vsel %vm1610_vm1, %v2428_v54, %v2424_v55  ;;  %v1062_v30 = vmul.f32 0.0625, %v309_v56  ;;  %v550_v54 = vsel %vm6244_vm0, %v117_v43, 0.0 }
  0xe7   :  { %v1747_v2 = vrot.slane %v1078_v61, %v4434_v37  ;;  %965 = vadd.xlane.f32.xlu1 %v964_v59  ;;  %v147_v59 = vld [vmem:[%s6235_s0 + $0x3b0] sm:$0xff] }
  0xe8   :  { %v1651_v3 = vrot.slane %v1062_v30, %v4434_v37  ;;  %920 = vadd.xlane.f32.xlu0 %v919_v60  ;;  %v447_v4 = vpop.xlane.xlu1 %446  ;;  %v132_v60 = vld [vmem:[%s6235_s0 + $0x338] sm:$0xff] }
  0xe9   :  { %v402_v6 = vpop.xlane.xlu0 %401  ;;  %v4453_v9 = vsel %vm1652_vm7, %v1747_v2, %v4351_v51  ;;  %v1108_v11 = vmul.f32 0.0625, %v447_v4  ;;  %v640_v2 = vsel %vm6244_vm0, %v147_v59, 0.0 }
  0xea   :  { %v4457_v45 = vsel %vm1652_vm7, %v1651_v3, %v4355_v52  ;;  %v1093_v14 = vmul.f32 0.0625, %v402_v6  ;;  %v370_v52 = vsel %vm6244_vm0, %v57_v15, 0.0  ;;  %v595_v3 = vsel %vm6244_vm0, %v132_v60, 0.0 }
  0xeb   :  { %v1895_v18 = vrot.slane %v1108_v11, %v4244_v10  ;;  %1010 = vadd.xlane.f32.xlu1 %v1009_v8  ;;  %v181_v11 = vld [vmem:[%s6235_s0 + $0x4c0] sm:$0xff] }
  0xec   :  { %v1821_v19 = vrot.slane %v1093_v14, %v4332_v29  ;;  %1007 = vadd.xlane.f32.xlu0 %v1006_v58  ;;  %v537_v51 = vpop.xlane.xlu1 %536  ;;  %v165_v14 = vld [vmem:[%s6235_s0 + $0x440] sm:$0xff] }
  0xed   :  { %v492_v22 = vpop.xlane.xlu0 %491  ;;  %v4471_v23 = vsel %vm1638_vm5, %v1895_v18, %v4369_v63  ;;  %v1138_v24 = vmul.f32 0.0625, %v537_v51  ;;  %v742_v51 = vsel %vm6244_vm0, %v181_v11, 0.0 }
  0xee   :  { %v4475_v57 = vsel %vm1645_vm6, %v1821_v19, %v4373_v0  ;;  %v1123_v26 = vmul.f32 0.0625, %v492_v22  ;;  %v460_v0 = vsel %vm6244_vm0, %v87_v27, 0.0  ;;  %v694_v22 = vsel %vm6244_vm0, %v165_v14, 0.0  ;;  %v211_v27 = vld [vmem:[%s6235_s0 + $0x5b0] sm:$0xff] }
  0xef   :  { %v2043_v33 = vrot.slane %v1138_v24, %v4179_v7  ;;  %371 = vadd.xlane.f32.xlu1 %v370_v52 }
  0xf0   :  { %v1969_v34 = vrot.slane %v1123_v26, %v4205_v35  ;;  %323 = vadd.xlane.f32.xlu0 %v322_v5  ;;  %v624_v63 = vpop.xlane.xlu1 %623 }
  0xf1   :  { %v582_v36 = vpop.xlane.xlu0 %581  ;;  %v4489_v39 = vsel %vm1624_vm3, %v2043_v33, %v4387_v12  ;;  %v1167_v49 = vmul.f32 0.0625, %v624_v63 }
  0xf2   :  { %v4493_v40 = vsel %vm1631_vm4, %v1969_v34, %v4391_v13  ;;  %v1153_v41 = vmul.f32 0.0625, %v582_v36  ;;  %v505_v13 = vsel %vm6244_vm0, %v102_v48, 0.0  ;;  %v832_v36 = vsel %vm6244_vm0, %v211_v27, 0.0  ;;  %v241_v48 = vld [vmem:[%s6235_s0 + $0x6a0] sm:$0xff] }
  0xf3   :  { %461 = vadd.xlane.f32.xlu1 %v460_v0  ;;  %v2187_v61 = vrot.slane %v1167_v49, %v4132_v28  ;;  %v787_v0 = vsel %vm6244_vm0, %v196_v31, 0.0  ;;  %v226_v49 = vld [vmem:[%s6235_s0 + $0x628] sm:$0xff]  ;;  %v88_v31 = vld [vmem:[%s6235_s0 + $0x1d8] sm:$0xff] }
  0xf4   :  { %v2117_v50 = vrot.slane %v1153_v41, %v4148_v42  ;;  %416 = vadd.xlane.f32.xlu0 %v415_v38  ;;  %v681_v12 = vpop.xlane.xlu1 %680 }
  0xf5   :  { %v627_v53 = vpop.xlane.xlu0 %626  ;;  %v1186_v21 = vmul.f32 0.0625, %v681_v12 }
  0xf6   :  { %v4506_v55 = vsel %vm1617_vm2, %v2117_v50, %v4404_v25  ;;  %v1168_v56 = vmul.f32 0.0625, %v627_v53 }
  0xf7   :  { %v2280_v30 = vrot.slane %v1186_v21, %v4179_v7  ;;  %551 = vadd.xlane.f32.xlu1 %v550_v54  ;;  %v877_v21 = vsel %vm6244_vm0, %v226_v49, 0.0  ;;  %v118_v49 = vld [vmem:[%s6235_s0 + $0x2c8] sm:$0xff] }
  0xf8   :  { %v2191_v62 = vrot.slane %v1168_v56, %v4136_v32  ;;  %506 = vadd.xlane.f32.xlu0 %v505_v13  ;;  %v774_v25 = vpop.xlane.xlu1 %773  ;;  %v922_v13 = vsel %vm6244_vm0, %v241_v48, 0.0 }
  0xf9   :  { %v729_v1 = vpop.xlane.xlu0 %728  ;;  %v4521_v4 = vsel %vm1624_vm3, %v2280_v30, %v4423_v47  ;;  %v1217_v8 = vmul.f32 0.0625, %v774_v25  ;;  %v1654_v47 = vadd.s32 4294967232, %v4111_v17  ;;  %v271_v30 = vld [vmem:[%s6235_s0 + $0x790] sm:$0xff] }
  0xfa   :  { %v4524_v6 = vsel %vm1610_vm1, %v2191_v62, %v2187_v61  ;;  %v1202_v58 = vmul.f32 0.0625, %v729_v1  ;;  %v256_v62 = vld [vmem:[%s6235_s0 + $0x718] sm:$0xff] }
  0xfb   :  { %v2433_v15 = vrot.slane %v1217_v8, %v4148_v42  ;;  %641 = vadd.xlane.f32.xlu1 %v640_v2 }
  0xfc   :  { %v2359_v16 = vrot.slane %v1202_v58, %v4179_v7  ;;  %596 = vadd.xlane.f32.xlu0 %v595_v3  ;;  %v819_v18 = vpop.xlane.xlu1 %818  ;;  %v967_v3 = vsel %vm6244_vm0, %v256_v62, 0.0  ;;  %v148_v62 = vld [vmem:[%s6235_s0 + $0x3b8] sm:$0xff] }
  0xfd   :  { %v816_v19 = vpop.xlane.xlu0 %815  ;;  %v4539_v52 = vsel %vm1617_vm2, %v2433_v15, %v4439_v46  ;;  %v1232_v24 = vmul.f32 0.0625, %v819_v18  ;;  %v4554_v46 = vsub.s32 %v1654_v47, %v4119_v20  ;;  %v58_v15 = vld [vmem:[%s6235_s0 + $0xe8] sm:$0xff] }
  0xfe   :  { %v4543_v5 = vsel %vm1624_vm3, %v2359_v16, %v4419_v44  ;;  %v1231_v26 = vmul.f32 0.0625, %v816_v19  ;;  %v42_v16 = vld [vmem:[%s6235_s0 + $0x68] sm:$0xff] }
  0xff   :  { %v2507_v33 = vrot.slane %v1232_v24, %v4136_v32  ;;  %743 = vadd.xlane.f32.xlu1 %v742_v51  ;;  %v325_v51 = vsel %vm6244_vm0, %v42_v16, 0.0 }
 0x100   :  { %v2503_v34 = vrot.slane %v1231_v26, %v4132_v28  ;;  %695 = vadd.xlane.f32.xlu0 %v694_v22  ;;  %v360_v44 = vpop.xlane.xlu1 %359 }
 0x101   :  { %v312_v63 = vpop.xlane.xlu0 %311  ;;  %v1079_v41 = vmul.f32 0.0625, %v360_v44 }
 0x102   :  { %v4559_v38 = vsel %vm1610_vm1, %v2507_v33, %v2503_v34  ;;  %v1063_v43 = vmul.f32 0.0625, %v312_v63  ;;  %v73_v33 = vld [vmem:[%s6235_s0 + $0x160] sm:$0xff] }
 0x103   :  { %v1752_v50 = vrot.slane %v1079_v41, %v4554_v46  ;;  %833 = vadd.xlane.f32.xlu1 %v832_v36  ;;  %v418_v36 = vsel %vm6244_vm0, %v73_v33, 0.0 }
 0x104   :  { %v1658_v12 = vrot.slane %v1063_v43, %v4554_v46  ;;  %788 = vadd.xlane.f32.xlu0 %v787_v0  ;;  %v450_v53 = vpop.xlane.xlu1 %449 }
 0x105   :  { %v405_v54 = vpop.xlane.xlu0 %404  ;;  %v4573_v56 = vsel %vm1659_vm8, %v1752_v50, %v4453_v9  ;;  %v1109_v60 = vmul.f32 0.0625, %v450_v53  ;;  %v103_v50 = vld [vmem:[%s6235_s0 + $0x250] sm:$0xff] }
 0x106   :  { %v4577_v59 = vsel %vm1659_vm8, %v1658_v12, %v4457_v45  ;;  %v1094_v61 = vmul.f32 0.0625, %v405_v54  ;;  %v1012_v45 = vsel %vm6244_vm0, %v271_v30, 0.0 }
 0x107   :  { %v1900_v25 = vrot.slane %v1109_v60, %v4332_v29  ;;  %923 = vadd.xlane.f32.xlu1 %v922_v13  ;;  %v508_v13 = vsel %vm6244_vm0, %v103_v50, 0.0 }
 0x108   :  { %v1826_v1 = vrot.slane %v1094_v61, %v4434_v37  ;;  %878 = vadd.xlane.f32.xlu0 %v877_v21  ;;  %v540_v9 = vpop.xlane.xlu1 %539 }
 0x109   :  { %v495_v2 = vpop.xlane.xlu0 %494  ;;  %v4591_v8 = vsel %vm1645_vm6, %v1900_v25, %v4471_v23  ;;  %v1139_v11 = vmul.f32 0.0625, %v540_v9  ;;  %v133_v25 = vld [vmem:[%s6235_s0 + $0x340] sm:$0xff] }
 0x10a   :  { %v4595_v58 = vsel %vm1652_vm7, %v1826_v1, %v4475_v57  ;;  %v1124_v14 = vmul.f32 0.0625, %v495_v2  ;;  %v373_v57 = vsel %vm6244_vm0, %v58_v15, 0.0 }
 0x10b   :  { %v2048_v47 = vrot.slane %v1139_v11, %v4205_v35  ;;  %1013 = vadd.xlane.f32.xlu1 %v1012_v45  ;;  %v643_v45 = vsel %vm6244_vm0, %v148_v62, 0.0 }
 0x10c   :  { %v1974_v18 = vrot.slane %v1124_v14, %v4244_v10  ;;  %968 = vadd.xlane.f32.xlu0 %v967_v3  ;;  %v630_v23 = vpop.xlane.xlu1 %629  ;;  %v598_v3 = vsel %vm6244_vm0, %v133_v25, 0.0 }
 0x10d   :  { %v585_v19 = vpop.xlane.xlu0 %584  ;;  %v4609_v22 = vsel %vm1631_vm4, %v2048_v47, %v4489_v39  ;;  %v1169_v26 = vmul.f32 0.0625, %v630_v23  ;;  %v182_v47 = vld [vmem:[%s6235_s0 + $0x4c8] sm:$0xff] }
 0x10e   :  { %v4613_v24 = vsel %vm1638_vm5, %v1974_v18, %v4493_v40  ;;  %v1154_v27 = vmul.f32 0.0625, %v585_v19  ;;  %v463_v40 = vsel %vm6244_vm0, %v88_v31, 0.0  ;;  %v166_v18 = vld [vmem:[%s6235_s0 + $0x448] sm:$0xff] }
 0x10f   :  { %v2196_v34 = vrot.slane %v1169_v26, %v4148_v42  ;;  %374 = vadd.xlane.f32.xlu1 %v373_v57  ;;  %v697_v26 = vsel %vm6244_vm0, %v166_v18, 0.0 }
 0x110   :  { %v2122_v44 = vrot.slane %v1154_v27, %v4179_v7  ;;  %326 = vadd.xlane.f32.xlu0 %v325_v51  ;;  %v732_v39 = vpop.xlane.xlu1 %731  ;;  %v745_v51 = vsel %vm6244_vm0, %v182_v47, 0.0 }
 0x111   :  { %v684_v63 = vpop.xlane.xlu0 %683  ;;  %v4627_v0 = vsel %vm1617_vm2, %v2196_v34, %v4524_v6  ;;  %v1203_v43 = vmul.f32 0.0625, %v732_v39  ;;  %v212_v34 = vld [vmem:[%s6235_s0 + $0x5b8] sm:$0xff] }
 0x112   :  { %v4631_v41 = vsel %vm1624_vm3, %v2122_v44, %v4506_v55  ;;  %v1187_v48 = vmul.f32 0.0625, %v684_v63  ;;  %v553_v55 = vsel %vm6244_vm0, %v118_v49, 0.0  ;;  %v197_v44 = vld [vmem:[%s6235_s0 + $0x540] sm:$0xff] }
 0x113   :  { %v2364_v12 = vrot.slane %v1203_v43, %v4205_v35  ;;  %464 = vadd.xlane.f32.xlu1 %v463_v40  ;;  %v835_v43 = vsel %vm6244_vm0, %v212_v34, 0.0 }
 0x114   :  { %v2285_v53 = vrot.slane %v1187_v48, %v4205_v35  ;;  %419 = vadd.xlane.f32.xlu0 %v418_v36  ;;  %v822_v6 = vpop.xlane.xlu1 %821  ;;  %v790_v48 = vsel %vm6244_vm0, %v197_v44, 0.0 }
 0x115   :  { %v777_v54 = vpop.xlane.xlu0 %776  ;;  %v4645_v21 = vsel %vm1631_vm4, %v2364_v12, %v4543_v5  ;;  %v1233_v61 = vmul.f32 0.0625, %v822_v6  ;;  %v1661_v5 = vadd.s32 4294967224, %v4111_v17  ;;  %v242_v6 = vld [vmem:[%s6235_s0 + $0x6a8] sm:$0xff] }
 0x116   :  { %v4649_v60 = vsel %vm1631_vm4, %v2285_v53, %v4521_v4  ;;  %v1218_v30 = vmul.f32 0.0625, %v777_v54  ;;  %v227_v54 = vld [vmem:[%s6235_s0 + $0x630] sm:$0xff] }
 0x117   :  { %v2512_v1 = vrot.slane %v1233_v61, %v4148_v42  ;;  %554 = vadd.xlane.f32.xlu1 %v553_v55 }
 0x118   :  { %v2438_v9 = vrot.slane %v1218_v30, %v4179_v7  ;;  %509 = vadd.xlane.f32.xlu0 %v508_v13  ;;  %v867_v4 = vpop.xlane.xlu1 %866  ;;  %v880_v30 = vsel %vm6244_vm0, %v227_v54, 0.0 }
 0x119   :  { %v864_v2 = vpop.xlane.xlu0 %863  ;;  %v4664_v11 = vsel %vm1617_vm2, %v2512_v1, %v4559_v38  ;;  %v1248_v15 = vmul.f32 0.0625, %v867_v4  ;;  %v4679_v38 = vsub.s32 %v1661_v5, %v4119_v20  ;;  %v272_v5 = vld [vmem:[%s6235_s0 + $0x798] sm:$0xff]  ;;  %v257_v4 = vld [vmem:[%s6235_s0 + $0x720] sm:$0xff] }
 0x11a   :  { %v4668_v14 = vsel %vm1624_vm3, %v2438_v9, %v4539_v52  ;;  %v1247_v16 = vmul.f32 0.0625, %v864_v2 }
 0x11b   :  { %v2586_v23 = vrot.slane %v1248_v15, %v4136_v32  ;;  %644 = vadd.xlane.f32.xlu1 %v643_v45  ;;  %v970_v15 = vsel %vm6244_vm0, %v257_v4, 0.0 }
 0x11c   :  { %v2582_v19 = vrot.slane %v1247_v16, %v4132_v28  ;;  %599 = vadd.xlane.f32.xlu0 %v598_v3  ;;  %v363_v52 = vpop.xlane.xlu1 %362 }
 0x11d   :  { %v315_v57 = vpop.xlane.xlu0 %314  ;;  %v1080_v31 = vmul.f32 0.0625, %v363_v52  ;;  %v43_v52 = vld [vmem:[%s6235_s0 + $0x70] sm:$0xff] }
 0x11e   :  { %v4684_v27 = vsel %vm1610_vm1, %v2586_v23, %v2582_v19  ;;  %v1064_v33 = vmul.f32 0.0625, %v315_v57  ;;  %v59_v19 = vld [vmem:[%s6235_s0 + $0xf0] sm:$0xff] }
 0x11f   :  { %v1757_v39 = vrot.slane %v1080_v31, %v4679_v38  ;;  %746 = vadd.xlane.f32.xlu1 %v745_v51  ;;  %v328_v31 = vsel %vm6244_vm0, %v43_v52, 0.0 }
 0x120   :  { %v1665_v63 = vrot.slane %v1064_v33, %v4679_v38  ;;  %698 = vadd.xlane.f32.xlu0 %v697_v26  ;;  %v453_v40 = vpop.xlane.xlu1 %452 }
 0x121   :  { %v408_v36 = vpop.xlane.xlu0 %407  ;;  %v4698_v49 = vsel %vm1666_vm9, %v1757_v39, %v4573_v56  ;;  %v1110_v12 = vmul.f32 0.0625, %v453_v40  ;;  %v74_v40 = vld [vmem:[%s6235_s0 + $0x168] sm:$0xff] }
 0x122   :  { %v4702_v50 = vsel %vm1666_vm9, %v1665_v63, %v4577_v59  ;;  %v1095_v53 = vmul.f32 0.0625, %v408_v36  ;;  %v925_v59 = vsel %vm6244_vm0, %v242_v6, 0.0  ;;  %v89_v63 = vld [vmem:[%s6235_s0 + $0x1e0] sm:$0xff] }
 0x123   :  { %v1905_v55 = vrot.slane %v1110_v12, %v4434_v37  ;;  %836 = vadd.xlane.f32.xlu1 %v835_v43  ;;  %v421_v12 = vsel %vm6244_vm0, %v74_v40, 0.0 }
 0x124   :  { %v1831_v13 = vrot.slane %v1095_v53, %v4554_v46  ;;  %791 = vadd.xlane.f32.xlu0 %v790_v48  ;;  %v543_v56 = vpop.xlane.xlu1 %542 }
 0x125   :  { %v498_v61 = vpop.xlane.xlu0 %497  ;;  %v4716_v62 = vsel %vm1652_vm7, %v1905_v55, %v4591_v8  ;;  %v1140_v1 = vmul.f32 0.0625, %v543_v56  ;;  %v104_v56 = vld [vmem:[%s6235_s0 + $0x258] sm:$0xff] }
 0x126   :  { %v4720_v25 = vsel %vm1659_vm8, %v1831_v13, %v4595_v58  ;;  %v1125_v9 = vmul.f32 0.0625, %v498_v61  ;;  %v1015_v58 = vsel %vm6244_vm0, %v272_v5, 0.0  ;;  %v119_v13 = vld [vmem:[%s6235_s0 + $0x2d0] sm:$0xff] }
 0x127   :  { %v2053_v2 = vrot.slane %v1140_v1, %v4244_v10  ;;  %926 = vadd.xlane.f32.xlu1 %v925_v59  ;;  %v556_v1 = vsel %vm6244_vm0, %v119_v13, 0.0 }
 0x128   :  { %v1979_v45 = vrot.slane %v1125_v9, %v4332_v29  ;;  %881 = vadd.xlane.f32.xlu0 %v880_v30  ;;  %v633_v8 = vpop.xlane.xlu1 %632  ;;  %v511_v9 = vsel %vm6244_vm0, %v104_v56, 0.0 }
 0x129   :  { %v588_v3 = vpop.xlane.xlu0 %587  ;;  %v4734_v16 = vsel %vm1638_vm5, %v2053_v2, %v4609_v22  ;;  %v1170_v18 = vmul.f32 0.0625, %v633_v8  ;;  %v134_v8 = vld [vmem:[%s6235_s0 + $0x348] sm:$0xff] }
 0x12a   :  { %v4738_v47 = vsel %vm1645_vm6, %v1979_v45, %v4613_v24  ;;  %v1155_v23 = vmul.f32 0.0625, %v588_v3  ;;  %v376_v24 = vsel %vm6244_vm0, %v59_v19, 0.0  ;;  %v149_v45 = vld [vmem:[%s6235_s0 + $0x3c0] sm:$0xff] }
 0x12b   :  { %v2201_v57 = vrot.slane %v1170_v18, %v4179_v7  ;;  %1016 = vadd.xlane.f32.xlu1 %v1015_v58  ;;  %v646_v18 = vsel %vm6244_vm0, %v149_v45, 0.0 }
 0x12c   :  { %v2127_v51 = vrot.slane %v1155_v23, %v4205_v35  ;;  %971 = vadd.xlane.f32.xlu0 %v970_v15  ;;  %v735_v22 = vpop.xlane.xlu1 %734  ;;  %v601_v23 = vsel %vm6244_vm0, %v134_v8, 0.0 }
 0x12d   :  { %v687_v26 = vpop.xlane.xlu0 %686  ;;  %v4752_v33 = vsel %vm1624_vm3, %v2201_v57, %v4627_v0  ;;  %v1204_v44 = vmul.f32 0.0625, %v735_v22  ;;  %v167_v22 = vld [vmem:[%s6235_s0 + $0x450] sm:$0xff] }
 0x12e   :  { %v4756_v34 = vsel %vm1631_vm4, %v2127_v51, %v4631_v41  ;;  %v1188_v39 = vmul.f32 0.0625, %v687_v26  ;;  %v466_v41 = vsel %vm6244_vm0, %v89_v63, 0.0  ;;  %v183_v51 = vld [vmem:[%s6235_s0 + $0x4d0] sm:$0xff]  ;;  %v700_v63 = vsel %vm6244_vm0, %v167_v22, 0.0 }
 0x12f   :  { %v2369_v36 = vrot.slane %v1204_v44, %v4244_v10  ;;  %377 = vadd.xlane.f32.xlu1 %v376_v24 }
 0x130   :  { %v2290_v43 = vrot.slane %v1188_v39, %v4244_v10  ;;  %329 = vadd.xlane.f32.xlu0 %v328_v31  ;;  %v825_v0 = vpop.xlane.xlu1 %824  ;;  %v748_v39 = vsel %vm6244_vm0, %v183_v51, 0.0 }
 0x131   :  { %v780_v48 = vpop.xlane.xlu0 %779  ;;  %v4770_v53 = vsel %vm1638_vm5, %v2369_v36, %v4645_v21  ;;  %v1234_v54 = vmul.f32 0.0625, %v825_v0  ;;  %v1668_v21 = vadd.s32 4294967216, %v4111_v17 }
 0x132   :  { %v4774_v6 = vsel %vm1638_vm5, %v2290_v43, %v4649_v60  ;;  %v1219_v55 = vmul.f32 0.0625, %v780_v48  ;;  %v213_v48 = vld [vmem:[%s6235_s0 + $0x5c0] sm:$0xff] }
 0x133   :  { %v2517_v61 = vrot.slane %v1234_v54, %v4179_v7  ;;  %467 = vadd.xlane.f32.xlu1 %v466_v41  ;;  %v198_v41 = vld [vmem:[%s6235_s0 + $0x548] sm:$0xff]  ;;  %v838_v13 = vsel %vm6244_vm0, %v213_v48, 0.0 }
 0x134   :  { %v2443_v59 = vrot.slane %v1219_v55, %v4205_v35  ;;  %422 = vadd.xlane.f32.xlu0 %v421_v12  ;;  %v912_v60 = vpop.xlane.xlu1 %911  ;;  %v793_v56 = vsel %vm6244_vm0, %v198_v41, 0.0 }
 0x135   :  { %v870_v30 = vpop.xlane.xlu0 %869  ;;  %v4789_v5 = vsel %vm1624_vm3, %v2517_v61, %v4664_v11  ;;  %v1263_v3 = vmul.f32 0.0625, %v912_v60  ;;  %v4803_v11 = vsub.s32 %v1668_v21, %v4119_v20 }
 0x136   :  { %v4793_v4 = vsel %vm1631_vm4, %v2443_v59, %v4668_v14  ;;  %v1249_v2 = vmul.f32 0.0625, %v870_v30  ;;  %v243_v30 = vld [vmem:[%s6235_s0 + $0x6b0] sm:$0xff] }
 0x137   :  { %557 = vadd.xlane.f32.xlu1 %v556_v1  ;;  %v2661_v26 = vrot.slane %v1263_v3, %v4132_v28  ;;  %v228_v1 = vld [vmem:[%s6235_s0 + $0x638] sm:$0xff] }
 0x138   :  { %v2591_v58 = vrot.slane %v1249_v2, %v4148_v42  ;;  %512 = vadd.xlane.f32.xlu0 %v511_v9  ;;  %v318_v15 = vpop.xlane.xlu1 %317  ;;  %v883_v8 = vsel %vm6244_vm0, %v228_v1, 0.0 }
 0x139   :  { %v915_v14 = vpop.xlane.xlu0 %914  ;;  %v1065_v52 = vmul.f32 0.0625, %v318_v15 }
 0x13a   :  { %v4809_v19 = vsel %vm1617_vm2, %v2591_v58, %v4684_v27  ;;  %v1264_v57 = vmul.f32 0.0625, %v915_v14 }
 0x13b   :  { %v1672_v24 = vrot.slane %v1065_v52, %v4803_v11  ;;  %647 = vadd.xlane.f32.xlu1 %v646_v18  ;;  %v273_v18 = vld [vmem:[%s6235_s0 + $0x7a0] sm:$0xff] }
 0x13c   :  { %v2665_v31 = vrot.slane %v1264_v57, %v4136_v32  ;;  %602 = vadd.xlane.f32.xlu0 %v601_v23  ;;  %v411_v27 = vpop.xlane.xlu1 %410  ;;  %v258_v23 = vld [vmem:[%s6235_s0 + $0x728] sm:$0xff] }
 0x13d   :  { %v366_v44 = vpop.xlane.xlu0 %365  ;;  %v4824_v40 = vsel %vm1673_vm10, %v1672_v24, %v4702_v50  ;;  %v1096_v43 = vmul.f32 0.0625, %v411_v27  ;;  %v973_v22 = vsel %vm6244_vm0, %v258_v23, 0.0 }
 0x13e   :  { %v4827_v36 = vsel %vm1610_vm1, %v2665_v31, %v2661_v26  ;;  %v1081_v0 = vmul.f32 0.0625, %v366_v44  ;;  %v60_v44 = vld [vmem:[%s6235_s0 + $0xf8] sm:$0xff] }
 0x13f   :  { %v1836_v12 = vrot.slane %v1096_v43, %v4679_v38  ;;  %749 = vadd.xlane.f32.xlu1 %v748_v39  ;;  %v44_v39 = vld [vmem:[%s6235_s0 + $0x78] sm:$0xff] }
 0x140   :  { %v1762_v54 = vrot.slane %v1081_v0, %v4803_v11  ;;  %701 = vadd.xlane.f32.xlu0 %v700_v63  ;;  %v501_v50 = vpop.xlane.xlu1 %500  ;;  %v331_v48 = vsel %vm6244_vm0, %v44_v39, 0.0 }
 0x141   :  { %v456_v55 = vpop.xlane.xlu0 %455  ;;  %v4841_v61 = vsel %vm1666_vm9, %v1836_v12, %v4720_v25  ;;  %v1126_v21 = vmul.f32 0.0625, %v501_v50 }
 0x142   :  { %v4845_v59 = vsel %vm1673_vm10, %v1762_v54, %v4698_v49  ;;  %v1111_v60 = vmul.f32 0.0625, %v456_v55  ;;  %v928_v49 = vsel %vm6244_vm0, %v243_v30, 0.0  ;;  %v90_v55 = vld [vmem:[%s6235_s0 + $0x1e8] sm:$0xff] }
 0x143   :  { %v1984_v9 = vrot.slane %v1126_v21, %v4434_v37  ;;  %839 = vadd.xlane.f32.xlu1 %v838_v13  ;;  %v75_v13 = vld [vmem:[%s6235_s0 + $0x170] sm:$0xff] }
 0x144   :  { %v1910_v2 = vrot.slane %v1111_v60, %v4554_v46  ;;  %794 = vadd.xlane.f32.xlu0 %v793_v56  ;;  %v591_v25 = vpop.xlane.xlu1 %590  ;;  %v424_v30 = vsel %vm6244_vm0, %v75_v13, 0.0 }
 0x145   :  { %v546_v45 = vpop.xlane.xlu0 %545  ;;  %v4859_v3 = vsel %vm1652_vm7, %v1984_v9, %v4738_v47  ;;  %v1156_v15 = vmul.f32 0.0625, %v591_v25 }
 0x146   :  { %v4863_v58 = vsel %vm1659_vm8, %v1910_v2, %v4716_v62  ;;  %v1141_v14 = vmul.f32 0.0625, %v546_v45  ;;  %v1018_v62 = vsel %vm6244_vm0, %v273_v18, 0.0  ;;  %v120_v45 = vld [vmem:[%s6235_s0 + $0x2d8] sm:$0xff] }
 0x147   :  { %v2132_v52 = vrot.slane %v1156_v15, %v4244_v10  ;;  %929 = vadd.xlane.f32.xlu1 %v928_v49  ;;  %v105_v49 = vld [vmem:[%s6235_s0 + $0x260] sm:$0xff]  ;;  %v559_v18 = vsel %vm6244_vm0, %v120_v45, 0.0 }
 0x148   :  { %v2058_v57 = vrot.slane %v1141_v14, %v4332_v29  ;;  %884 = vadd.xlane.f32.xlu0 %v883_v8  ;;  %v690_v47 = vpop.xlane.xlu1 %689  ;;  %v514_v23 = vsel %vm6244_vm0, %v105_v49, 0.0 }
 0x149   :  { %v636_v51 = vpop.xlane.xlu0 %635  ;;  %v4877_v26 = vsel %vm1638_vm5, %v2132_v52, %v4756_v34  ;;  %v1189_v31 = vmul.f32 0.0625, %v690_v47 }
 0x14a   :  { %v4881_v24 = vsel %vm1645_vm6, %v2058_v57, %v4734_v16  ;;  %v1171_v27 = vmul.f32 0.0625, %v636_v51  ;;  %v379_v16 = vsel %vm6244_vm0, %v60_v44, 0.0  ;;  %v150_v51 = vld [vmem:[%s6235_s0 + $0x3c8] sm:$0xff] }
 0x14b   :  { %v2295_v63 = vrot.slane %v1189_v31, %v4332_v29  ;;  %1019 = vadd.xlane.f32.xlu1 %v1018_v62  ;;  %v135_v62 = vld [vmem:[%s6235_s0 + $0x350] sm:$0xff]  ;;  %v649_v44 = vsel %vm6244_vm0, %v150_v51, 0.0 }
 0x14c   :  { %v2206_v43 = vrot.slane %v1171_v27, %v4205_v35  ;;  %974 = vadd.xlane.f32.xlu0 %v973_v22  ;;  %v783_v34 = vpop.xlane.xlu1 %782  ;;  %v604_v39 = vsel %vm6244_vm0, %v135_v62, 0.0 }
 0x14d   :  { %v738_v0 = vpop.xlane.xlu0 %737  ;;  %v4895_v41 = vsel %vm1645_vm6, %v2295_v63, %v4774_v6  ;;  %v1220_v54 = vmul.f32 0.0625, %v783_v34 }
 0x14e   :  { %v4899_v12 = vsel %vm1631_vm4, %v2206_v43, %v4752_v33  ;;  %v1205_v50 = vmul.f32 0.0625, %v738_v0  ;;  %v469_v33 = vsel %vm6244_vm0, %v90_v55, 0.0  ;;  %v184_v0 = vld [vmem:[%s6235_s0 + $0x4d8] sm:$0xff] }
 0x14f   :  { %v2448_v56 = vrot.slane %v1220_v54, %v4244_v10  ;;  %380 = vadd.xlane.f32.xlu1 %v379_v16  ;;  %v168_v16 = vld [vmem:[%s6235_s0 + $0x458] sm:$0xff]  ;;  %v751_v13 = vsel %vm6244_vm0, %v184_v0, 0.0 }
 0x150   :  { %v2374_v21 = vrot.slane %v1205_v50, %v4332_v29  ;;  %332 = vadd.xlane.f32.xlu0 %v331_v48  ;;  %v873_v6 = vpop.xlane.xlu1 %872 }
 0x151   :  { %v828_v60 = vpop.xlane.xlu0 %827  ;;  %v4913_v1 = vsel %vm1638_vm5, %v2448_v56, %v4793_v4  ;;  %v1250_v2 = vmul.f32 0.0625, %v873_v6  ;;  %v1675_v4 = vadd.s32 4294967208, %v4111_v17  ;;  %v703_v56 = vsel %vm6244_vm0, %v168_v16, 0.0 }
 0x152   :  { %v4917_v9 = vsel %vm1645_vm6, %v2374_v21, %v4770_v53  ;;  %v1235_v25 = vmul.f32 0.0625, %v828_v60 }
 0x153   :  { %v2596_v8 = vrot.slane %v1250_v2, %v4179_v7  ;;  %470 = vadd.xlane.f32.xlu1 %v469_v33  ;;  %v199_v2 = vld [vmem:[%s6235_s0 + $0x550] sm:$0xff] }
 0x154   :  { %v2522_v15 = vrot.slane %v1235_v25, %v4205_v35  ;;  %425 = vadd.xlane.f32.xlu0 %v424_v30  ;;  %v960_v53 = vpop.xlane.xlu1 %959  ;;  %v214_v30 = vld [vmem:[%s6235_s0 + $0x5c8] sm:$0xff] }
 0x155   :  { %v918_v14 = vpop.xlane.xlu0 %917  ;;  %v4932_v52 = vsel %vm1624_vm3, %v2596_v8, %v4809_v19  ;;  %v1279_v22 = vmul.f32 0.0625, %v960_v53  ;;  %v4946_v19 = vsub.s32 %v1675_v4, %v4119_v20  ;;  %v841_v8 = vsel %vm6244_vm0, %v214_v30, 0.0 }
 0x156   :  { %v4936_v57 = vsel %vm1631_vm4, %v2522_v15, %v4789_v5  ;;  %v1265_v47 = vmul.f32 0.0625, %v918_v14  ;;  %v796_v15 = vsel %vm6244_vm0, %v199_v2, 0.0 }
 0x157   :  { %560 = vadd.xlane.f32.xlu1 %v559_v18  ;;  %v2740_v48 = vrot.slane %v1279_v22, %v4132_v28 }
 0x158   :  { %v2670_v31 = vrot.slane %v1265_v47, %v4148_v42  ;;  %515 = vadd.xlane.f32.xlu0 %v514_v23  ;;  %v321_v27 = vpop.xlane.xlu1 %320  ;;  %v244_v23 = vld [vmem:[%s6235_s0 + $0x6b8] sm:$0xff]  ;;  %v229_v47 = vld [vmem:[%s6235_s0 + $0x640] sm:$0xff] }
 0x159   :  { %v963_v5 = vpop.xlane.xlu0 %962  ;;  %v1066_v43 = vmul.f32 0.0625, %v321_v27 }
 0x15a   :  { %v4952_v63 = vsel %vm1617_vm2, %v2670_v31, %v4827_v36  ;;  %v1280_v34 = vmul.f32 0.0625, %v963_v5  ;;  %v886_v31 = vsel %vm6244_vm0, %v229_v47, 0.0 }
 0x15b   :  { %v1679_v54 = vrot.slane %v1066_v43, %v4946_v19  ;;  %650 = vadd.xlane.f32.xlu1 %v649_v44  ;;  %v274_v43 = vld [vmem:[%s6235_s0 + $0x7a8] sm:$0xff] }
 0x15c   :  { %v2744_v50 = vrot.slane %v1280_v34, %v4136_v32  ;;  %605 = vadd.xlane.f32.xlu0 %v604_v39  ;;  %v414_v36 = vpop.xlane.xlu1 %413  ;;  %v259_v34 = vld [vmem:[%s6235_s0 + $0x730] sm:$0xff] }
 0x15d   :  { %v369_v55 = vpop.xlane.xlu0 %368  ;;  %v4967_v21 = vsel %vm1680_vm11, %v1679_v54, %v4824_v40  ;;  %v1097_v60 = vmul.f32 0.0625, %v414_v36  ;;  %v976_v54 = vsel %vm6244_vm0, %v259_v34, 0.0 }
 0x15e   :  { %v4970_v6 = vsel %vm1610_vm1, %v2744_v50, %v2740_v48  ;;  %v1082_v33 = vmul.f32 0.0625, %v369_v55 }
 0x15f   :  { %v1841_v25 = vrot.slane %v1097_v60, %v4803_v11  ;;  %752 = vadd.xlane.f32.xlu1 %v751_v13  ;;  %v76_v60 = vld [vmem:[%s6235_s0 + $0x178] sm:$0xff] }
 0x160   :  { %v1767_v45 = vrot.slane %v1082_v33, %v4946_v19  ;;  %704 = vadd.xlane.f32.xlu0 %v703_v56  ;;  %v504_v40 = vpop.xlane.xlu1 %503  ;;  %v91_v56 = vld [vmem:[%s6235_s0 + $0x1f0] sm:$0xff] }
 0x161   :  { %v459_v49 = vpop.xlane.xlu0 %458  ;;  %v4984_v4 = vsel %vm1673_vm10, %v1841_v25, %v4841_v61  ;;  %v1127_v14 = vmul.f32 0.0625, %v504_v40  ;;  %v427_v25 = vsel %vm6244_vm0, %v76_v60, 0.0 }
 0x162   :  { %v4988_v53 = vsel %vm1680_vm11, %v1767_v45, %v4845_v59  ;;  %v1112_v18 = vmul.f32 0.0625, %v459_v49  ;;  %v931_v59 = vsel %vm6244_vm0, %v244_v23, 0.0 }
 0x163   :  { %v1989_v51 = vrot.slane %v1127_v14, %v4554_v46  ;;  %842 = vadd.xlane.f32.xlu1 %v841_v8  ;;  %v106_v14 = vld [vmem:[%s6235_s0 + $0x268] sm:$0xff] }
 0x164   :  { %v1915_v62 = vrot.slane %v1112_v18, %v4679_v38  ;;  %797 = vadd.xlane.f32.xlu0 %v796_v15  ;;  %v594_v61 = vpop.xlane.xlu1 %593  ;;  %v121_v15 = vld [vmem:[%s6235_s0 + $0x2e0] sm:$0xff] }
 0x165   :  { %v549_v22 = vpop.xlane.xlu0 %548  ;;  %v5002_v27 = vsel %vm1659_vm8, %v1989_v51, %v4859_v3  ;;  %v1157_v44 = vmul.f32 0.0625, %v594_v61  ;;  %v517_v51 = vsel %vm6244_vm0, %v106_v14, 0.0 }
 0x166   :  { %v5006_v5 = vsel %vm1666_vm9, %v1915_v62, %v4863_v58  ;;  %v1142_v39 = vmul.f32 0.0625, %v549_v22  ;;  %v1021_v58 = vsel %vm6244_vm0, %v274_v43, 0.0 }
 0x167   :  { %v2137_v0 = vrot.slane %v1157_v44, %v4332_v29  ;;  %932 = vadd.xlane.f32.xlu1 %v931_v59  ;;  %v136_v44 = vld [vmem:[%s6235_s0 + $0x358] sm:$0xff] }
 0x168   :  { %v2063_v16 = vrot.slane %v1142_v39, %v4434_v37  ;;  %887 = vadd.xlane.f32.xlu0 %v886_v31  ;;  %v693_v3 = vpop.xlane.xlu1 %692  ;;  %v151_v31 = vld [vmem:[%s6235_s0 + $0x3d0] sm:$0xff] }
 0x169   :  { %v639_v48 = vpop.xlane.xlu0 %638  ;;  %v5020_v50 = vsel %vm1645_vm6, %v2137_v0, %v4877_v26  ;;  %v1190_v55 = vmul.f32 0.0625, %v693_v3  ;;  %v607_v0 = vsel %vm6244_vm0, %v136_v44, 0.0 }
 0x16a   :  { %v5024_v36 = vsel %vm1652_vm7, %v2063_v16, %v4881_v24  ;;  %v1172_v13 = vmul.f32 0.0625, %v639_v48  ;;  %v472_v24 = vsel %vm6244_vm0, %v91_v56, 0.0 }
 0x16b   :  { %v2300_v33 = vrot.slane %v1190_v55, %v4434_v37  ;;  %1022 = vadd.xlane.f32.xlu1 %v1021_v58  ;;  %v169_v55 = vld [vmem:[%s6235_s0 + $0x460] sm:$0xff] }
 0x16c   :  { %v2211_v30 = vrot.slane %v1172_v13, %v4244_v10  ;;  %977 = vadd.xlane.f32.xlu0 %v976_v54  ;;  %v786_v26 = vpop.xlane.xlu1 %785  ;;  %v185_v54 = vld [vmem:[%s6235_s0 + $0x4e0] sm:$0xff] }
 0x16d   :  { %v741_v2 = vpop.xlane.xlu0 %740  ;;  %v5038_v45 = vsel %vm1652_vm7, %v2300_v33, %v4895_v41  ;;  %v1221_v49 = vmul.f32 0.0625, %v786_v26  ;;  %v754_v33 = vsel %vm6244_vm0, %v185_v54, 0.0 }
 0x16e   :  { %v5042_v40 = vsel %vm1638_vm5, %v2211_v30, %v4899_v12  ;;  %v1206_v8 = vmul.f32 0.0625, %v741_v2  ;;  %v562_v12 = vsel %vm6244_vm0, %v121_v15, 0.0  ;;  %v706_v30 = vsel %vm6244_vm0, %v169_v55, 0.0 }
 0x16f   :  { %v2453_v18 = vrot.slane %v1221_v49, %v4332_v29  ;;  %473 = vadd.xlane.f32.xlu1 %v472_v24  ;;  %v215_v49 = vld [vmem:[%s6235_s0 + $0x5d0] sm:$0xff] }
 0x170   :  { %v2379_v23 = vrot.slane %v1206_v8, %v4434_v37  ;;  %428 = vadd.xlane.f32.xlu0 %v427_v25  ;;  %v876_v41 = vpop.xlane.xlu1 %875  ;;  %v200_v8 = vld [vmem:[%s6235_s0 + $0x558] sm:$0xff] }
 0x171   :  { %v831_v47 = vpop.xlane.xlu0 %830  ;;  %v5056_v62 = vsel %vm1645_vm6, %v2453_v18, %v4913_v1  ;;  %v1251_v22 = vmul.f32 0.0625, %v876_v41  ;;  %v799_v41 = vsel %vm6244_vm0, %v200_v8, 0.0 }
 0x172   :  { %v5060_v61 = vsel %vm1652_vm7, %v2379_v23, %v4917_v9  ;;  %v1236_v59 = vmul.f32 0.0625, %v831_v47  ;;  %v652_v9 = vsel %vm6244_vm0, %v151_v31, 0.0  ;;  %v844_v23 = vsel %vm6244_vm0, %v215_v49, 0.0 }
 0x173   :  { %v2601_v39 = vrot.slane %v1251_v22, %v4205_v35  ;;  %563 = vadd.xlane.f32.xlu1 %v562_v12 }
 0x174   :  { %v2527_v43 = vrot.slane %v1236_v59, %v4244_v10  ;;  %518 = vadd.xlane.f32.xlu0 %v517_v51  ;;  %v966_v1 = vpop.xlane.xlu1 %965 }
 0x175   :  { %v921_v34 = vpop.xlane.xlu0 %920  ;;  %v5074_v16 = vsel %vm1631_vm4, %v2601_v39, %v4932_v52  ;;  %v1281_v48 = vmul.f32 0.0625, %v966_v1  ;;  %v1682_v52 = vadd.s32 4294967200, %v4111_v17 }
 0x176   :  { %v5078_v3 = vsel %vm1638_vm5, %v2527_v43, %v4936_v57  ;;  %v1266_v58 = vmul.f32 0.0625, %v921_v34 }
 0x177   :  { %v2749_v13 = vrot.slane %v1281_v48, %v4148_v42  ;;  %653 = vadd.xlane.f32.xlu1 %v652_v9  ;;  %v275_v48 = vld [vmem:[%s6235_s0 + $0x7b0] sm:$0xff] }
 0x178   :  { %v2675_v56 = vrot.slane %v1266_v58, %v4179_v7  ;;  %608 = vadd.xlane.f32.xlu0 %v607_v0  ;;  %v1011_v57 = vpop.xlane.xlu1 %1010  ;;  %v260_v58 = vld [vmem:[%s6235_s0 + $0x738] sm:$0xff] }
 0x179   :  { %v1008_v60 = vpop.xlane.xlu0 %1007  ;;  %v5093_v26 = vsel %vm1617_vm2, %v2749_v13, %v4970_v6  ;;  %v1296_v24 = vmul.f32 0.0625, %v1011_v57  ;;  %v5108_v6 = vsub.s32 %v1682_v52, %v4119_v20 }
 0x17a   :  { %v5097_v2 = vsel %vm1624_vm3, %v2675_v56, %v4952_v63  ;;  %v1295_v25 = vmul.f32 0.0625, %v1008_v60  ;;  %v979_v56 = vsel %vm6244_vm0, %v260_v58, 0.0 }
 0x17b   :  { %v2823_v15 = vrot.slane %v1296_v24, %v4136_v32  ;;  %755 = vadd.xlane.f32.xlu1 %v754_v33  ;;  %v230_v32 = vld [vmem:[%s6235_s0 + $0x648] sm:$0xff]  ;;  %v92_v24 = vld [vmem:[%s6235_s0 + $0x1f8] sm:$0xff] }
 0x17c   :  { %v2819_v14 = vrot.slane %v1295_v25, %v4132_v28  ;;  %707 = vadd.xlane.f32.xlu0 %v706_v30  ;;  %v372_v63 = vpop.xlane.xlu1 %371  ;;  %v245_v28 = vld [vmem:[%s6235_s0 + $0x6c0] sm:$0xff]  ;;  %v889_v43 = vsel %vm6244_vm0, %v230_v32, 0.0  ;;  %v107_v30 = vld [vmem:[%s6235_s0 + $0x270] sm:$0xff] }
 0x17d   :  { %v324_v18 = vpop.xlane.xlu0 %323  ;;  %v1083_v12 = vmul.f32 0.0625, %v372_v63  ;;  %v934_v39 = vsel %vm6244_vm0, %v245_v28, 0.0 }
 0x17e   :  { %v5113_v47 = vsel %vm1610_vm1, %v2823_v15, %v2819_v14  ;;  %v1067_v51 = vmul.f32 0.0625, %v324_v18  ;;  %v475_v15 = vsel %vm6244_vm0, %v92_v24, 0.0  ;;  %vm2895_vm1 = vcmask 1041409  }
 0x17f   :  { %v1772_v22 = vrot.slane %v1083_v12, %v5108_v6  ;;  %845 = vadd.xlane.f32.xlu1 %v844_v23  ;;  %v122_v12 = vld [vmem:[%s6235_s0 + $0x2e8] sm:$0xff] }
 0x180   :  { %v1686_v59 = vrot.slane %v1067_v51, %v5108_v6  ;;  %800 = vadd.xlane.f32.xlu0 %v799_v41  ;;  %v462_v31 = vpop.xlane.xlu1 %461  ;;  %v137_v41 = vld [vmem:[%s6235_s0 + $0x360] sm:$0xff] }
 0x181   :  { %v417_v44 = vpop.xlane.xlu0 %416  ;;  %v5127_v1 = vsel %vm1687_vm12, %v1772_v22, %v4988_v53  ;;  %v1113_v9 = vmul.f32 0.0625, %v462_v31  ;;  %v565_v22 = vsel %vm6244_vm0, %v122_v12, 0.0 }
 0x182   :  { %v5131_v34 = vsel %vm1687_vm12, %v1686_v59, %v4967_v21  ;;  %v1098_v0 = vmul.f32 0.0625, %v417_v44  ;;  %v1024_v21 = vsel %vm6244_vm0, %v275_v48, 0.0 }
 0x183   :  { %v1920_v54 = vrot.slane %v1113_v9, %v4803_v11  ;;  %935 = vadd.xlane.f32.xlu1 %v934_v39  ;;  %v152_v9 = vld [vmem:[%s6235_s0 + $0x3d8] sm:$0xff] }
 0x184   :  { %v1846_v55 = vrot.slane %v1098_v0, %v4946_v19  ;;  %890 = vadd.xlane.f32.xlu0 %v889_v43  ;;  %v552_v53 = vpop.xlane.xlu1 %551  ;;  %v170_v43 = vld [vmem:[%s6235_s0 + $0x468] sm:$0xff] }
 0x185   :  { %v507_v13 = vpop.xlane.xlu0 %506  ;;  %v5145_v52 = vsel %vm1673_vm10, %v1920_v54, %v5006_v5  ;;  %v1143_v60 = vmul.f32 0.0625, %v552_v53  ;;  %v655_v54 = vsel %vm6244_vm0, %v152_v9, 0.0 }
 0x186   :  { %v5149_v57 = vsel %vm1680_vm11, %v1846_v55, %v4984_v4  ;;  %v1128_v33 = vmul.f32 0.0625, %v507_v13  ;;  %v520_v4 = vsel %vm6244_vm0, %v107_v30, 0.0 }
 0x187   :  { %v2068_v25 = vrot.slane %v1143_v60, %v4554_v46  ;;  %1025 = vadd.xlane.f32.xlu1 %v1024_v21  ;;  %v186_v60 = vld [vmem:[%s6235_s0 + $0x4e8] sm:$0xff] }
 0x188   :  { %v1994_v49 = vrot.slane %v1128_v33, %v4679_v38  ;;  %980 = vadd.xlane.f32.xlu0 %v979_v56  ;;  %v642_v5 = vpop.xlane.xlu1 %641  ;;  %v201_v56 = vld [vmem:[%s6235_s0 + $0x560] sm:$0xff] }
 0x189   :  { %v597_v8 = vpop.xlane.xlu0 %596  ;;  %v5163_v14 = vsel %vm1659_vm8, %v2068_v25, %v5024_v36  ;;  %v1173_v18 = vmul.f32 0.0625, %v642_v5  ;;  %v757_v25 = vsel %vm6244_vm0, %v186_v60, 0.0 }
 0x18a   :  { %v5167_v63 = vsel %vm1666_vm9, %v1994_v49, %v5002_v27  ;;  %v1158_v23 = vmul.f32 0.0625, %v597_v8  ;;  %v610_v27 = vsel %vm6244_vm0, %v137_v41, 0.0 }
 0x18b   :  { %v2216_v51 = vrot.slane %v1173_v18, %v4332_v29  ;;  %521 = vadd.xlane.f32.xlu1 %v520_v4  ;;  %v216_v18 = vld [vmem:[%s6235_s0 + $0x5d8] sm:$0xff] }
 0x18c   :  { %v2142_v28 = vrot.slane %v1158_v23, %v4434_v37  ;;  %476 = vadd.xlane.f32.xlu0 %v475_v15  ;;  %v744_v36 = vpop.xlane.xlu1 %743  ;;  %v231_v15 = vld [vmem:[%s6235_s0 + $0x650] sm:$0xff] }
 0x18d   :  { %v696_v32 = vpop.xlane.xlu0 %695  ;;  %v5181_v59 = vsel %vm1645_vm6, %v2216_v51, %v5042_v40  ;;  %v1207_v44 = vmul.f32 0.0625, %v744_v36  ;;  %v892_v51 = vsel %vm6244_vm0, %v231_v15, 0.0 }
 0x18e   :  { %v5185_v31 = vsel %vm1652_vm7, %v2142_v28, %v5020_v50  ;;  %v1191_v39 = vmul.f32 0.0625, %v696_v32  ;;  %v709_v50 = vsel %vm6244_vm0, %v170_v43, 0.0  ;;  %v847_v28 = vsel %vm6244_vm0, %v216_v18, 0.0 }
 0x18f   :  { %v2384_v0 = vrot.slane %v1207_v44, %v4554_v46  ;;  %611 = vadd.xlane.f32.xlu1 %v610_v27  ;;  %v261_v44 = vld [vmem:[%s6235_s0 + $0x740] sm:$0xff] }
 0x190   :  { %v2305_v48 = vrot.slane %v1191_v39, %v4554_v46  ;;  %566 = vadd.xlane.f32.xlu0 %v565_v22  ;;  %v834_v40 = vpop.xlane.xlu1 %833  ;;  %v246_v39 = vld [vmem:[%s6235_s0 + $0x6c8] sm:$0xff] }
 0x191   :  { %v789_v58 = vpop.xlane.xlu0 %788  ;;  %v5199_v55 = vsel %vm1659_vm8, %v2384_v0, %v5060_v61  ;;  %v1237_v13 = vmul.f32 0.0625, %v834_v40  ;;  %v937_v40 = vsel %vm6244_vm0, %v246_v39, 0.0 }
 0x192   :  { %v5203_v53 = vsel %vm1659_vm8, %v2305_v48, %v5038_v45  ;;  %v1222_v21 = vmul.f32 0.0625, %v789_v58  ;;  %v802_v45 = vsel %vm6244_vm0, %v201_v56, 0.0  ;;  %v982_v48 = vsel %vm6244_vm0, %v261_v44, 0.0 }
 0x193   :  { %v2532_v33 = vrot.slane %v1237_v13, %v4332_v29  ;;  %710 = vadd.xlane.f32.xlu1 %v709_v50  ;;  %v108_v13 = vld [vmem:[%s6235_s0 + $0x278] sm:$0xff] }
 0x194   :  { %v2458_v30 = vrot.slane %v1222_v21, %v4434_v37  ;;  %656 = vadd.xlane.f32.xlu0 %v655_v54  ;;  %v924_v61 = vpop.xlane.xlu1 %923  ;;  %v276_v21 = vld [vmem:[%s6235_s0 + $0x7b8] sm:$0xff] }
 0x195   :  { %v879_v24 = vpop.xlane.xlu0 %878  ;;  %v5217_v49 = vsel %vm1645_vm6, %v2532_v33, %v5078_v3  ;;  %v1267_v8 = vmul.f32 0.0625, %v924_v61  ;;  %v1689_v3 = vadd.s32 4294967192, %v4111_v17  ;;  %v523_v33 = vsel %vm6244_vm0, %v108_v13, 0.0 }
 0x196   :  { %v5221_v5 = vsel %vm1652_vm7, %v2458_v30, %v5056_v62  ;;  %v1252_v4 = vmul.f32 0.0625, %v879_v24  ;;  %v1027_v30 = vsel %vm6244_vm0, %v276_v21, 0.0 }
 0x197   :  { %v2680_v23 = vrot.slane %v1267_v8, %v4205_v35  ;;  %803 = vadd.xlane.f32.xlu1 %v802_v45  ;;  %v138_v8 = vld [vmem:[%s6235_s0 + $0x368] sm:$0xff] }
 0x198   :  { %v2606_v41 = vrot.slane %v1252_v4, %v4244_v10  ;;  %758 = vadd.xlane.f32.xlu0 %v757_v25  ;;  %v1014_v62 = vpop.xlane.xlu1 %1013  ;;  %v123_v4 = vld [vmem:[%s6235_s0 + $0x2f0] sm:$0xff] }
 0x199   :  { %v969_v12 = vpop.xlane.xlu0 %968  ;;  %v5236_v36 = vsel %vm1631_vm4, %v2680_v23, %v5097_v2  ;;  %v1297_v27 = vmul.f32 0.0625, %v1014_v62  ;;  %v5251_v2 = vsub.s32 %v1689_v3, %v4119_v20 }
 0x19a   :  { %v5240_v32 = vsel %vm1638_vm5, %v2606_v41, %v5074_v16  ;;  %v1282_v22 = vmul.f32 0.0625, %v969_v12  ;;  %v568_v41 = vsel %vm6244_vm0, %v123_v4, 0.0 }
 0x19b   :  { %v2828_v43 = vrot.slane %v1297_v27, %v4148_v42  ;;  %893 = vadd.xlane.f32.xlu1 %v892_v51  ;;  %v153_v27 = vld [vmem:[%s6235_s0 + $0x3e0] sm:$0xff] }
 0x19c   :  { %v2754_v9 = vrot.slane %v1282_v22, %v4179_v7  ;;  %848 = vadd.xlane.f32.xlu0 %v847_v28  ;;  %v375_v16 = vpop.xlane.xlu1 %374  ;;  %v171_v28 = vld [vmem:[%s6235_s0 + $0x470] sm:$0xff] }
 0x19d   :  { %v327_v0 = vpop.xlane.xlu0 %326  ;;  %v5257_v58 = vsel %vm1617_vm2, %v2828_v43, %v5113_v47  ;;  %v1084_v50 = vmul.f32 0.0625, %v375_v16  ;;  %v658_v43 = vsel %vm6244_vm0, %v153_v27, 0.0 }
 0x19e   :  { %v5261_v42 = vsel %vm1624_vm3, %v2754_v9, %v5093_v26  ;;  %v1068_v54 = vmul.f32 0.0625, %v327_v0 }
 0x19f   :  { %v1777_v56 = vrot.slane %v1084_v50, %v5251_v2  ;;  %983 = vadd.xlane.f32.xlu1 %v982_v48  ;;  %v187_v50 = vld [vmem:[%s6235_s0 + $0x4f0] sm:$0xff] }
 0x1a0   :  { %v1693_v47 = vrot.slane %v1068_v54, %v5251_v2  ;;  %938 = vadd.xlane.f32.xlu0 %v937_v40  ;;  %v465_v60 = vpop.xlane.xlu1 %464  ;;  %v202_v40 = vld [vmem:[%s6235_s0 + $0x568] sm:$0xff] }
 0x1a1   :  { %v420_v26 = vpop.xlane.xlu0 %419  ;;  %v5275_v61 = vsel %vm1694_vm13, %v1777_v56, %v5127_v1  ;;  %v1114_v45 = vmul.f32 0.0625, %v465_v60  ;;  %v760_v56 = vsel %vm6244_vm0, %v187_v50, 0.0 }
 0x1a2   :  { %v5279_v24 = vsel %vm1694_vm13, %v1693_v47, %v5131_v34  ;;  %v1099_v25 = vmul.f32 0.0625, %v420_v26  ;;  %v613_v34 = vsel %vm6244_vm0, %v138_v8, 0.0 }
 0x1a3   :  { %v1925_v15 = vrot.slane %v1114_v45, %v4946_v19  ;;  %524 = vadd.xlane.f32.xlu1 %v523_v33  ;;  %v217_v45 = vld [vmem:[%s6235_s0 + $0x5e0] sm:$0xff] }
 0x1a4   :  { %v1851_v18 = vrot.slane %v1099_v25, %v5108_v6  ;;  %1028 = vadd.xlane.f32.xlu0 %v1027_v30  ;;  %v555_v1 = vpop.xlane.xlu1 %554  ;;  %v232_v30 = vld [vmem:[%s6235_s0 + $0x658] sm:$0xff] }
 0x1a5   :  { %v510_v23 = vpop.xlane.xlu0 %509  ;;  %v5293_v3 = vsel %vm1680_vm11, %v1925_v15, %v5145_v52  ;;  %v1144_v12 = vmul.f32 0.0625, %v555_v1  ;;  %v850_v15 = vsel %vm6244_vm0, %v217_v45, 0.0 }
 0x1a6   :  { %v5297_v62 = vsel %vm1687_vm12, %v1851_v18, %v5149_v57  ;;  %v1129_v51 = vmul.f32 0.0625, %v510_v23  ;;  %v712_v57 = vsel %vm6244_vm0, %v171_v28, 0.0 }
 0x1a7   :  { %v2073_v22 = vrot.slane %v1144_v12, %v4679_v38  ;;  %614 = vadd.xlane.f32.xlu1 %v613_v34  ;;  %v247_v12 = vld [vmem:[%s6235_s0 + $0x6d0] sm:$0xff] }
 0x1a8   :  { %v1999_v44 = vrot.slane %v1129_v51, %v4803_v11  ;;  %569 = vadd.xlane.f32.xlu0 %v568_v41  ;;  %v645_v52 = vpop.xlane.xlu1 %644  ;;  %v262_v41 = vld [vmem:[%s6235_s0 + $0x748] sm:$0xff] }
 0x1a9   :  { %v600_v39 = vpop.xlane.xlu0 %599  ;;  %v5311_v9 = vsel %vm1666_vm9, %v2073_v22, %v5163_v14  ;;  %v1174_v0 = vmul.f32 0.0625, %v645_v52  ;;  %v940_v22 = vsel %vm6244_vm0, %v247_v12, 0.0 }
 0x1aa   :  { %v5315_v16 = vsel %vm1673_vm10, %v1999_v44, %v5167_v63  ;;  %v1159_v48 = vmul.f32 0.0625, %v600_v39  ;;  %v805_v63 = vsel %vm6244_vm0, %v202_v40, 0.0 }
 0x1ab   :  { %v2221_v54 = vrot.slane %v1174_v0, %v4434_v37  ;;  %713 = vadd.xlane.f32.xlu1 %v712_v57  ;;  %v277_v0 = vld [vmem:[%s6235_s0 + $0x7c0] sm:$0xff] }
 0x1ac   :  { %v2147_v13 = vrot.slane %v1159_v48, %v4554_v46  ;;  %659 = vadd.xlane.f32.xlu0 %v658_v43  ;;  %v747_v14 = vpop.xlane.xlu1 %746  ;;  %v124_v43 = vld [vmem:[%s6235_s0 + $0x2f8] sm:$0xff] }
 0x1ad   :  { %v699_v21 = vpop.xlane.xlu0 %698  ;;  %v5329_v47 = vsel %vm1652_vm7, %v2221_v54, %v5181_v59  ;;  %v1208_v26 = vmul.f32 0.0625, %v747_v14  ;;  %v571_v54 = vsel %vm6244_vm0, %v124_v43, 0.0 }
 0x1ae   :  { %v5333_v60 = vsel %vm1659_vm8, %v2147_v13, %v5185_v31  ;;  %v1192_v33 = vmul.f32 0.0625, %v699_v21  ;;  %v895_v31 = vsel %vm6244_vm0, %v232_v30, 0.0  ;;  %v1030_v13 = vsel %vm6244_vm0, %v277_v0, 0.0 }
 0x1af   :  { %v2389_v25 = vrot.slane %v1208_v26, %v4679_v38  ;;  %806 = vadd.xlane.f32.xlu1 %v805_v63  ;;  %v154_v26 = vld [vmem:[%s6235_s0 + $0x3e8] sm:$0xff] }
 0x1b0   :  { %v2310_v8 = vrot.slane %v1192_v33, %v4679_v38  ;;  %761 = vadd.xlane.f32.xlu0 %v760_v56  ;;  %v837_v59 = vpop.xlane.xlu1 %836  ;;  %v139_v33 = vld [vmem:[%s6235_s0 + $0x370] sm:$0xff] }
 0x1b1   :  { %v792_v4 = vpop.xlane.xlu0 %791  ;;  %v5347_v18 = vsel %vm1666_vm9, %v2389_v25, %v5199_v55  ;;  %v1238_v23 = vmul.f32 0.0625, %v837_v59  ;;  %v616_v59 = vsel %vm6244_vm0, %v139_v33, 0.0 }
 0x1b2   :  { %v5351_v1 = vsel %vm1666_vm9, %v2310_v8, %v5203_v53  ;;  %v1223_v34 = vmul.f32 0.0625, %v792_v4  ;;  %v985_v53 = vsel %vm6244_vm0, %v262_v41, 0.0  ;;  %v661_v8 = vsel %vm6244_vm0, %v154_v26, 0.0 }
 0x1b3   :  { %v2537_v51 = vrot.slane %v1238_v23, %v4434_v37  ;;  %896 = vadd.xlane.f32.xlu1 %v895_v31  ;;  %v188_v23 = vld [vmem:[%s6235_s0 + $0x4f8] sm:$0xff] }
 0x1b4   :  { %v2463_v28 = vrot.slane %v1223_v34, %v4554_v46  ;;  %851 = vadd.xlane.f32.xlu0 %v850_v15  ;;  %v927_v55 = vpop.xlane.xlu1 %926  ;;  %v172_v34 = vld [vmem:[%s6235_s0 + $0x478] sm:$0xff] }
 0x1b5   :  { %v882_v27 = vpop.xlane.xlu0 %881  ;;  %v5365_v44 = vsel %vm1652_vm7, %v2537_v51, %v5217_v49  ;;  %v1268_v39 = vmul.f32 0.0625, %v927_v55  ;;  %v1696_v49 = vadd.s32 4294967184, %v4111_v17  ;;  %v763_v51 = vsel %vm6244_vm0, %v188_v23, 0.0 }
 0x1b6   :  { %6247 = vst [vmem:[#allocation7_spill] sm:$0xff] %v5365_v44  ;;  %v5369_v52 = vsel %vm1659_vm8, %v2463_v28, %v5221_v5  ;;  %v1253_v57 = vmul.f32 0.0625, %v882_v27  ;;  %v715_v28 = vsel %vm6244_vm0, %v172_v34, 0.0 }
 0x1b7   :  { %v2685_v48 = vrot.slane %v1268_v39, %v4244_v10  ;;  %986 = vadd.xlane.f32.xlu1 %v985_v53  ;;  %v218_v39 = vld [vmem:[%s6235_s0 + $0x5e8] sm:$0xff] }
 0x1b8   :  { %v2611_v40 = vrot.slane %v1253_v57, %v4332_v29  ;;  %941 = vadd.xlane.f32.xlu0 %v940_v22  ;;  %v1017_v5 = vpop.xlane.xlu1 %1016  ;;  %v203_v57 = vld [vmem:[%s6235_s0 + $0x570] sm:$0xff] }
 0x1b9   :  { %v972_v50 = vpop.xlane.xlu0 %971  ;;  %v5384_v14 = vsel %vm1638_vm5, %v2685_v48, %v5236_v36  ;;  %v1298_v63 = vmul.f32 0.0625, %v1017_v5  ;;  %v5399_v36 = vsub.s32 %v1696_v49, %v4119_v20 }
 0x1ba   :  { %6248 = vst [vmem:[#allocation8_spill] sm:$0xff] %v5384_v14  ;;  %v5388_v21 = vsel %vm1645_vm6, %v2611_v40, %v5240_v32  ;;  %v1283_v56 = vmul.f32 0.0625, %v972_v50  ;;  %v808_v40 = vsel %vm6244_vm0, %v203_v57, 0.0 }
 0x1bb   :  { %v2833_v30 = vrot.slane %v1298_v63, %v4179_v7  ;;  %572 = vadd.xlane.f32.xlu1 %v571_v54  ;;  %v233_v63 = vld [vmem:[%s6235_s0 + $0x660] sm:$0xff] }
 0x1bc   :  { %v2759_v45 = vrot.slane %v1283_v56, %v4205_v35  ;;  %1031 = vadd.xlane.f32.xlu0 %v1030_v13  ;;  %v378_v32 = vpop.xlane.xlu1 %377  ;;  %v248_v13 = vld [vmem:[%s6235_s0 + $0x6d8] sm:$0xff] }
 0x1bd   :  { %v330_v25 = vpop.xlane.xlu0 %329  ;;  %v5405_v4 = vsel %vm1624_vm3, %v2833_v30, %v5257_v58  ;;  %v1085_v31 = vmul.f32 0.0625, %v378_v32  ;;  %v898_v30 = vsel %vm6244_vm0, %v233_v63, 0.0  ;;  %vm2897_vm3 = vcmask 1042434  }
 0x1be   :  { %v5409_v7 = vsel %vm1631_vm4, %v2759_v45, %v5261_v42  ;;  %v1069_v15 = vmul.f32 0.0625, %v330_v25 }
 0x1bf   :  { %v1782_v41 = vrot.slane %v1085_v31, %v5399_v36  ;;  %662 = vadd.xlane.f32.xlu1 %v661_v8  ;;  %v263_v31 = vld [vmem:[%s6235_s0 + $0x750] sm:$0xff] }
 0x1c0   :  { %v1700_v58 = vrot.slane %v1069_v15, %v5399_v36  ;;  %617 = vadd.xlane.f32.xlu0 %v616_v59  ;;  %v468_v12 = vpop.xlane.xlu1 %467  ;;  %v278_v59 = vld [vmem:[%s6235_s0 + $0x7c8] sm:$0xff] }
 0x1c1   :  { %v423_v42 = vpop.xlane.xlu0 %422  ;;  %v5423_v55 = vsel %vm1701_vm14, %v1782_v41, %v5275_v61  ;;  %v1115_v53 = vmul.f32 0.0625, %v468_v12  ;;  %v1033_v34 = vsel %vm6244_vm0, %v278_v59, 0.0  ;;  %v988_v41 = vsel %vm6244_vm0, %v263_v31, 0.0  ;;  %v1318_v59 = vld [vmem:[%s6236_s1 + $0x38] sm:$0xff] }
 0x1c2   :  { %v5427_v27 = vsel %vm1701_vm14, %v1700_v58, %v5279_v24  ;;  %v1100_v22 = vmul.f32 0.0625, %v423_v42  ;;  %v853_v24 = vsel %vm6244_vm0, %v218_v39, 0.0  ;;  %v155_v42 = vld [vmem:[%s6235_s0 + $0x3f0] sm:$0xff]  ;;  %v204_v39 = vld [vmem:[%s6235_s0 + $0x578] sm:$0xff] }
 0x1c3   :  { %v1930_v43 = vrot.slane %v1115_v53, %v5108_v6  ;;  %764 = vadd.xlane.f32.xlu1 %v763_v51  ;;  %v140_v51 = vld [vmem:[%s6235_s0 + $0x378] sm:$0xff] }
 0x1c4   :  { %v1856_v0 = vrot.slane %v1100_v22, %v5251_v2  ;;  %716 = vadd.xlane.f32.xlu0 %v715_v28  ;;  %v558_v61 = vpop.xlane.xlu1 %557  ;;  %v619_v22 = vsel %vm6244_vm0, %v140_v51, 0.0  ;;  %v264_v31 = vld [vmem:[%s6235_s0 + $0x758] sm:$0xff] }
 0x1c5   :  { %v513_v48 = vpop.xlane.xlu0 %512  ;;  %v5441_v49 = vsel %vm1687_vm12, %v1930_v43, %v5293_v3  ;;  %v1145_v50 = vmul.f32 0.0625, %v558_v61  ;;  %v811_v61 = vsel %vm6244_vm0, %v204_v39, 0.0  ;;  %v220_v39 = vld [vmem:[%s6235_s0 + $0x5f8] sm:$0xff] }
 0x1c6   :  { %v5445_v5 = vsel %vm1694_vm13, %v1856_v0, %v5297_v62  ;;  %v1130_v54 = vmul.f32 0.0625, %v513_v48  ;;  %v943_v62 = vsel %vm6244_vm0, %v248_v13, 0.0  ;;  %v249_v48 = vld [vmem:[%s6235_s0 + $0x6e0] sm:$0xff]  ;;  %v1313_v13 = vld [vmem:[%s6236_s1 + $0x10] sm:$0xff] }
 0x1c7   :  { %v2078_v56 = vrot.slane %v1145_v50, %v4803_v11  ;;  %854 = vadd.xlane.f32.xlu1 %v853_v24  ;;  %v1312_v24 = vld [vmem:[%s6236_s1 + $0x8] sm:$0xff] }
 0x1c8   :  { %v2004_v26 = vrot.slane %v1130_v54, %v4946_v19  ;;  %809 = vadd.xlane.f32.xlu0 %v808_v40  ;;  %v648_v3 = vpop.xlane.xlu1 %647  ;;  %v1314_v40 = vld [vmem:[%s6236_s1 + $0x18] sm:$0xff]  ;;  %v234_v50 = vld [vmem:[%s6235_s0 + $0x668] sm:$0xff]  ;;  %v1311_v54 = vld [vmem:[%s6236_s1] sm:$0xff] }
 0x1c9   :  { %v603_v33 = vpop.xlane.xlu0 %602  ;;  %v5459_v45 = vsel %vm1673_vm10, %v2078_v56, %v5311_v9  ;;  %v1175_v25 = vmul.f32 0.0625, %v648_v3  ;;  %v3705_v63 = vpack.c.bf16 %v1314_v40, %v1312_v24  ;;  %v3707_v56 = vpack.c.bf16 %v1313_v13, %v1311_v54  ;;  %v156_v40 = vld [vmem:[%s6235_s0 + $0x3f8] sm:$0xff]  ;;  %v1321_v54 = vld [vmem:[%s6236_s1 + $0x50] sm:$0xff] }
 0x1ca   :  { %v5463_v32 = vsel %vm1680_vm11, %v2004_v26, %v5315_v16  ;;  %v1160_v8 = vmul.f32 0.0625, %v603_v33  ;;  %v1703_v26 = vadd.s32 4294967176, %v4111_v17 }
 0x1cb   :  { %v2226_v15 = vrot.slane %v1175_v25, %v4554_v46  ;;  %944 = vadd.xlane.f32.xlu1 %v943_v62  ;;  %v946_v62 = vsel %vm6244_vm0, %v249_v48, 0.0  ;;  %v279_v25 = vld [vmem:[%s6235_s0 + $0x7d0] sm:$0xff]  ;;  %3706 = vmatprep.subr.bf16.mxu0 %v3705_v63 }
 0x1cc   :  { %v2152_v23 = vrot.slane %v1160_v8, %v4679_v38  ;;  %899 = vadd.xlane.f32.xlu0 %v898_v30  ;;  %v5473_v9 = vpop.xlane.xlu1 %749  ;;  %v901_v30 = vsel %vm6244_vm0, %v234_v50, 0.0  ;;  %v1316_v8 = vld [vmem:[%s6236_s1 + $0x28] sm:$0xff]  ;;  %3708 = vmatpush1.bf16.msra.mxu0 %v3707_v56  ;;  %v1319_v50 = vld [vmem:[%s6236_s1 + $0x40] sm:$0xff] }
 0x1cd   :  { %v5475_v16 = vpop.xlane.xlu0 %701  ;;  %v5481_v58 = vsel %vm1659_vm8, %v2226_v15, %v5329_v47  ;;  %v664_v47 = vsel %vm6244_vm0, %v155_v42, 0.0  ;;  %v1315_v15 = vld [vmem:[%s6236_s1 + $0x20] sm:$0xff]  ;;  %v5555_v42 = vsub.s32 %v1703_v26, %v4119_v20  ;;  %v3715_v63 = vpack.c.bf16 %v1321_v54, %v1319_v50 }
 0x1ce   :  { %v5485_v12 = vsel %vm1666_vm9, %v2152_v23, %v5333_v60  ;;  %v219_v60 = vld [vmem:[%s6235_s0 + $0x5f0] sm:$0xff]  ;;  %v265_v50 = vld [vmem:[%s6235_s0 + $0x760] sm:$0xff] }
 0x1cf   :  { %1034 = vadd.xlane.f32.xlu1 %v1033_v34  ;;  %v856_v0 = vsel %vm6244_vm0, %v219_v60, 0.0  ;;  %v1317_v23 = vld [vmem:[%s6236_s1 + $0x30] sm:$0xff]  ;;  %v3709_v34 = vpack.c.bf16 %v1318_v59, %v1316_v8  ;;  %v991_v60 = vsel %vm6244_vm0, %v264_v31, 0.0  ;;  %v667_v8 = vsel %vm6244_vm0, %v156_v40, 0.0  ;;  %v250_v59 = vld [vmem:[%s6235_s0 + $0x6e8] sm:$0xff]  ;;  %v1330_v40 = vld [vmem:[%s6236_s1 + $0x98] sm:$0xff] }
 0x1d0   :  { %989 = vadd.xlane.f32.xlu0 %v988_v41  ;;  %v5493_v28 = vpop.xlane.xlu1 %839  ;;  %v3711_v41 = vpack.c.bf16 %v1317_v23, %v1315_v15  ;;  %v1324_v31 = vld [vmem:[%s6236_s1 + $0x68] sm:$0xff]  ;;  %v1326_v15 = vld [vmem:[%s6236_s1 + $0x78] sm:$0xff]  ;;  %v1327_v54 = vld [vmem:[%s6236_s1 + $0x80] sm:$0xff] }
 0x1d1   :  { %v5495_v53 = vpop.xlane.xlu0 %794  ;;  %3710 = vmatprep.subr.bf16.mxu0 %v3709_v34 }
 0x1d2   :  { %3712 = vmatpush1.bf16.msra.mxu0 %v3711_v41  ;;  %v235_v41 = vld [vmem:[%s6235_s0 + $0x670] sm:$0xff]  ;;  %v5758_v20 = vmul.f32 0.0625, %v5495_v53 }
 0x1d3   :  { %665 = vadd.xlane.f32.xlu1 %v664_v47 }
 0x1d4   :  { %620 = vadd.xlane.f32.xlu0 %v619_v22  ;;  %v5505_v57 = vpop.xlane.xlu1 %929  ;;  %v1036_v22 = vsel %vm6244_vm0, %v279_v25, 0.0  ;;  %v859_v25 = vsel %vm6244_vm0, %v220_v39, 0.0 }
 0x1d5   :  { %v5507_v43 = vpop.xlane.xlu0 %884 }
 0x1d7   :  { %857 = vadd.xlane.f32.xlu1 %v856_v0  ;;  %v1320_v0 = vld [vmem:[%s6236_s1 + $0x48] sm:$0xff] }
 0x1d8   :  { %812 = vadd.xlane.f32.xlu0 %v811_v61  ;;  %v5530_v3 = vpop.xlane.xlu1 %1019  ;;  %v1322_v61 = vld [vmem:[%s6236_s1 + $0x58] sm:$0xff] }
 0x1d9   :  { %v5532_v33 = vpop.xlane.xlu0 %974  ;;  %v3713_v13 = vpack.c.bf16 %v1322_v61, %v1320_v0  ;;  %v949_v0 = vsel %vm6244_vm0, %v250_v59, 0.0  ;;  %v904_v61 = vsel %vm6244_vm0, %v235_v41, 0.0  ;;  %v994_v59 = vsel %vm6244_vm0, %v265_v50, 0.0  ;;  %v1331_v41 = vld [vmem:[%s6236_s1 + $0xa0] sm:$0xff]  ;;  %v1338_v50 = vld [vmem:[%s6236_s1 + $0xd8] sm:$0xff] }
 0x1db   :  { %947 = vadd.xlane.f32.xlu1 %v946_v62  ;;  %3714 = vmatprep.subr.bf16.mxu0 %v3713_v13  ;;  %v1329_v13 = vld [vmem:[%s6236_s1 + $0x90] sm:$0xff] }
 0x1dc   :  { %902 = vadd.xlane.f32.xlu0 %v901_v30  ;;  %v381_v51 = vpop.xlane.xlu1 %380  ;;  %3716 = vmatpush1.bf16.msra.mxu0 %v3715_v63 }
 0x1dd   :  { %v333_v47 = vpop.xlane.xlu0 %332  ;;  %v1086_v48 = vmul.f32 0.0625, %v381_v51  ;;  %v1323_v51 = vld [vmem:[%s6236_s1 + $0x60] sm:$0xff] }
 0x1de   :  { %v1070_v24 = vmul.f32 0.0625, %v333_v47  ;;  %v1325_v47 = vld [vmem:[%s6236_s1 + $0x70] sm:$0xff] }
 0x1df   :  { %v1787_v56 = vrot.slane %v1086_v48, %v5555_v42  ;;  %1037 = vadd.xlane.f32.xlu1 %v1036_v22  ;;  %v280_v48 = vld [vmem:[%s6235_s0 + $0x7d8] sm:$0xff] }
 0x1e0   :  { %v1707_v26 = vrot.slane %v1070_v24, %v5555_v42  ;;  %992 = vadd.xlane.f32.xlu0 %v991_v60  ;;  %v5579_v62 = vpop.xlane.xlu1 %470  ;;  %v3719_v60 = vpack.c.bf16 %v1325_v47, %v1323_v51  ;;  %v1328_v24 = vld [vmem:[%s6236_s1 + $0x88] sm:$0xff]  ;;  %v1333_v51 = vld [vmem:[%s6236_s1 + $0xb0] sm:$0xff] }
 0x1e1   :  { %v5581_v30 = vpop.xlane.xlu0 %425  ;;  %v1788_v23 = vsel %vm1708_vm15, %v1787_v56, %v5423_v55  ;;  %v3717_v55 = vpack.c.bf16 %v1326_v15, %v1324_v31  ;;  %v3721_v63 = vpack.c.bf16 %v1330_v40, %v1328_v24  ;;  %v3723_v56 = vpack.c.bf16 %v1329_v13, %v1327_v54  ;;  %v251_v31 = vld [vmem:[%s6235_s0 + $0x6f0] sm:$0xff]  ;;  %v1332_v15 = vld [vmem:[%s6236_s1 + $0xa8] sm:$0xff]  ;;  %v281_v24 = vld [vmem:[%s6235_s0 + $0x7e0] sm:$0xff] }
 0x1e2   :  { %v1709_v34 = vsel %vm1708_vm15, %v1707_v26, %v5427_v27  ;;  %v1336_v40 = vld [vmem:[%s6236_s1 + $0xc8] sm:$0xff]  ;;  %v1335_v13 = vld [vmem:[%s6236_s1 + $0xc0] sm:$0xff] }
 0x1e3   :  { %v5608_v22 = vsel %vm2895_vm1, %v1788_v23, %v1709_v34  ;;  %860 = vadd.xlane.f32.xlu1 %v859_v25  ;;  %3718 = vmatprep.subr.bf16.mxu0 %v3717_v55  ;;  %v1334_v23 = vld [vmem:[%s6236_s1 + $0xb8] sm:$0xff]  ;;  %v3727_v55 = vpack.c.bf16 %v1333_v51, %v1331_v41  ;;  %v266_v54 = vld [vmem:[%s6235_s0 + $0x768] sm:$0xff] }
 0x1e4   :  { %668 = vadd.xlane.f32.xlu0 %v667_v8  ;;  %v5610_v27 = vpop.xlane.xlu1 %560  ;;  %3720 = vmatpush1.bf16.msra.mxu0 %v3719_v60  ;;  %v1039_v8 = vsel %vm6244_vm0, %v280_v48, 0.0  ;;  %v236_v34 = vld [vmem:[%s6235_s0 + $0x678] sm:$0xff]  ;;  %v3725_v47 = vpack.c.bf16 %v1334_v23, %v1332_v15  ;;  %v1042_v15 = vsel %vm6244_vm0, %v281_v24, 0.0  ;;  %v997_v23 = vsel %vm6244_vm0, %v266_v54, 0.0  ;;  %v1340_v41 = vld [vmem:[%s6236_s1 + $0xe8] sm:$0xff] }
 0x1e5   :  { %v5612_v39 = vpop.xlane.xlu0 %515  ;;  %3722 = vmatprep.subr.bf16.mxu0 %v3721_v63  ;;  %v907_v48 = vsel %vm6244_vm0, %v236_v34, 0.0  ;;  %v1337_v63 = vld [vmem:[%s6236_s1 + $0xd0] sm:$0xff]  ;;  %v1342_v51 = vld [vmem:[%s6236_s1 + $0xf8] sm:$0xff] }
 0x1e6   :  { %v267_v34 = vld [vmem:[%s6235_s0 + $0x770] sm:$0xff] }
 0x1e7   :  { %950 = vadd.xlane.f32.xlu1 %v949_v0  ;;  %v1000_v54 = vsel %vm6244_vm0, %v267_v34, 0.0 }
 0x1e8   :  { %905 = vadd.xlane.f32.xlu0 %v904_v61  ;;  %v5634_v26 = vpop.xlane.xlu1 %650  ;;  %3724 = vmatpush1.bf16.msra.mxu0 %v3723_v56  ;;  %v952_v61 = vsel %vm6244_vm0, %v251_v31, 0.0  ;;  %v3729_v56 = vpack.c.bf16 %v1338_v50, %v1336_v40 }
 0x1e9   :  { %v5636_v25 = vpop.xlane.xlu0 %605  ;;  %3726 = vmatprep.subr.bf16.mxu0 %v3725_v47  ;;  %v252_v47 = vld [vmem:[%s6235_s0 + $0x6f8] sm:$0xff] }
 0x1eb   :  { %1040 = vadd.xlane.f32.xlu1 %v1039_v8  ;;  %v3731_v8 = vpack.c.bf16 %v1337_v63, %v1335_v13  ;;  %v955_v13 = vsel %vm6244_vm0, %v252_v47, 0.0  ;;  %v268_v63 = vld [vmem:[%s6235_s0 + $0x778] sm:$0xff]  ;;  %v283_v47 = vld [vmem:[%s6235_s0 + $0x7f0] sm:$0xff] }
 0x1ec   :  { %995 = vadd.xlane.f32.xlu0 %v994_v59  ;;  %v5658_v60 = vpop.xlane.xlu1 %752  ;;  %3728 = vmatpush1.bf16.msra.mxu0 %v3727_v55  ;;  %v1339_v55 = vld [vmem:[%s6236_s1 + $0xe0] sm:$0xff]  ;;  %v1003_v34 = vsel %vm6244_vm0, %v268_v63, 0.0 }
 0x1ed   :  { %v5660_v0 = vpop.xlane.xlu0 %704  ;;  %3730 = vmatprep.subr.bf16.mxu0 %v3729_v56  ;;  %v282_v56 = vld [vmem:[%s6235_s0 + $0x7e8] sm:$0xff] }
 0x1ef   :  { %953 = vadd.xlane.f32.xlu1 %v952_v61  ;;  %v1341_v61 = vld [vmem:[%s6236_s1 + $0xf0] sm:$0xff] }
 0x1f0   :  { %908 = vadd.xlane.f32.xlu0 %v907_v48  ;;  %v5682_v59 = vpop.xlane.xlu1 %842  ;;  %3732 = vmatpush1.bf16.msra.mxu0 %v3731_v8  ;;  %v3733_v48 = vpack.c.bf16 %v1342_v51, %v1340_v41  ;;  %v3735_v24 = vpack.c.bf16 %v1341_v61, %v1339_v55  ;;  %v1101_v8 = vmul.f32 0.0625, %v5581_v30  ;;  %v1045_v41 = vsel %vm6244_vm0, %v282_v56, 0.0  ;;  %v284_v55 = vld [vmem:[%s6235_s0 + $0x7f8] sm:$0xff]  ;;  %s3793_s0 = smov 96  }
 0x1f1   :  { %v5684_v31 = vpop.xlane.xlu0 %797  ;;  %v6239_v51 = vmov 0.0  }
 0x1f2   :  { %3734 = vmatprep.subr.bf16.mxu0 %v3733_v48  ;;  %2982 = vmatprep.mubr.f32.mxu0 %v6239_v51  ;;  %v1861_v30 = vrot.slane %v1101_v8, %v5399_v36 }
 0x1f3   :  { %1043 = vadd.xlane.f32.xlu1 %v1042_v15 }
 0x1f4   :  { %998 = vadd.xlane.f32.xlu0 %v997_v23  ;;  %v5706_v40 = vpop.xlane.xlu1 %932  ;;  %3736 = vmatpush1.bf16.msra.mxu0 %v3735_v24  ;;  %v1048_v24 = vsel %vm6244_vm0, %v283_v47, 0.0  ;;  %v1862_v56 = vsel %vm1701_vm14, %v1861_v30, %v5445_v5  ;;  %v1254_v5 = vmul.f32 0.0625, %v5507_v43  ;;  %v1299_v30 = vmul.f32 0.0625, %v5530_v3 }
 0x1f5   :  { %v888_v50 = vpop.xlane.xlu0 %887  ;;  %v1116_v43 = vmul.f32 0.0625, %v5579_v62 }
 0x1f6   :  { %v2616_v3 = vrot.slane %v1254_v5, %v4434_v37 }
 0x1f7   :  { %1001 = vadd.xlane.f32.xlu1 %v1000_v54  ;;  %v1051_v54 = vsel %vm6244_vm0, %v284_v55, 0.0  ;;  %vm2899_vm0 = vcmask 1043459  }
 0x1f8   :  { %956 = vadd.xlane.f32.xlu0 %v955_v13  ;;  %v1023_v15 = vpop.xlane.xlu1 %1022 }
 0x1f9   :  { %v978_v23 = vpop.xlane.xlu0 %977 }
 0x1fa   :  { %v1285_v62 = vmul.f32 0.0625, %v978_v23  ;;  %v1161_v23 = vmul.f32 0.0625, %v5636_v25 }
 0x1fb   :  { %1004 = vadd.xlane.f32.xlu1 %v1003_v34 }
 0x1fc   :  { %1046 = vadd.xlane.f32.xlu0 %v1045_v41  ;;  %v474_v61 = vpop.xlane.xlu1 %473 }
 0x1fd   :  { %v429_v48 = vpop.xlane.xlu0 %428 }
 0x1fe   :  { %v1102_v13 = vmul.f32 0.0625, %v429_v48  ;;  %v1209_v48 = vmul.f32 0.0625, %v5473_v9 }
 0x1ff   :  { %1052 = vadd.xlane.f32.xlu1 %v1051_v54 }
 0x200   :  { %v1866_v63 = vrot.slane %v1102_v13, %v5555_v42  ;;  %1049 = vadd.xlane.f32.xlu0 %v1048_v24  ;;  %v564_v51 = vpop.xlane.xlu1 %563  ;;  %v1193_v13 = vmul.f32 0.0625, %v5475_v16  ;;  %v5755_v16 = vmul.f32 0.0625, %v5493_v28 }
 0x201   :  { %v519_v34 = vpop.xlane.xlu0 %518 }
 0x202   :  { %v1867_v41 = vsel %vm1708_vm15, %v1866_v63, %v1862_v56  ;;  %v1284_v63 = vmul.f32 0.0625, %v5532_v33  ;;  %v2315_v56 = vrot.slane %v1193_v13, %v4803_v11  ;;  %v1146_v33 = vmul.f32 0.0625, %v5610_v27 }
 0x203   :  { %v5735_v8 = vsel %vm2897_vm3, %v1867_v41, %v5608_v22  ;;  %v2394_v22 = vrot.slane %v1209_v48, %v4803_v11  ;;  %v1255_v41 = vmul.f32 0.0625, %v888_v50  ;;  %v2838_v48 = vrot.slane %v1299_v30, %v4205_v35 }
 0x204   :  { %v5737_v47 = vpop.xlane.xlu1 %653  ;;  %v2764_v50 = vrot.slane %v1284_v63, %v4244_v10  ;;  %v1300_v13 = vmul.f32 0.0625, %v1023_v15  ;;  %v5771_v28 = vsel %vm1673_vm10, %v2315_v56, %v5351_v1  ;;  %v2468_v27 = vrot.slane %v5758_v20, %v4679_v38 }
 0x205   :  { %v609_v55 = vpop.xlane.xlu0 %608  ;;  %v5767_v14 = vsel %vm1673_vm10, %v2394_v22, %v5347_v18  ;;  %v2621_v53 = vrot.slane %v1255_v41, %v4554_v46  ;;  %v1935_v15 = vrot.slane %v1116_v43, %v5251_v2  ;;  %v2617_v30 = vsel %vm1652_vm7, %v2616_v3, %v5388_v21 }
 0x206   :  { %v2083_v1 = vrot.slane %v1146_v33, %v4946_v19  ;;  %v1131_v63 = vmul.f32 0.0625, %v5612_v39  ;;  %v2839_v22 = vsel %vm1631_vm4, %v2838_v48, %v5405_v4  ;;  %v2765_v56 = vsel %vm1638_vm5, %v2764_v50, %v5409_v7 }
 0x207   :  { %v2843_v41 = vrot.slane %v1300_v13, %v4244_v10  ;;  %v2769_v21 = vrot.slane %v1285_v62, %v4332_v29  ;;  %v1117_v3 = vmul.f32 0.0625, %v474_v61  ;;  %v1132_v33 = vmul.f32 0.0625, %v519_v34 }
 0x208   :  { %v5741_v24 = vpop.xlane.xlu1 %755  ;;  %v1936_v25 = vsel %vm1694_vm13, %v1935_v15, %v5441_v49  ;;  %v2084_v10 = vsel %vm1680_vm11, %v2083_v1, %v5459_v45  ;;  %v2009_v50 = vrot.slane %v1131_v63, %v5108_v6  ;;  %v1176_v13 = vmul.f32 0.0625, %v5634_v26 }
 0x209   :  { %v5743_v54 = vpop.xlane.xlu0 %707  ;;  %v2157_v61 = vrot.slane %v1161_v23, %v4803_v11  ;;  %v2844_v34 = vsel %vm1638_vm5, %v2843_v41, %v2839_v22  ;;  %v2770_v15 = vsel %vm1645_vm6, %v2769_v21, %v2765_v56  ;;  %v1162_v45 = vmul.f32 0.0625, %v609_v55 }
 0x20a   :  { %v2010_v22 = vsel %vm1687_vm12, %v2009_v50, %v5463_v32  ;;  %v2231_v56 = vrot.slane %v1176_v13, %v4679_v38  ;;  %v1194_v55 = vmul.f32 0.0625, %v5660_v0  ;;  %vm2901_vm4 = vcmask 1044484  }
 0x20b   :  { %v2158_v41 = vsel %vm1673_vm10, %v2157_v61, %v5485_v12  ;;  %v2162_v32 = vrot.slane %v1162_v45, %v4946_v19  ;;  %v1210_v61 = vmul.f32 0.0625, %v5658_v60  ;;  %v1211_v60 = vmul.f32 0.0625, %v5741_v24 }
 0x20c   :  { %v5750_v17 = vpop.xlane.xlu1 %845  ;;  %vm2903_vm5 = vcmask 1045509  }
 0x20d   :  { %v5752_v9 = vpop.xlane.xlu0 %800 }
 0x210   :  { %v5774_v44 = vpop.xlane.xlu1 %935 }
 0x211   :  { %v891_v5 = vpop.xlane.xlu0 %890 }
 0x212   :  { %v1256_v18 = vmul.f32 0.0625, %v891_v5  ;;  %v2622_v5 = vsel %vm1659_vm8, %v2621_v53, %v2617_v30  ;;  %v1147_v53 = vmul.f32 0.0625, %v564_v51 }
 0x214   :  { %v2626_v43 = vrot.slane %v1256_v18, %v4679_v38  ;;  %v1026_v39 = vpop.xlane.xlu1 %1025  ;;  %v2014_v18 = vrot.slane %v1132_v33, %v5251_v2 }
 0x215   :  { %v981_v35 = vpop.xlane.xlu0 %980  ;;  %v1301_v7 = vmul.f32 0.0625, %v1026_v39 }
 0x216   :  { %v5797_v4 = vsel %vm1666_vm9, %v2626_v43, %v2622_v5  ;;  %v1286_v48 = vmul.f32 0.0625, %v981_v35  ;;  %v1940_v35 = vrot.slane %v1117_v3, %v5399_v36  ;;  %v2088_v43 = vrot.slane %v1147_v53, %v5108_v6 }
 0x217   :  { %v2848_v62 = vrot.slane %v1301_v7, %v4332_v29  ;;  %v1177_v5 = vmul.f32 0.0625, %v5737_v47  ;;  %v2015_v39 = vsel %vm1694_vm13, %v2014_v18, %v2010_v22  ;;  %v1195_v7 = vmul.f32 0.0625, %v5743_v54 }
 0x218   :  { %v2774_v49 = vrot.slane %v1286_v48, %v4434_v37  ;;  %v522_v30 = vpop.xlane.xlu1 %521  ;;  %v1941_v33 = vsel %vm1701_vm14, %v1940_v35, %v1936_v25  ;;  %v1225_v25 = vmul.f32 0.0625, %v5684_v31  ;;  %v2089_v54 = vsel %vm1687_vm12, %v2088_v43, %v2084_v10 }
 0x219   :  { %v477_v1 = vpop.xlane.xlu0 %476  ;;  %v5811_v26 = vsel %vm1645_vm6, %v2848_v62, %v2844_v34  ;;  %v1133_v51 = vmul.f32 0.0625, %v522_v30  ;;  %v2320_v34 = vrot.slane %v1194_v55, %v4946_v19  ;;  %v2236_v62 = vrot.slane %v1177_v5, %v4803_v11 }
 0x21a   :  { %v5814_v63 = vsel %vm1652_vm7, %v2774_v49, %v2770_v15  ;;  %v1118_v23 = vmul.f32 0.0625, %v477_v1  ;;  %v2163_v35 = vsel %vm1680_vm11, %v2162_v32, %v2158_v41  ;;  %v2325_v18 = vrot.slane %v1195_v7, %v5108_v6 }
 0x21b   :  { %v2019_v21 = vrot.slane %v1133_v51, %v5399_v36  ;;  %v1226_v31 = vmul.f32 0.0625, %v5752_v9  ;;  %v2399_v22 = vrot.slane %v1210_v61, %v4946_v19  ;;  %v2321_v24 = vsel %vm1680_vm11, %v2320_v34, %v5771_v28 }
 0x21c   :  { %v1945_v3 = vrot.slane %v1118_v23, %v5555_v42  ;;  %v612_v48 = vpop.xlane.xlu1 %611  ;;  %v2232_v23 = vsel %vm1666_vm9, %v2231_v56, %v5481_v58  ;;  %v1240_v9 = vmul.f32 0.0625, %v5682_v59  ;;  %v2473_v41 = vrot.slane %v1225_v25, %v4803_v11 }
 0x21d   :  { %v567_v12 = vpop.xlane.xlu0 %566  ;;  %v5831_v0 = vsel %vm1701_vm14, %v2019_v21, %v2015_v39  ;;  %v1163_v47 = vmul.f32 0.0625, %v612_v48  ;;  %v2237_v55 = vsel %vm1673_vm10, %v2236_v62, %v2232_v23  ;;  %v2404_v21 = vrot.slane %v1211_v60, %v5108_v6 }
 0x21e   :  { %v1946_v50 = vsel %vm1708_vm15, %v1945_v3, %v1941_v33  ;;  %v1148_v13 = vmul.f32 0.0625, %v567_v12  ;;  %v2326_v3 = vsel %vm1687_vm12, %v2325_v18, %v2321_v24  ;;  %v1241_v58 = vmul.f32 0.0625, %v5750_v17 }
 0x21f   :  { %v5839_v53 = vsel %vm2899_vm0, %v1946_v50, %v5735_v8  ;;  %v2167_v49 = vrot.slane %v1163_v47, %v5108_v6  ;;  %v2478_v56 = vrot.slane %v1226_v31, %v4946_v19  ;;  %v2469_v48 = vsel %vm1666_vm9, %v2468_v27, %v5369_v52 }
 0x220   :  { %v2093_v15 = vrot.slane %v1148_v13, %v5251_v2  ;;  %v711_v45 = vpop.xlane.xlu1 %710  ;;  %v1269_v12 = vmul.f32 0.0625, %v5505_v57  ;;  %v2400_v17 = vsel %vm1680_vm11, %v2399_v22, %v5767_v14  ;;  %v2547_v50 = vrot.slane %v1240_v9, %v4679_v38 }
 0x221   :  { %v657_v30 = vpop.xlane.xlu0 %656  ;;  %v5850_v8 = vsel %vm1687_vm12, %v2167_v49, %v2163_v35  ;;  %v1196_v1 = vmul.f32 0.0625, %v711_v45  ;;  %v2474_v47 = vsel %vm1673_vm10, %v2473_v41, %v2469_v48  ;;  %v1270_v13 = vmul.f32 0.0625, %v5706_v40  ;;  %v6251_v41 = vld [vmem:[#allocation8_spill] sm:$0xff] }
 0x222   :  { %v5853_v10 = vsel %vm1694_vm13, %v2093_v15, %v2089_v54  ;;  %v1178_v51 = vmul.f32 0.0625, %v657_v30  ;;  %v2405_v25 = vsel %vm1687_vm12, %v2404_v21, %v2400_v17  ;;  %v2552_v20 = vrot.slane %v1241_v58, %v4803_v11  ;;  %v6249_v15 = vld [vmem:[#allocation7_spill] sm:$0xff] }
 0x223   :  { %v2330_v43 = vrot.slane %v1196_v1, %v5251_v2  ;;  %v2479_v52 = vsel %vm1680_vm11, %v2478_v56, %v2474_v47  ;;  %v1271_v57 = vmul.f32 0.0625, %v5774_v44  ;;  %v6250_v35 = vrot.slane %v5755_v16, %v4554_v46 }
 0x224   :  { %v2241_v5 = vrot.slane %v1178_v51, %v4946_v19  ;;  %v804_v33 = vpop.xlane.xlu1 %803  ;;  %v2690_v18 = vrot.slane %v1269_v12, %v4332_v29  ;;  %v2695_v44 = vrot.slane %v1270_v13, %v4434_v37 }
 0x225   :  { %v759_v28 = vpop.xlane.xlu0 %758  ;;  %v2331_v59 = vsel %vm1694_vm13, %v2330_v43, %v2326_v3  ;;  %v1227_v32 = vmul.f32 0.0625, %v804_v33  ;;  %v2543_v60 = vsel %vm1659_vm8, %v6250_v35, %v6249_v15  ;;  %v2700_v51 = vrot.slane %v1271_v57, %v4554_v46 }
 0x226   :  { %v5871_v39 = vsel %vm1680_vm11, %v2241_v5, %v2237_v55  ;;  %v1212_v7 = vmul.f32 0.0625, %v759_v28  ;;  %v2548_v31 = vsel %vm1666_vm9, %v2547_v50, %v2543_v60  ;;  %v2691_v55 = vsel %vm1645_vm6, %v2690_v18, %v6251_v41 }
 0x227   :  { %v2483_v61 = vrot.slane %v1227_v32, %v5108_v6  ;;  %v2553_v1 = vsel %vm1673_vm10, %v2552_v20, %v2548_v31  ;;  %v2696_v43 = vsel %vm1652_vm7, %v2695_v44, %v2691_v55  ;;  %vm2905_vm6 = vcmask 1046534  }
 0x228   :  { %v2409_v34 = vrot.slane %v1212_v7, %v5251_v2  ;;  %v894_v27 = vpop.xlane.xlu1 %893  ;;  %v2701_v3 = vsel %vm1659_vm8, %v2700_v51, %v2696_v43 }
 0x229   :  { %v849_v14 = vpop.xlane.xlu0 %848  ;;  %v2484_v54 = vsel %vm1687_vm12, %v2483_v61, %v2479_v52  ;;  %v1257_v49 = vmul.f32 0.0625, %v894_v27 }
 0x22a   :  { %v2410_v62 = vsel %vm1694_vm13, %v2409_v34, %v2405_v25  ;;  %v1242_v40 = vmul.f32 0.0625, %v849_v14 }
 0x22b   :  { %v2631_v45 = vrot.slane %v1257_v49, %v4803_v11 }
 0x22c   :  { %v2557_v30 = vrot.slane %v1242_v40, %v4946_v19  ;;  %v984_v23 = vpop.xlane.xlu1 %983 }
 0x22d   :  { %v939_v22 = vpop.xlane.xlu0 %938  ;;  %v2632_v16 = vsel %vm1673_vm10, %v2631_v45, %v5797_v4  ;;  %v1287_v29 = vmul.f32 0.0625, %v984_v23 }
 0x22e   :  { %v2558_v24 = vsel %vm1680_vm11, %v2557_v30, %v2553_v1  ;;  %v1272_v9 = vmul.f32 0.0625, %v939_v22 }
 0x22f   :  { %v2779_v5 = vrot.slane %v1287_v29, %v4554_v46 }
 0x230   :  { %v2705_v21 = vrot.slane %v1272_v9, %v4679_v38  ;;  %v525_v58 = vpop.xlane.xlu1 %524 }
 0x231   :  { %v1029_v56 = vpop.xlane.xlu0 %1028  ;;  %v2780_v4 = vsel %vm1659_vm8, %v2779_v5, %v5814_v63  ;;  %v1134_v28 = vmul.f32 0.0625, %v525_v58 }
 0x232   :  { %v2706_v33 = vsel %vm1666_vm9, %v2705_v21, %v2701_v3  ;;  %v1302_v32 = vmul.f32 0.0625, %v1029_v56 }
 0x233   :  { %v2024_v7 = vrot.slane %v1134_v28, %v5555_v42 }
 0x234   :  { %v2853_v48 = vrot.slane %v1302_v32, %v4434_v37  ;;  %v615_v12 = vpop.xlane.xlu1 %614 }
 0x235   :  { %v570_v17 = vpop.xlane.xlu0 %569  ;;  %v2025_v50 = vsel %vm1708_vm15, %v2024_v7, %v5831_v0 }
 0x236   :  { %v5922_v47 = vsel %vm1652_vm7, %v2853_v48, %v5811_v26  ;;  %v2902_v63 = vsel %vm2901_vm4, %v2025_v50, %v5839_v53  ;;  %vm2907_vm7 = vcmask 1047559  }
 0x238   :  { %v714_v13 = vpop.xlane.xlu1 %713 }
 0x239   :  { %v5926_v61 = vpop.xlane.xlu0 %659  ;;  %v1197_v34 = vmul.f32 0.0625, %v714_v13 }
 0x23b   :  { %v2335_v25 = vrot.slane %v1197_v34, %v5399_v36 }
 0x23c   :  { %v807_v37 = vpop.xlane.xlu1 %806 }
 0x23d   :  { %v762_v20 = vpop.xlane.xlu0 %761  ;;  %v2336_v52 = vsel %vm1701_vm14, %v2335_v25, %v2331_v59  ;;  %v1228_v57 = vmul.f32 0.0625, %v807_v37  ;;  %v1149_v59 = vmul.f32 0.0625, %v570_v17 }
 0x23e   :  { %v1213_v27 = vmul.f32 0.0625, %v762_v20 }
 0x23f   :  { %v2488_v0 = vrot.slane %v1228_v57, %v5251_v2  ;;  %v2098_v23 = vrot.slane %v1149_v59, %v5399_v36 }
 0x240   :  { %v2414_v26 = vrot.slane %v1213_v27, %v5399_v36  ;;  %v897_v14 = vpop.xlane.xlu1 %896 }
 0x241   :  { %v852_v49 = vpop.xlane.xlu0 %851  ;;  %v5933_v53 = vsel %vm1694_vm13, %v2488_v0, %v2484_v54  ;;  %v1258_v15 = vmul.f32 0.0625, %v897_v14  ;;  %v2099_v55 = vsel %vm1701_vm14, %v2098_v23, %v5853_v10 }
 0x242   :  { %v2415_v40 = vsel %vm1701_vm14, %v2414_v26, %v2410_v62  ;;  %v1243_v35 = vmul.f32 0.0625, %v852_v49 }
 0x243   :  { %v2636_v60 = vrot.slane %v1258_v15, %v4946_v19 }
 0x244   :  { %v2562_v18 = vrot.slane %v1243_v35, %v5108_v6  ;;  %v987_v31 = vpop.xlane.xlu1 %986 }
 0x245   :  { %v942_v44 = vpop.xlane.xlu0 %941  ;;  %v5939_v45 = vsel %vm1680_vm11, %v2636_v60, %v2632_v16  ;;  %v1288_v1 = vmul.f32 0.0625, %v987_v31 }
 0x246   :  { %v5942_v30 = vsel %vm1687_vm12, %v2562_v18, %v2558_v24  ;;  %v1273_v54 = vmul.f32 0.0625, %v942_v44 }
 0x247   :  { %v2784_v51 = vrot.slane %v1288_v1, %v4679_v38 }
 0x248   :  { %v2710_v62 = vrot.slane %v1273_v54, %v4803_v11  ;;  %v573_v22 = vpop.xlane.xlu1 %572 }
 0x249   :  { %v5947_v29 = vpop.xlane.xlu0 %1031  ;;  %v5950_v9 = vsel %vm1666_vm9, %v2784_v51, %v2780_v4  ;;  %v1150_v41 = vmul.f32 0.0625, %v573_v22 }
 0x24a   :  { %v5953_v16 = vsel %vm1673_vm10, %v2710_v62, %v2706_v33  ;;  %v1179_v62 = vmul.f32 0.0625, %v5926_v61 }
 0x24b   :  { %v2103_v24 = vrot.slane %v1150_v41, %v5555_v42 }
 0x24c   :  { %v663_v43 = vpop.xlane.xlu1 %662 }
 0x24d   :  { %v618_v5 = vpop.xlane.xlu0 %617  ;;  %v2104_v21 = vsel %vm1708_vm15, %v2103_v24, %v2099_v55  ;;  %v1180_v22 = vmul.f32 0.0625, %v663_v43 }
 0x24e   :  { %v2904_v3 = vsel %vm2903_vm5, %v2104_v21, %v2902_v63  ;;  %v1164_v63 = vmul.f32 0.0625, %v615_v12  ;;  %v1165_v25 = vmul.f32 0.0625, %v618_v5 }
 0x250   :  { %v765_v58 = vpop.xlane.xlu1 %764  ;;  %v2172_v57 = vrot.slane %v1164_v63, %v5251_v2  ;;  %v2177_v27 = vrot.slane %v1165_v25, %v5399_v36 }
 0x251   :  { %v717_v56 = vpop.xlane.xlu0 %716  ;;  %v1214_v4 = vmul.f32 0.0625, %v765_v58  ;;  %v2251_v58 = vrot.slane %v1180_v22, %v5251_v2 }
 0x252   :  { %v1198_v28 = vmul.f32 0.0625, %v717_v56 }
 0x253   :  { %v2419_v33 = vrot.slane %v1214_v4, %v5555_v42 }
 0x254   :  { %v2340_v32 = vrot.slane %v1198_v28, %v5555_v42  ;;  %v855_v7 = vpop.xlane.xlu1 %854 }
 0x255   :  { %v810_v48 = vpop.xlane.xlu0 %809  ;;  %v2420_v17 = vsel %vm1708_vm15, %v2419_v33, %v2415_v40  ;;  %v1244_v41 = vmul.f32 0.0625, %v855_v7 }
 0x256   :  { %v2341_v10 = vsel %vm1708_vm15, %v2340_v32, %v2336_v52  ;;  %v1229_v0 = vmul.f32 0.0625, %v810_v48  ;;  %v2173_v52 = vsel %vm1694_vm13, %v2172_v57, %v5850_v8 }
 0x257   :  { %v2909_v50 = vsel %vm2895_vm1, %v2420_v17, %v2341_v10  ;;  %v2178_v12 = vsel %vm1701_vm14, %v2177_v27, %v2173_v52 }
 0x258   :  { %v5965_v13 = vpop.xlane.xlu1 %944  ;;  %v2493_v15 = vrot.slane %v1229_v0, %v5399_v36 }
 0x259   :  { %v900_v34 = vpop.xlane.xlu0 %899 }
 0x25a   :  { %v2494_v1 = vsel %vm1701_vm14, %v2493_v15, %v5933_v53  ;;  %v2567_v53 = vrot.slane %v1244_v41, %v5251_v2  ;;  %v1259_v0 = vmul.f32 0.0625, %v900_v34  ;;  %v1274_v34 = vmul.f32 0.0625, %v5965_v13 }
 0x25c   :  { %v5967_v37 = vpop.xlane.xlu1 %1034  ;;  %v2568_v48 = vsel %vm1694_vm13, %v2567_v53, %v5942_v30  ;;  %v2641_v15 = vrot.slane %v1259_v0, %v5108_v6  ;;  %v2715_v13 = vrot.slane %v1274_v34, %v4946_v19 }
 0x25d   :  { %v5969_v20 = vpop.xlane.xlu0 %989 }
 0x25e   :  { %v1289_v22 = vmul.f32 0.0625, %v5969_v20 }
 0x260   :  { %v666_v26 = vpop.xlane.xlu1 %665 }
 0x261   :  { %v621_v14 = vpop.xlane.xlu0 %620  ;;  %v1181_v24 = vmul.f32 0.0625, %v666_v26 }
 0x262   :  { %v1166_v49 = vmul.f32 0.0625, %v621_v14 }
 0x263   :  { %v2256_v56 = vrot.slane %v1181_v24, %v5399_v36 }
 0x264   :  { %v2182_v40 = vrot.slane %v1166_v49, %v5555_v42  ;;  %v858_v35 = vpop.xlane.xlu1 %857 }
 0x265   :  { %v813_v60 = vpop.xlane.xlu0 %812  ;;  %v1245_v55 = vmul.f32 0.0625, %v858_v35 }
 0x266   :  { %v1230_v18 = vmul.f32 0.0625, %v813_v60  ;;  %v2183_v59 = vsel %vm1708_vm15, %v2182_v40, %v2178_v12  ;;  %v6252_v12 = vmov 0.0  }
 0x267   :  { %v2906_v31 = vsel %vm2905_vm6, %v2183_v59, %v2904_v3  ;;  %v2246_v3 = vrot.slane %v1179_v62, %v5108_v6  ;;  %v2572_v4 = vrot.slane %v1245_v55, %v5399_v36 }
 0x268   :  { %v2498_v44 = vrot.slane %v1230_v18, %v5555_v42  ;;  %v948_v8 = vpop.xlane.xlu1 %947 }
 0x269   :  { %v903_v54 = vpop.xlane.xlu0 %902  ;;  %v2247_v43 = vsel %vm1687_vm12, %v2246_v3, %v5871_v39 }
 0x26a   :  { %v2499_v51 = vsel %vm1708_vm15, %v2498_v44, %v2494_v1  ;;  %v2252_v7 = vsel %vm1694_vm13, %v2251_v58, %v2247_v43  ;;  %v1260_v30 = vmul.f32 0.0625, %v903_v54  ;;  %v1275_v1 = vmul.f32 0.0625, %v948_v8 }
 0x26b   :  { %v2910_v23 = vsel %vm2897_vm3, %v2499_v51, %v2909_v50  ;;  %v2573_v50 = vsel %vm1701_vm14, %v2572_v4, %v2568_v48  ;;  %v2257_v57 = vsel %vm1701_vm14, %v2256_v56, %v2252_v7  ;;  %v1304_v8 = vmul.f32 0.0625, %v5967_v37 }
 0x26c   :  { %v1038_v5 = vpop.xlane.xlu1 %1037  ;;  %v2646_v35 = vrot.slane %v1260_v30, %v5251_v2  ;;  %v2720_v53 = vrot.slane %v1275_v1, %v5108_v6  ;;  %v2716_v37 = vsel %vm1680_vm11, %v2715_v13, %v5953_v16  ;;  %vm6255_vm3 = vcmask 130048  }
 0x26d   :  { %v993_v21 = vpop.xlane.xlu0 %992 }
 0x26e   :  { %v1290_v58 = vmul.f32 0.0625, %v993_v21 }
 0x270   :  { %v861_v28 = vpop.xlane.xlu1 %860  ;;  %v2794_v7 = vrot.slane %v1290_v58, %v4946_v19 }
 0x271   :  { %v669_v61 = vpop.xlane.xlu0 %668  ;;  %v1246_v33 = vmul.f32 0.0625, %v861_v28 }
 0x272   :  { %v1182_v32 = vmul.f32 0.0625, %v669_v61  ;;  %v2789_v61 = vrot.slane %v1289_v22, %v4803_v11 }
 0x273   :  { %v2577_v17 = vrot.slane %v1246_v33, %v5555_v42  ;;  %v1305_v33 = vmul.f32 0.0625, %v1038_v5 }
 0x274   :  { %v2261_v10 = vrot.slane %v1182_v32, %v5555_v42  ;;  %v951_v63 = vpop.xlane.xlu1 %950  ;;  %v2790_v16 = vsel %vm1673_vm10, %v2789_v61, %v5950_v9 }
 0x275   :  { %v906_v25 = vpop.xlane.xlu0 %905  ;;  %v2578_v27 = vsel %vm1708_vm15, %v2577_v17, %v2573_v50  ;;  %v1276_v51 = vmul.f32 0.0625, %v951_v63  ;;  %v2721_v50 = vsel %vm1687_vm12, %v2720_v53, %v2716_v37  ;;  %v2795_v30 = vsel %vm1680_vm11, %v2794_v7, %v2790_v16 }
 0x276   :  { %v2262_v39 = vsel %vm1708_vm15, %v2261_v10, %v2257_v57  ;;  %v2911_v26 = vsel %vm2899_vm0, %v2578_v27, %v2910_v23  ;;  %v1261_v49 = vmul.f32 0.0625, %v906_v25  ;;  %v1303_v23 = vmul.f32 0.0625, %v5947_v29 }
 0x277   :  { %v2908_v14 = vsel %vm2907_vm7, %v2262_v39, %v2906_v31  ;;  %v2642_v31 = vsel %vm1687_vm12, %v2641_v15, %v5939_v45  ;;  %v2725_v29 = vrot.slane %v1276_v51, %v5251_v2  ;;  %v2863_v10 = vrot.slane %v1304_v8, %v4679_v38 }
 0x278   :  { %2983 = vmatmul.mubr.f32.vlgmr.msra.gmra.mrb[0].mxu0 %v2908_v14  ;;  %v1041_v52 = vpop.xlane.xlu1 %1040  ;;  %v2651_v60 = vrot.slane %v1261_v49, %v5399_v36  ;;  %v2647_v54 = vsel %vm1694_vm13, %v2646_v35, %v2642_v31  ;;  %v2858_v28 = vrot.slane %v1303_v23, %v4554_v46  ;;  %v2868_v39 = vrot.slane %v1305_v33, %v4803_v11 }
 0x279   :  { %v996_v40 = vpop.xlane.xlu0 %995  ;;  %2988 = vmatprep.mubr.f32.mxu0 %v6252_v12  ;;  %v1306_v63 = vmul.f32 0.0625, %v1041_v52  ;;  %v2726_v5 = vsel %vm1694_vm13, %v2725_v29, %v2721_v50 }
 0x27a   :  { %v2652_v41 = vsel %vm1701_vm14, %v2651_v60, %v2647_v54  ;;  %v1291_v56 = vmul.f32 0.0625, %v996_v40  ;;  %v2859_v11 = vsel %vm1659_vm8, %v2858_v28, %v5922_v47 }
 0x27b   :  { %v2873_v15 = vrot.slane %v1306_v63, %v4946_v19  ;;  %v2864_v34 = vsel %vm1666_vm9, %v2863_v10, %v2859_v11 }
 0x27c   :  { %v954_v18 = vpop.xlane.xlu1 %953  ;;  %v2799_v46 = vrot.slane %v1291_v56, %v5108_v6  ;;  %v2869_v54 = vsel %vm1673_vm10, %v2868_v39, %v2864_v34 }
 0x27d   :  { %v909_v59 = vpop.xlane.xlu0 %908  ;;  %v1277_v24 = vmul.f32 0.0625, %v954_v18 }
 0x27e   :  { %v1262_v44 = vmul.f32 0.0625, %v909_v59  ;;  %v2800_v35 = vsel %vm1687_vm12, %v2799_v46, %v2795_v30  ;;  %v16_v30 = vld [vmem:[%s6237_s2 + $0x8] sm:$0xff] }
 0x27f   :  { %v2730_v32 = vrot.slane %v1277_v24, %v5399_v36 }
 0x280   :  { %v2656_v62 = vrot.slane %v1262_v44, %v5555_v42  ;;  %v1044_v55 = vpop.xlane.xlu1 %1043 }
 0x281   :  { %v999_v3 = vpop.xlane.xlu0 %998  ;;  %v1307_v25 = vmul.f32 0.0625, %v1044_v55  ;;  %v2731_v0 = vsel %vm1701_vm14, %v2730_v32, %v2726_v5 }
 0x282   :  { %v2657_v45 = vsel %vm1708_vm15, %v2656_v62, %v2652_v41  ;;  %v1292_v20 = vmul.f32 0.0625, %v999_v3 }
 0x283   :  { %v2912_v4 = vsel %vm2901_vm4, %v2657_v45, %v2911_v26  ;;  %v2878_v60 = vrot.slane %v1307_v25, %v5108_v6  ;;  %v2874_v6 = vsel %vm1680_vm11, %v2873_v15, %v2869_v54  ;;  %vm3477_vm4 = vcmask 64512  }
 0x284   :  { %v1002_v21 = vpop.xlane.xlu1 %1001  ;;  %v2804_v57 = vrot.slane %v1292_v20, %v5251_v2 }
 0x285   :  { %v957_v43 = vpop.xlane.xlu0 %956  ;;  %v1293_v48 = vmul.f32 0.0625, %v1002_v21  ;;  %v2879_v22 = vsel %vm1687_vm12, %v2878_v60, %v2874_v6 }
 0x286   :  { %v1278_v17 = vmul.f32 0.0625, %v957_v43  ;;  %v2805_v18 = vsel %vm1694_vm13, %v2804_v57, %v2800_v35 }
 0x287   :  { %v2809_v38 = vrot.slane %v1293_v48, %v5399_v36 }
 0x288   :  { %v2735_v27 = vrot.slane %v1278_v17, %v5555_v42  ;;  %v1005_v26 = vpop.xlane.xlu1 %1004 }
 0x289   :  { %v1047_v14 = vpop.xlane.xlu0 %1046  ;;  %v1294_v52 = vmul.f32 0.0625, %v1005_v26  ;;  %v2810_v44 = vsel %vm1701_vm14, %v2809_v38, %v2805_v18  ;;  %v3651_v38 = vld [vmem:[%s6237_s2 + $0x21] ss:$0 sm:$0xff]  ;;  %v3652_v26 = vld [vmem:[%s6237_s2 + $0x22] ss:$0 sm:$0xff] }
 0x28a   :  { %v2736_v49 = vsel %vm1708_vm15, %v2735_v27, %v2731_v0  ;;  %v1308_v40 = vmul.f32 0.0625, %v1047_v14  ;;  %v3650_v0 = vld [vmem:[%s6237_s2 + $0x20] ss:$0 sm:$0xff] }
 0x28b   :  { %v2913_v9 = vsel %vm2903_vm5, %v2736_v49, %v2912_v4  ;;  %v2814_v59 = vrot.slane %v1294_v52, %v5555_v42  ;;  %v15_v14 = vld [vmem:[%s6237_s2] sm:$0xff]  ;;  %v17_v49 = vld [vmem:[%s6237_s2 + $0x10] sm:$0xff]  ;;  %vm3560_vm5 = vcmask 1041408  }
 0x28c   :  { %v2883_v31 = vrot.slane %v1308_v40, %v5251_v2  ;;  %v1053_v1 = vpop.xlane.xlu1 %1052  ;;  %v3737_v52 = vpack.c.bf16 %v16_v30, %v15_v14  ;;  %v18_v40 = vld [vmem:[%s6237_s2 + $0x18] sm:$0xff] }
 0x28d   :  { %v1050_v19 = vpop.xlane.xlu0 %1049  ;;  %v1310_v62 = vmul.f32 0.0625, %v1053_v1  ;;  %v2815_v47 = vsel %vm1708_vm15, %v2814_v59, %v2810_v44  ;;  %v3741_v15 = vpack.c.bf16 %v18_v40, %v17_v49 }
 0x28e   :  { %v1309_v51 = vmul.f32 0.0625, %v1050_v19  ;;  %v2914_v23 = vsel %vm2905_vm6, %v2815_v47, %v2913_v9  ;;  %v2884_v2 = vsel %vm1694_vm13, %v2883_v31, %v2879_v22  ;;  %3738 = vmatprep.subr.bf16.mxu1 %v3737_v52  ;;  %vm3556_vm6 = vcmask 15360  }
 0x28f   :  { %v2893_v24 = vrot.slane %v1310_v62, %v5555_v42  ;;  %3740 = vmatpush3.bf16.msra.mxu1 %v3737_v52 }
 0x290   :  { %v2888_v41 = vrot.slane %v1309_v51, %v5399_v36  ;;  %v6253_v36 = vld [vmem:[#allocation6_spill] sm:$0xff]  ;;  %3742 = vmatprep.subr.bf16.mxu1 %v3741_v15 }
 0x291   :  { %vm3000_vm0 = vcmp.lt.s32.totalorder %v6253_v36, 4  ;;  %vm3003_vm8 = vcmp.ge.s32.totalorder %v6253_v36, 4  ;;  %vm3027_vm9 = vcmp.lt.s32.totalorder %v6253_v36, 2  ;;  %vm3030_vm10 = vcmp.ge.s32.totalorder %v6253_v36, 2 }
 0x292   :  { %v2889_v55 = vsel %vm1701_vm14, %v2888_v41, %v2884_v2  ;;  %v6100_v63 = vadd.s32 8, %v6253_v36  ;;  %vm3052_vm11 = vcmp.lt.s32.totalorder %v6253_v36, 6  ;;  %vm3097_vm14 = vcmask 785920  }
 0x293   :  { %v2894_v3 = vsel %vm1708_vm15, %v2893_v24, %v2889_v55  ;;  %3744 = vmatpush3.bf16.msra.mxu1 %v3741_v15  ;;  %vm3154_vm15 = vcmask 261120  }
 0x294   :  { %v2915_v13 = vsel %vm2907_vm7, %v2894_v3, %v2914_v23  ;;  %vm3056_vm12 = vcmp.lt.s32.totalorder %v6100_v63, 14  ;;  %vm3074_vm13 = vcmp.lt.s32.totalorder %v6100_v63, 12  ;;  %v3657_v63 = vld [vmem:[%s6237_s2 + $0x25] ss:$0 sm:$0xff]  ;;  %vm3634_vm7 = vcmask 33792  }
 0x295   :  { %2989 = vmatmul.mubr.f32.gmra.mrb[2].mxu0 %v2915_v13 }
 0x34b   :  { %v6063_v58 = vpop.f32.mrb[0].mxu0 }
 0x34c   :  { %3019 = vrot.lane.b32.xlu0 %v6063_v58, %s3793_s0  ;;  %v2986_v45 = vpop.f32.mrb[1].mxu0  ;;  %v2998_v42 = vrot.slane %v6063_v58, 4 }
 0x34d   :  { %v3069_v4 = vrot.slane %v2986_v45, 4 }
 0x368   :  { %v6067_v8 = vpop.f32.mrb[2].mxu0 }
 0x369   :  { %v2999_v53 = vrot.slane %v6067_v8, 4  ;;  %3021 = vrot.lane.b32.xlu1 %v6067_v8, %s3793_s0  ;;  %v2992_v56 = vpop.f32.mrb[3].mxu0 }
 0x36a   :  { %v3070_v29 = vrot.slane %v2992_v56, 4 }
 0x36b   :  { %v3002_v20 = vsel %vm3000_vm0, %v2999_v53, %v2998_v42  ;;  %v3001_v28 = vsel %vm3000_vm0, %v2998_v42, %v2999_v53 }
 0x36c   :  { %v3072_v61 = vsel %vm3000_vm0, %v3070_v29, %v3069_v4  ;;  %v3005_v33 = vsel %vm3003_vm8, %v3002_v20, 0.0  ;;  %v3071_v32 = vsel %vm3000_vm0, %v3069_v4, %v3070_v29 }
 0x36d   :  { %3044 = vrot.lane.b32.xlu1 %v6063_v58, %s3794_s20  ;;  %3009 = vrot.lane.b32.xlu0 %v3005_v33, %s3795_s21  ;;  %v3076_v39 = vsel %vm3074_vm13, %v3072_v61, 0.0 }
 0x371   :  { %3046 = vrot.lane.b32.xlu1 %v6067_v8, %s3794_s20 }
 0x375   :  { %3011 = vrot.lane.b32.xlu1 %v3001_v28, %s3795_s21 }
 0x3be   :  { %v3020_v21 = vpop.permute.xlu0 %3019 }
 0x3bf   :  { %v3025_v37 = vrot.slane %v3020_v21, 6 }
 0x3db   :  { %v3022_v43 = vpop.permute.xlu1 %3021 }
 0x3dc   :  { %v3026_v7 = vrot.slane %v3022_v43, 6 }
 0x3de   :  { %v3028_v48 = vsel %vm3027_vm9, %v3025_v37, %v3026_v7  ;;  %v3029_v17 = vsel %vm3027_vm9, %v3026_v7, %v3025_v37 }
 0x3df   :  { %v3045_v10 = vpop.permute.xlu1 %3044  ;;  %3038 = vrot.lane.b32.xlu1 %v3028_v48, %s3795_s21  ;;  %v3032_v50 = vsel %vm3030_vm10, %v3029_v17, 0.0  ;;  %v3010_v35 = vpop.permute.xlu0 %3009 }
 0x3e0   :  { %3036 = vrot.lane.b32.xlu0 %v3032_v50, %s3795_s21  ;;  %v3050_v5 = vrot.slane %v3045_v10, 2  ;;  %v3015_v34 = vadd.f32 %v3010_v35, %v6063_v58 }
 0x3e3   :  { %v3047_v46 = vpop.permute.xlu1 %3046 }
 0x3e4   :  { %v3051_v25 = vrot.slane %v3047_v46, 2 }
 0x3e6   :  { %v3053_v57 = vsel %vm3052_vm11, %v3050_v5, %v3051_v25  ;;  %v3054_v27 = vsel %vm3052_vm11, %v3051_v25, %v3050_v5 }
 0x3e7   :  { %3061 = vrot.lane.b32.xlu0 %v3053_v57, %s3795_s21  ;;  %v3058_v16 = vsel %vm3056_vm12, %v3054_v27, 0.0  ;;  %v3012_v9 = vpop.permute.xlu1 %3011 }
 0x3e8   :  { %3063 = vrot.lane.b32.xlu1 %v3058_v16, %s3795_s21  ;;  %v3016_v18 = vadd.f32 %v3012_v9, %v6067_v8 }
 0x3eb   :  { %3079 = vrot.lane.b32.xlu0 %v3071_v32, %s3795_s21 }
 0x3ec   :  { %3081 = vrot.lane.b32.xlu1 %v3076_v39, %s3795_s21 }
 0x3ef   :  { %3092 = vrot.lane.b32.xlu0 %v3650_v0, %s3795_s21 }
 0x3f0   :  { %3131 = vrot.lane.b32.xlu1 %v3651_v38, %s3795_s21 }
 0x3f3   :  { %3141 = vrot.lane.b32.xlu0 %v3652_v26, %s3795_s21 }
 0x451   :  { %v3039_v60 = vpop.permute.xlu1 %3038 }
 0x452   :  { %v3037_v11 = vpop.permute.xlu0 %3036  ;;  %v3043_v31 = vadd.f32 %v3039_v60, %v3016_v18 }
 0x453   :  { %v3042_v19 = vadd.f32 %v3037_v11, %v3015_v34 }
 0x459   :  { %v3062_v59 = vpop.permute.xlu0 %3061 }
 0x45a   :  { %v3064_v44 = vpop.permute.xlu1 %3063  ;;  %v3067_v51 = vadd.f32 %v3062_v59, %v3042_v19 }
 0x45b   :  { %v3068_v1 = vadd.f32 %v3064_v44, %v3043_v31 }
 0x45d   :  { %v3080_v54 = vpop.permute.xlu0 %3079 }
 0x45e   :  { %v3082_v62 = vpop.permute.xlu1 %3081  ;;  %v3085_v6 = vadd.f32 %v3080_v54, %v3067_v51 }
 0x45f   :  { %v3086_v47 = vadd.f32 %v3082_v62, %v3068_v1 }
 0x461   :  { %v3093_v23 = vpop.permute.xlu0 %3092 }
 0x462   :  { %v3095_v22 = vadd.f32 %v3093_v23, %v3085_v6  ;;  %v3096_v41 = vadd.f32 %v3093_v23, %v3086_v47  ;;  %v3132_v46 = vpop.permute.xlu1 %3131 }
 0x464   :  { %v3098_v24 = vsel %vm3097_vm14, %v3095_v22, 0.0  ;;  %v3099_v2 = vsel %vm3097_vm14, %v3096_v41, 0.0 }
 0x465   :  { %v3100_v55 = vadd.f32 %v3099_v2, %v3098_v24  ;;  %v3142_v57 = vpop.permute.xlu0 %3141 }
 0x467   :  { %v3101_v3 = vrot.slane %v3100_v55, 4 }
 0x469   :  { %v3102_v13 = vadd.f32 %v3101_v3, %v3100_v55 }
 0x46b   :  { %v3103_v58 = vrot.slane %v3102_v13, 2 }
 0x46d   :  { %v3104_v45 = vadd.f32 %v3103_v58, %v3102_v13  ;;  %v3656_v13 = vld [vmem:[%s6237_s2 + $0x24] ss:$0 sm:$0xff] }
 0x46f   :  { %v3105_v8 = vrot.slane %v3104_v45, 1 }
 0x471   :  { %v3106_v42 = vadd.f32 %v3105_v8, %v3104_v45  ;;  %v3655_v45 = vld [vmem:[%s6237_s2 + $0x23] ss:$0 sm:$0xff] }
 0x473   :  { %v3107_v53 = vmul.f32 0.0625, %v3106_v42 }
 0x475   :  { %v3108_v56 = vsub.f32 %v3095_v22, %v3107_v53  ;;  %v3109_v4 = vsub.f32 %v3096_v41, %v3107_v53 }
 0x477   :  { %v3110_v29 = vmul.f32 %v3108_v56, %v3108_v56  ;;  %v3111_v20 = vmul.f32 %v3109_v4, %v3109_v4 }
 0x479   :  { %v3112_v28 = vsel %vm3097_vm14, %v3110_v29, 0.0  ;;  %v3113_v61 = vsel %vm3097_vm14, %v3111_v20, 0.0 }
 0x47a   :  { %v3114_v33 = vadd.f32 %v3113_v61, %v3112_v28 }
 0x47c   :  { %v3115_v32 = vrot.slane %v3114_v33, 4 }
 0x47e   :  { %v3116_v21 = vadd.f32 %v3115_v32, %v3114_v33 }
 0x480   :  { %v3117_v43 = vrot.slane %v3116_v21, 2 }
 0x482   :  { %v3118_v37 = vadd.f32 %v3117_v43, %v3116_v21 }
 0x484   :  { %v3119_v7 = vrot.slane %v3118_v37, 1 }
 0x486   :  { %v3120_v48 = vadd.f32 %v3119_v7, %v3118_v37 }
 0x488   :  { %v3121_v17 = vmul.f32 0.0625, %v3120_v48 }
 0x48a   :  { %v3122_v10 = vadd.f32 1e-05, %v3121_v17 }
 0x48c   :  { %3764 = vrsqrt.f32 %v3122_v10 }
 0x496   :  { %v3765_v50 = vpop.eup %3764 }
 0x497   :  { %v3124_v5 = vmul.f32 %v3765_v50, %v3108_v56  ;;  %v3125_v25 = vmul.f32 %v3765_v50, %v3109_v4 }
 0x499   :  { %v3134_v27 = vmul.f32 %v3132_v46, %v3124_v5  ;;  %v3135_v16 = vmul.f32 %v3132_v46, %v3125_v25 }
 0x49b   :  { %v3144_v39 = vadd.f32 %v3142_v57, %v3134_v27  ;;  %v3145_v0 = vadd.f32 %v3142_v57, %v3135_v16 }
 0x49d   :  { %v3146_v38 = vmax.f32 %v3144_v39, 0.0  ;;  %v3147_v26 = vmax.f32 %v3145_v0, 0.0 }
 0x49f   :  { %3152 = vrot.lane.b32.xlu0 %v3147_v26, %s3795_s21  ;;  %3150 = vrot.lane.b32.xlu1 %v3146_v38, %s3795_s21 }
 0x511   :  { %v3153_v14 = vpop.permute.xlu0 %3152  ;;  %v3151_v30 = vpop.permute.xlu1 %3150 }
 0x512   :  { %3685 = vmatprep.mubr.msk.f32.mxu1 %vm3154_vm15, %v3151_v30 }
 0x513   :  { %3686 = vmatmul.mubr.msk.f32.vlgmr.msra.gmra.mrb[0].mxu1 %vm3154_vm15, %v3153_v14 }
 0x5e6   :  { %v3687_v49 = vpop.f32.mrb[0].mxu1 }
 0x5e7   :  { %3254 = vrot.lane.b32.xlu0 %v3687_v49, %s3796_s9  ;;  %v3225_v52 = vpop.f32.mrb[1].mxu1  ;;  %v3235_v40 = vrot.slane %v3687_v49, 4 }
 0x5e8   :  { %3252 = vrot.lane.b32.xlu1 %v3225_v52, %s3796_s9  ;;  %v3234_v15 = vrot.slane %v3225_v52, 4 }
 0x5ea   :  { %v3236_v35 = vsel %vm3000_vm0, %v3234_v15, %v3235_v40  ;;  %v3237_v9 = vsel %vm3000_vm0, %v3235_v40, %v3234_v15 }
 0x5eb   :  { %3276 = vrot.lane.b32.xlu0 %v3687_v49, %s3797_s10  ;;  %v3238_v11 = vsel %vm3003_vm8, %v3237_v9, 0.0 }
 0x5ec   :  { %3274 = vrot.lane.b32.xlu1 %v3225_v52, %s3797_s10 }
 0x5ef   :  { %3298 = vrot.lane.b32.xlu0 %v3687_v49, %s3793_s0 }
 0x5f0   :  { %3296 = vrot.lane.b32.xlu1 %v3225_v52, %s3793_s0 }
 0x5f3   :  { %3244 = vrot.lane.b32.xlu0 %v3236_v35, %s3798_s11 }
 0x5f4   :  { %3242 = vrot.lane.b32.xlu1 %v3238_v11, %s3798_s11 }
 0x659   :  { %v3255_v60 = vpop.permute.xlu0 %3254 }
 0x65a   :  { %v3259_v18 = vrot.slane %v3255_v60, 6  ;;  %v3253_v59 = vpop.permute.xlu1 %3252 }
 0x65b   :  { %v3258_v34 = vrot.slane %v3253_v59, 6 }
 0x65d   :  { %v3277_v44 = vpop.permute.xlu0 %3276  ;;  %v3260_v31 = vsel %vm3027_vm9, %v3258_v34, %v3259_v18  ;;  %v3261_v41 = vsel %vm3027_vm9, %v3259_v18, %v3258_v34 }
 0x65e   :  { %v3281_v19 = vrot.slane %v3277_v44, 2  ;;  %v3275_v1 = vpop.permute.xlu1 %3274  ;;  %3268 = vrot.lane.b32.xlu0 %v3260_v31, %s3798_s11  ;;  %v3262_v2 = vsel %vm3030_vm10, %v3261_v41, 0.0 }
 0x65f   :  { %v3280_v54 = vrot.slane %v3275_v1, 2 }
 0x661   :  { %v3299_v51 = vpop.permute.xlu0 %3298  ;;  %v3282_v62 = vsel %vm3052_vm11, %v3280_v54, %v3281_v19  ;;  %v3283_v47 = vsel %vm3052_vm11, %v3281_v19, %v3280_v54 }
 0x662   :  { %v3303_v6 = vrot.slane %v3299_v51, 4  ;;  %v3297_v23 = vpop.permute.xlu1 %3296  ;;  %3288 = vrot.lane.b32.xlu1 %v3282_v62, %s3798_s11  ;;  %v3285_v22 = vsel %vm3056_vm12, %v3283_v47, 0.0  ;;  %v3799_v62 = vmov 0.0|0.0  }
 0x663   :  { %v3302_v24 = vrot.slane %v3297_v23, 4  ;;  %3290 = vrot.lane.b32.xlu0 %v3285_v22, %s3798_s11  ;;  %3745 = vmatprep.subr.bf16.mxu1 %v3799_v62 }
 0x665   :  { %v3305_v55 = vsel %vm3000_vm0, %v3303_v6, %v3302_v24  ;;  %v3304_v58 = vsel %vm3000_vm0, %v3302_v24, %v3303_v6  ;;  %v3245_v8 = vpop.permute.xlu0 %3244 }
 0x666   :  { %3266 = vrot.lane.b32.xlu1 %v3262_v2, %s3798_s11  ;;  %v3307_v3 = vsel %vm3074_vm13, %v3305_v55, 0.0  ;;  %v3243_v42 = vpop.permute.xlu1 %3242  ;;  %v3249_v28 = vadd.f32 %v3687_v49, %v3245_v8 }
 0x667   :  { %3312 = vrot.lane.b32.xlu0 %v3307_v3, %s3798_s11  ;;  %v3248_v29 = vadd.f32 %v3243_v42, %v3225_v52  ;;  %v6254_v3 = vld [vmem:[#allocation5_spill] sm:$0xff] }
 0x66a   :  { %3310 = vrot.lane.b32.xlu1 %v3304_v58, %s3798_s11 }
 0x66b   :  { %3361 = vrot.lane.b32.xlu0 %v3656_v13, %s3798_s11  ;;  %v3382_v13 = vand.u32 1, %v6254_v3 }
 0x66d   :  { %vm3390_vm1 = vcmp.eq.s32.totalorder %v3382_v13, %v6253_v36 }
 0x66e   :  { %3323 = vrot.lane.b32.xlu1 %v3655_v45, %s3798_s11  ;;  %v3391_v42 = vsel %vm3390_vm1, 0.125, %v6252_v12 }
 0x672   :  { %3371 = vrot.lane.b32.xlu1 %v3657_v63, %s3798_s11 }
 0x6d0   :  { %v3269_v53 = vpop.permute.xlu0 %3268 }
 0x6d1   :  { %v3273_v33 = vadd.f32 %v3269_v53, %v3249_v28  ;;  %v27_v53 = vld [vmem:[%s6237_s2 + $0x28] sm:$0xff] }
 0x6d4   :  { %v3289_v56 = vpop.permute.xlu1 %3288 }
 0x6d5   :  { %v3291_v4 = vpop.permute.xlu0 %3290 }
 0x6d6   :  { %v3295_v37 = vadd.f32 %v3291_v4, %v3273_v33  ;;  %v28_v4 = vld [vmem:[%s6237_s2 + $0x30] sm:$0x3] }
 0x6d8   :  { %v3267_v20 = vpop.permute.xlu1 %3266 }
 0x6d9   :  { %v3272_v61 = vadd.f32 %v3267_v20, %v3248_v29  ;;  %v3313_v21 = vpop.permute.xlu0 %3312  ;;  %v3659_v29 = vld [vmem:[%s6237_s2 + $0x26] ss:$0 sm:$0xff] }
 0x6da   :  { %v3317_v7 = vadd.f32 %v3313_v21, %v3295_v37 }
 0x6db   :  { %v3294_v32 = vadd.f32 %v3289_v56, %v3272_v61 }
 0x6dc   :  { %v3311_v43 = vpop.permute.xlu1 %3310 }
 0x6dd   :  { %v3316_v48 = vadd.f32 %v3311_v43, %v3294_v32  ;;  %v3362_v1 = vpop.permute.xlu0 %3361 }
 0x6e0   :  { %v3324_v17 = vpop.permute.xlu1 %3323 }
 0x6e1   :  { %v3326_v10 = vadd.f32 %v3324_v17, %v3316_v48  ;;  %v3327_v50 = vadd.f32 %v3324_v17, %v3317_v7 }
 0x6e3   :  { %v3328_v46 = vsel %vm1617_vm2, %v3326_v10, 0.0  ;;  %v3329_v5 = vsel %vm1617_vm2, %v3327_v50, 0.0 }
 0x6e4   :  { %v3330_v25 = vadd.f32 %v3329_v5, %v3328_v46  ;;  %v3372_v47 = vpop.permute.xlu1 %3371 }
 0x6e6   :  { %v3331_v57 = vrot.slane %v3330_v25, 4 }
 0x6e8   :  { %v3332_v27 = vadd.f32 %v3331_v57, %v3330_v25 }
 0x6ea   :  { %v3333_v16 = vrot.slane %v3332_v27, 2 }
 0x6ec   :  { %v3334_v39 = vadd.f32 %v3333_v16, %v3332_v27 }
 0x6ee   :  { %v3335_v0 = vrot.slane %v3334_v39, 1 }
 0x6f0   :  { %v3336_v38 = vadd.f32 %v3335_v0, %v3334_v39 }
 0x6f2   :  { %v3337_v26 = vmul.f32 0.0625, %v3336_v38 }
 0x6f4   :  { %v3338_v14 = vsub.f32 %v3326_v10, %v3337_v26  ;;  %v3339_v30 = vsub.f32 %v3327_v50, %v3337_v26 }
 0x6f6   :  { %v3340_v49 = vmul.f32 %v3338_v14, %v3338_v14  ;;  %v3341_v52 = vmul.f32 %v3339_v30, %v3339_v30 }
 0x6f8   :  { %v3342_v40 = vsel %vm1617_vm2, %v3340_v49, 0.0  ;;  %v3343_v15 = vsel %vm1617_vm2, %v3341_v52, 0.0  ;;  %vm3800_vm2 = vmmov 0  }
 0x6f9   :  { %v3344_v35 = vadd.f32 %v3343_v15, %v3342_v40  ;;  %3692 = vmatprep.mubr.msk.f32.mxu1 %vm3800_vm2, %v6252_v12 }
 0x6fb   :  { %v3345_v9 = vrot.slane %v3344_v35, 4 }
 0x6fd   :  { %v3346_v11 = vadd.f32 %v3345_v9, %v3344_v35 }
 0x6ff   :  { %v3347_v60 = vrot.slane %v3346_v11, 2 }
 0x701   :  { %v3348_v18 = vadd.f32 %v3347_v60, %v3346_v11 }
 0x703   :  { %v3349_v59 = vrot.slane %v3348_v18, 1 }
 0x705   :  { %v3350_v34 = vadd.f32 %v3349_v59, %v3348_v18 }
 0x707   :  { %v3351_v44 = vmul.f32 0.0625, %v3350_v34 }
 0x709   :  { %v3352_v31 = vadd.f32 1e-05, %v3351_v44 }
 0x70b   :  { %3766 = vrsqrt.f32 %v3352_v31 }
 0x715   :  { %v3767_v19 = vpop.eup %3766 }
 0x716   :  { %v3354_v54 = vmul.f32 %v3767_v19, %v3338_v14  ;;  %v3355_v51 = vmul.f32 %v3767_v19, %v3339_v30 }
 0x718   :  { %v3364_v6 = vmul.f32 %v3362_v1, %v3354_v54  ;;  %v3365_v23 = vmul.f32 %v3362_v1, %v3355_v51 }
 0x71a   :  { %v3374_v22 = vadd.f32 %v3372_v47, %v3364_v6  ;;  %v3375_v41 = vadd.f32 %v3372_v47, %v3365_v23 }
 0x71c   :  { %v3376_v24 = vmax.f32 %v3374_v22, 0.0  ;;  %v3377_v2 = vmax.f32 %v3375_v41, 0.0 }
 0x71e   :  { %v3759_v55 = vpack.i.bf16 %v3377_v2, %v3376_v24 }
 0x720   :  { %3760 = vrot.lane.b32.xlu0 %v3759_v55, %s3801_s17 }
 0x792   :  { %v3761_v58 = vpop.permute.xlu0 %3760 }
 0x793   :  { %v3763_v45 = vunpack.i.h.bf16 %v3761_v58  ;;  %v3762_v63 = vunpack.i.l.bf16 %v3761_v58 }
 0x795   :  { %v3746_v8 = vpack.c.bf16 %v3763_v45, %v3762_v63 }
 0x797   :  { %3747 = vmatpush3.bf16.msra.mxu1 %v3746_v8 }
 0x798   :  { %3695 = vmatprep.subr.mxu1 %v6252_v12 }
 0x79a   :  { %3693 = vmatmul.mubr.msk.f32.vlgmr.msra.gmra.mrb[2].mxu1 %vm6255_vm3, %v3391_v42 }
 0x79b   :  { %3696 = vmatpush3.msra.mxu1 %v27_v53  ;;  %3697 = vmatprep.mubr.msk.f32.mxu1 %vm3800_vm2, %v6252_v12 }
 0x79c   :  { %3700 = vmatprep.subr.mxu1 %v6252_v12 }
 0x86d   :  { %v3469_v36 = vpop.f32.mrb[2].mxu1 }
 0x86e   :  { %v3694_v56 = vpop.f32.mrb[3].mxu1  ;;  %3698 = vmatmul.mubr.msk.f32.vlgmr.msra.gmra.mrb[4].mxu1 %vm3477_vm4, %v3469_v36 }
 0x86f   :  { %3702 = vmatprep.mubr.msk.f32.mxu1 %vm3800_vm2, %v6252_v12  ;;  %3701 = vmatpush3.msk.msra.mxu1 %vm3560_vm5, %v28_v4  ;;  %v3661_v12 = vld [vmem:[%s6237_s2 + $0x27] ss:$0 sm:$0xff] }
 0x941   :  { %v3547_v20 = vpop.f32.mrb[4].mxu1 }
 0x942   :  { %v3548_v28 = vadd.f32 %v3659_v29, %v3547_v20  ;;  %v3699_v61 = vpop.f32.mrb[5].mxu1 }
 0x944   :  { %v3551_v33 = vmax.f32 %v3548_v28, 0.0 }
 0x946   :  { %3703 = vmatmul.mubr.msk.f32.vlgmr.msra.gmra.mrb[6].mxu1 %vm3556_vm6, %v3551_v33 }
 0xa19   :  { %v3630_v32 = vpop.f32.mrb[6].mxu1 }
 0xa1a   :  { %v3631_v21 = vadd.f32 %v3661_v12, %v3630_v32  ;;  %v3704_v43 = vpop.f32.mrb[7].mxu1 }
 0xa1c   :  { %3635 = vst.msk [vmem:[#allocation2] sm:$0x3] %vm3634_vm7, %v3631_v21 }
 0xa1d   :  { %3779 = shalt.err (!%p3776_p4)
}
 0xa1e   :  { %s3780_s30 = scalar_lea.hbm %s6238_s3, 32 }
 0xa1f   :  { %p3781_p5 = scmp.ne.s32.totalorder %s6238_s3, %s3780_s30  ;;  %p3784_p6 = scmp.lt.u32.totalorder %s3780_s30, %s6238_s3 }
 0xa21   :  { %p3786_p7 = pnand %p3784_p6, %p3781_p5 }
 0xa23   :  { %3789 = shalt.err (!%p3786_p7)
}
 0xa24   :  { %3645 = dma.vmem_to_hbm [thread:$0]  %s3643_s26, 32, %s6238_s3, [#allocation3]  }
 0xa25   :  { %3790 = dma.done.wait [#allocation3], 32  }
 0xa26   :  { %3791 = vsyncadd [#allocation3], 4294967264 }
 0xa27   :  { %3649 = vsyncpa [#allocation3], 1 }

</bundles_post_ra>
